<compile_context>
chip_gen: v6e
topology: v6e:2x2x1
jax: 0.10.0
libtpu: 0.0.40
codegen_flags: <defaults>
</compile_context>

<pallas_src>
import functools

import jax
import jax.numpy as jnp
from jax.experimental import pallas as pl
from jax.experimental.pallas import tpu as pltpu


# ----------------------------------------------------------------------------
# Fused Pallas kernel: full Decoder forward
# ----------------------------------------------------------------------------
def _decoder_kernel(x_ref, wih1_ref, whh1_ref, b1_ref,
                    wih2_ref, whh2_ref, b2_ref, wo_ref, bo_ref,
                    out_ref, *, T, H1, H2):
    """Fused 2-layer LSTM decoder + output Linear + Sigmoid.

    x_ref    : (B, T, D1)   batch-first input sequence (B padded to mult. of 8)
    wih1_ref : (D1, 4*H1)   layer-1 W_ih^T, gate columns ordered [i,f,o,g]
    whh1_ref : (H1, 4*H1)   layer-1 W_hh^T, same gate order
    b1_ref   : (1, 4*H1)    layer-1 b_ih + b_hh, same gate order
    wih2_ref : (H1, 4*H2)   layer-2 W_ih^T
    whh2_ref : (H2, 4*H2)   layer-2 W_hh^T
    b2_ref   : (1, 4*H2)    layer-2 b_ih + b_hh
    wo_ref   : (H2, F)      output Linear weight (transposed)
    bo_ref   : (1, F)       output Linear bias
    out_ref  : (B, T, F)    decoder output (reshaped to (B, T*F) in wrapper)
    """
    x = x_ref[...]
    wih1 = wih1_ref[...]
    whh1 = whh1_ref[...]
    b1 = b1_ref[...]
    wih2 = wih2_ref[...]
    whh2 = whh2_ref[...]
    b2 = b2_ref[...]
    wo = wo_ref[...]
    bo = bo_ref[...]

    B = x.shape[0]
    D1 = x.shape[2]
    F = wo.shape[1]
    # Matmul operand dtype follows the prepped weights (f32 by default; bf16
    # if prepare_decoder_params was called with matmul_dtype=jnp.bfloat16 on
    # v6e/v7x). Accumulation is always f32 via preferred_element_type.
    mm_dtype = wih1.dtype

    # ---- Layer-1 input->gates contribution for ALL timesteps (one matmul,
    #      fully overlappable, off the serial recurrence path). Bias folded. --
    xw1 = jnp.dot(x.reshape(B * T, D1).astype(mm_dtype), wih1,
                  preferred_element_type=jnp.float32) + b1          # (B*T, 4H1)
    xw1 = xw1.reshape(B, T, 4 * H1)

    def lstm_cell(gates, c, H):
        # Gate column order is [i, f, o, g] (prep-time permutation):
        # one contiguous sigmoid pass + one tanh pass on the EUP.
        sig = jax.nn.sigmoid(gates[:, :3 * H])
        i_g = sig[:, 0:H]
        f_g = sig[:, H:2 * H]
        o_g = sig[:, 2 * H:3 * H]
        g_g = jnp.tanh(gates[:, 3 * H:])
        c_new = f_g * c + i_g * g_g
        h_new = o_g * jnp.tanh(c_new)
        return h_new, c_new

    h1 = jnp.zeros((B, H1), jnp.float32)
    c1 = jnp.zeros((B, H1), jnp.float32)
    h2 = jnp.zeros((B, H2), jnp.float32)
    c2 = jnp.zeros((B, H2), jnp.float32)

    ys = []
    # T is a small static constant -> fully unrolled; the LLO scheduler sees
    # the whole schedule and can co-issue MXU / VPU / EUP work across steps.
    for t in range(T):
        # Layer 1: only the h1 @ W_hh1 dot sits on the recurrence chain.
        gates1 = xw1[:, t, :] + jnp.dot(h1.astype(mm_dtype), whh1,
                                        preferred_element_type=jnp.float32)
        h1, c1 = lstm_cell(gates1, c1, H1)
        y1 = jnp.maximum(h1, 0.0)   # hidden_activation (ReLU); dropout = id (eval)

        # Layer 2: two accumulating dots, no lane-concat.
        gates2 = (jnp.dot(y1.astype(mm_dtype), wih2,
                          preferred_element_type=jnp.float32)
                  + jnp.dot(h2.astype(mm_dtype), whh2,
                            preferred_element_type=jnp.float32)
                  + b2)
        h2, c2 = lstm_cell(gates2, c2, H2)
        ys.append(jnp.maximum(h2, 0.0))   # ReLU; dropout = identity (eval)

    # ---- Hoisted output head: ONE matmul + ONE sigmoid + ONE store. ----------
    y2_all = jnp.stack(ys, axis=1).reshape(B * T, H2)                # (B*T, H2)
    head = jnp.dot(y2_all.astype(mm_dtype), wo,
                   preferred_element_type=jnp.float32) + bo          # (B*T, F)
    out_ref[...] = jax.nn.sigmoid(head).reshape(B, T, F).astype(out_ref.dtype)


# ----------------------------------------------------------------------------
# Wrappers
# ----------------------------------------------------------------------------
def prepare_decoder_params(raw_params, matmul_dtype=jnp.float32):
    """One-time weight prep (amortized across forward calls).

    raw_params: {"lstms": [(w_ih(4H,D), w_hh(4H,H), b_ih(4H,), b_hh(4H,)), ...],
                 "w_out": (F,F), "b_out": (F,)}
    matmul_dtype: jnp.float32 everywhere; jnp.bfloat16 is a good choice on
      v6e/v7x (native bf16 MXU), keep f32 on v5e.
    """
    def permute_gates(a):
        # PyTorch gate-row order [i, f, g, o] -> kernel order [i, f, o, g].
        H = a.shape[0] // 4
        return jnp.concatenate([a[0:2 * H], a[3 * H:4 * H], a[2 * H:3 * H]],
                               axis=0)

    lstms = []
    for (w_ih, w_hh, b_ih, b_hh) in raw_params["lstms"]:
        w_ih = permute_gates(jnp.asarray(w_ih, jnp.float32))
        w_hh = permute_gates(jnp.asarray(w_hh, jnp.float32))
        b = permute_gates(jnp.asarray(b_ih, jnp.float32)
                          + jnp.asarray(b_hh, jnp.float32))
        lstms.append((w_ih.T.astype(matmul_dtype),     # (Din, 4H)
                      w_hh.T.astype(matmul_dtype),     # (H, 4H)
                      b[None, :]))                     # (1, 4H), f32 bias
    w_out = jnp.asarray(raw_params["w_out"], jnp.float32).T.astype(matmul_dtype)
    b_out = jnp.asarray(raw_params["b_out"], jnp.float32)[None, :]
    return {"lstms": lstms, "w_out": w_out, "b_out": b_out}


def decoder_forward_pallas(w_btd, params):
    """Full Decoder.forward in a single fused pallas_call.

    w_btd : (B, T, hidden_neurons[mid]) batch-first input.
    params: output of prepare_decoder_params (exactly 2 LSTM layers, per the
            hidden_neurons=[16,8,16] config).
    Returns (B, T * n_features), matching the PyTorch reshape.
    The `hidden` argument of the PyTorch forward is unused there (LSTMs always
    start from zero state), so it is omitted here.
    """
    B0, T, D1 = w_btd.shape
    (wih1, whh1, b1), (wih2, whh2, b2) = params["lstms"]
    wo, bo = params["w_out"], params["b_out"]
    H1 = wih1.shape[1] // 4
    H2 = wih2.shape[1] // 4
    F = wo.shape[1]
    assert H2 == F, "last LSTM must output n_features"

    # Pad batch to a full sublane group (multiple of 8) for vreg occupancy;
    # padded rows are sliced off below.
    B = max(8, ((B0 + 7) // 8) * 8)
    x = jnp.asarray(w_btd, jnp.float32)
    if B != B0:
        x = jnp.pad(x, ((0, B - B0), (0, 0), (0, 0)))

    kernel = functools.partial(_decoder_kernel, T=T, H1=H1, H2=H2)

    # Advisory cost estimate (matmuls + transcendentals + bytes touched).
    mm_flops = 2 * B * T * (D1 * 4 * H1 + H1 * 4 * H1
                            + H1 * 4 * H2 + H2 * 4 * H2 + H2 * F)
    transc = B * T * (5 * H1 + 5 * H2 + F)
    bytes_acc = 4 * (x.size + wih1.size + whh1.size + b1.size
                     + wih2.size + whh2.size + b2.size
                     + wo.size + bo.size + B * T * F)
    cost = pl.CostEstimate(flops=int(mm_flops),
                           transcendentals=int(transc),
                           bytes_accessed=int(bytes_acc))

    # Whole arrays resident in VMEM; no grid / pipelining at these tiny sizes.
    vmem_spec = pl.BlockSpec(memory_space=pltpu.MemorySpace.VMEM)

    out3 = pl.pallas_call(
        kernel,
        out_shape=jax.ShapeDtypeStruct((B, T, F), jnp.float32),
        in_specs=[vmem_spec] * 9,
        out_specs=vmem_spec,
        cost_estimate=cost,
    )(x, wih1, whh1, b1, wih2, whh2, b2, wo, bo)

    # Free metadata reshape in XLA, then drop padded batch rows.
    return out3.reshape(B, T * F)[:B0]


# ----------------------------------------------------------------------------
# Pure-JAX reference (mirrors torch semantics) for a correctness check
# ----------------------------------------------------------------------------
def _lstm_ref(x_btd, w_ih, w_hh, b_ih, b_hh):
    B, T, _ = x_btd.shape
    H = w_hh.shape[1]

    def step(carry, x_t):
        h, c = carry
        gates = x_t @ w_ih.T + b_ih + h @ w_hh.T + b_hh
        i, f, g, o = jnp.split(gates, 4, axis=-1)
        i, f, o = jax.nn.sigmoid(i), jax.nn.sigmoid(f), jax.nn.sigmoid(o)
        g = jnp.tanh(g)
        c = f * c + i * g
        h = o * jnp.tanh(c)
        return (h, c), h

    init = (jnp.zeros((B, H), jnp.float32), jnp.zeros((B, H), jnp.float32))
    _, ys = jax.lax.scan(step, init, jnp.swapaxes(x_btd, 0, 1))
    return jnp.swapaxes(ys, 0, 1)


def decoder_forward_ref(w_btd, raw_params):
    out = jnp.asarray(w_btd, jnp.float32)
    for (w_ih, w_hh, b_ih, b_hh) in raw_params["lstms"]:
        out = _lstm_ref(out, w_ih, w_hh, b_ih, b_hh)
        out = jnp.maximum(out, 0.0)          # hidden_activation = ReLU
        # dropout: identity (eval)
    out = out @ raw_params["w_out"].T + raw_params["b_out"]
    out = jax.nn.sigmoid(out)                # output_activation = Sigmoid
    return out.reshape(out.shape[0], out.shape[1] * out.shape[2])


# ----------------------------------------------------------------------------
# Main
# ----------------------------------------------------------------------------
if __name__ == "__main__":
    # Config
    n_features = 4
    seq_len = 8          # n_samples
    batch = 2            # wrapper pads to 8 internally for sublane occupancy
    hidden_neurons = [16, 8, 16]   # decoder consumes hidden_neurons[1:] sizes

    # Layer sizes implied by Decoder.__init__:
    #   LSTM(hidden_neurons[1]=8 -> hidden_neurons[2]=16)
    #   LSTM(hidden_neurons[-1]=16 -> n_features=4)
    lstm_dims = [(hidden_neurons[1], hidden_neurons[2]),
                 (hidden_neurons[-1], n_features)]

    key = jax.random.PRNGKey(0)
    keys = jax.random.split(key, 4 * len(lstm_dims) + 3)

    lstm_params = []
    ki = 0
    for (din, h) in lstm_dims:
        s = 1.0 / jnp.sqrt(h)
        w_ih = jax.random.uniform(keys[ki + 0], (4 * h, din), jnp.float32, -s, s)
        w_hh = jax.random.uniform(keys[ki + 1], (4 * h, h), jnp.float32, -s, s)
        b_ih = jax.random.uniform(keys[ki + 2], (4 * h,), jnp.float32, -s, s)
        b_hh = jax.random.uniform(keys[ki + 3], (4 * h,), jnp.float32, -s, s)
        lstm_params.append((w_ih, w_hh, b_ih, b_hh))
        ki += 4

    s = 1.0 / jnp.sqrt(n_features)
    w_out = jax.random.uniform(keys[ki + 0], (n_features, n_features),
                               jnp.float32, -s, s)
    b_out = jax.random.uniform(keys[ki + 1], (n_features,), jnp.float32, -s, s)
    raw_params = {"lstms": lstm_params, "w_out": w_out, "b_out": b_out}

    # One-time weight prep (transpose / gate reorder / bias folding).
    # On v6e/v7x, matmul_dtype=jnp.bfloat16 cuts MXU passes on the serial
    # recurrence chain; keep the f32 default for v5e and for the exact check.
    params = prepare_decoder_params(raw_params, matmul_dtype=jnp.float32)

    # Example input: w of shape (B, T, hidden_neurons[1]) = (2, 8, 8)
    w_in = jax.random.normal(keys[ki + 2], (batch, seq_len, hidden_neurons[1]),
                             jnp.float32)

    out = decoder_forward_pallas(w_in, params)
    out = jax.block_until_ready(out)

    ref = jax.block_until_ready(decoder_forward_ref(w_in, raw_params))
    assert out.shape == (batch, seq_len * n_features), out.shape
    assert jnp.allclose(out, ref, rtol=1e-4, atol=1e-4), (
        "mismatch vs pure-JAX reference: "
        f"max abs err {jnp.max(jnp.abs(out - ref))}")

    print("KERNEL_OK")
</pallas_src>

<mosaic_0001>
module attributes {stable_mosaic.version = 11 : i64} {
  func.func @_decoder_kernel(%arg0: memref<8x8x8xf32, #tpu.memory_space<vmem>>, %arg1: memref<8x64xf32, #tpu.memory_space<vmem>>, %arg2: memref<16x64xf32, #tpu.memory_space<vmem>>, %arg3: memref<1x64xf32, #tpu.memory_space<vmem>>, %arg4: memref<16x16xf32, #tpu.memory_space<vmem>>, %arg5: memref<4x16xf32, #tpu.memory_space<vmem>>, %arg6: memref<1x16xf32, #tpu.memory_space<vmem>>, %arg7: memref<4x4xf32, #tpu.memory_space<vmem>>, %arg8: memref<1x4xf32, #tpu.memory_space<vmem>>, %arg9: memref<8x8x4xf32, #tpu.memory_space<vmem>>) attributes {dimension_semantics = [], scalar_prefetch = 0 : i64, scratch_operands = 0 : i64, tpu.core_type = #tpu.core_type<tc>} {
    %c0 = arith.constant 0 : index
    %c0_0 = arith.constant 0 : index
    %c0_1 = arith.constant 0 : index
    %0 = vector.load %arg0[%c0, %c0_0, %c0_1] : memref<8x8x8xf32, #tpu.memory_space<vmem>>, vector<8x8x8xf32>
    %c0_2 = arith.constant 0 : index
    %c0_3 = arith.constant 0 : index
    %1 = vector.load %arg1[%c0_2, %c0_3] : memref<8x64xf32, #tpu.memory_space<vmem>>, vector<8x64xf32>
    %c0_4 = arith.constant 0 : index
    %c0_5 = arith.constant 0 : index
    %2 = vector.load %arg2[%c0_4, %c0_5] : memref<16x64xf32, #tpu.memory_space<vmem>>, vector<16x64xf32>
    %c0_6 = arith.constant 0 : index
    %c0_7 = arith.constant 0 : index
    %3 = vector.load %arg3[%c0_6, %c0_7] : memref<1x64xf32, #tpu.memory_space<vmem>>, vector<1x64xf32>
    %c0_8 = arith.constant 0 : index
    %c0_9 = arith.constant 0 : index
    %4 = vector.load %arg4[%c0_8, %c0_9] : memref<16x16xf32, #tpu.memory_space<vmem>>, vector<16x16xf32>
    %c0_10 = arith.constant 0 : index
    %c0_11 = arith.constant 0 : index
    %5 = vector.load %arg5[%c0_10, %c0_11] : memref<4x16xf32, #tpu.memory_space<vmem>>, vector<4x16xf32>
    %c0_12 = arith.constant 0 : index
    %c0_13 = arith.constant 0 : index
    %6 = vector.load %arg6[%c0_12, %c0_13] : memref<1x16xf32, #tpu.memory_space<vmem>>, vector<1x16xf32>
    %c0_14 = arith.constant 0 : index
    %c0_15 = arith.constant 0 : index
    %7 = vector.load %arg7[%c0_14, %c0_15] : memref<4x4xf32, #tpu.memory_space<vmem>>, vector<4x4xf32>
    %c0_16 = arith.constant 0 : index
    %c0_17 = arith.constant 0 : index
    %8 = vector.load %arg8[%c0_16, %c0_17] : memref<1x4xf32, #tpu.memory_space<vmem>>, vector<1x4xf32>
    %9 = vector.shape_cast %0 : vector<8x8x8xf32> to vector<64x8xf32>
    %cst = arith.constant dense<0.000000e+00> : vector<64x64xf32>
    %10 = tpu.matmul %9, %1, %cst {dimension_numbers = #tpu.dot_dimension_numbers<[1], [0], [0], [1], [0, 0, 1, 1], [], []>} : vector<64x8xf32>, vector<8x64xf32>, vector<64x64xf32> -> vector<64x64xf32>
    %11 = vector.broadcast %3 : vector<1x64xf32> to vector<64x64xf32>
    %12 = arith.addf %10, %11 : vector<64x64xf32>
    %13 = vector.shape_cast %12 : vector<64x64xf32> to vector<8x8x64xf32>
    %cst_18 = arith.constant 0.000000e+00 : f32
    %14 = vector.broadcast %cst_18 : f32 to vector<8x16xf32>
    %cst_19 = arith.constant 0.000000e+00 : f32
    %15 = vector.broadcast %cst_19 : f32 to vector<8x16xf32>
    %cst_20 = arith.constant 0.000000e+00 : f32
    %16 = vector.broadcast %cst_20 : f32 to vector<8x4xf32>
    %cst_21 = arith.constant 0.000000e+00 : f32
    %17 = vector.broadcast %cst_21 : f32 to vector<8x4xf32>
    %18 = vector.extract_strided_slice %13 {offsets = [0, 0, 0], sizes = [8, 1, 64], strides = [1, 1, 1]} : vector<8x8x64xf32> to vector<8x1x64xf32>
    %19 = vector.shape_cast %18 : vector<8x1x64xf32> to vector<8x64xf32>
    %cst_22 = arith.constant dense<0.000000e+00> : vector<8x64xf32>
    %20 = tpu.matmul %14, %2, %cst_22 {dimension_numbers = #tpu.dot_dimension_numbers<[1], [0], [0], [1], [0, 0, 1, 1], [], []>} : vector<8x16xf32>, vector<16x64xf32>, vector<8x64xf32> -> vector<8x64xf32>
    %21 = arith.addf %19, %20 : vector<8x64xf32>
    %22 = vector.extract_strided_slice %21 {offsets = [0, 0], sizes = [8, 48], strides = [1, 1]} : vector<8x64xf32> to vector<8x48xf32>
    %23 = arith.negf %22 : vector<8x48xf32>
    %24 = math.exp %23 : vector<8x48xf32>
    %cst_23 = arith.constant 1.000000e+00 : f32
    %25 = vector.broadcast %cst_23 : f32 to vector<8x48xf32>
    %26 = arith.addf %25, %24 : vector<8x48xf32>
    %27 = arith.divf %25, %26 : vector<8x48xf32>
    %28 = vector.extract_strided_slice %27 {offsets = [0, 0], sizes = [8, 16], strides = [1, 1]} : vector<8x48xf32> to vector<8x16xf32>
    %29 = vector.extract_strided_slice %27 {offsets = [0, 16], sizes = [8, 16], strides = [1, 1]} : vector<8x48xf32> to vector<8x16xf32>
    %30 = vector.extract_strided_slice %27 {offsets = [0, 32], sizes = [8, 16], strides = [1, 1]} : vector<8x48xf32> to vector<8x16xf32>
    %31 = vector.extract_strided_slice %21 {offsets = [0, 48], sizes = [8, 16], strides = [1, 1]} : vector<8x64xf32> to vector<8x16xf32>
    %32 = math.tanh %31 : vector<8x16xf32>
    %33 = arith.mulf %29, %15 : vector<8x16xf32>
    %34 = arith.mulf %28, %32 : vector<8x16xf32>
    %35 = arith.addf %33, %34 : vector<8x16xf32>
    %36 = math.tanh %35 : vector<8x16xf32>
    %37 = arith.mulf %30, %36 : vector<8x16xf32>
    %cst_24 = arith.constant 0.000000e+00 : f32
    %38 = vector.broadcast %cst_24 : f32 to vector<8x16xf32>
    %39 = arith.maximumf %37, %38 : vector<8x16xf32>
    %cst_25 = arith.constant dense<0.000000e+00> : vector<8x16xf32>
    %40 = tpu.matmul %39, %4, %cst_25 {dimension_numbers = #tpu.dot_dimension_numbers<[1], [0], [0], [1], [0, 0, 1, 1], [], []>} : vector<8x16xf32>, vector<16x16xf32>, vector<8x16xf32> -> vector<8x16xf32>
    %cst_26 = arith.constant dense<0.000000e+00> : vector<8x16xf32>
    %41 = tpu.matmul %16, %5, %cst_26 {dimension_numbers = #tpu.dot_dimension_numbers<[1], [0], [0], [1], [0, 0, 1, 1], [], []>} : vector<8x4xf32>, vector<4x16xf32>, vector<8x16xf32> -> vector<8x16xf32>
    %42 = arith.addf %40, %41 : vector<8x16xf32>
    %43 = vector.broadcast %6 : vector<1x16xf32> to vector<8x16xf32>
    %44 = arith.addf %42, %43 : vector<8x16xf32>
    %45 = vector.extract_strided_slice %44 {offsets = [0, 0], sizes = [8, 12], strides = [1, 1]} : vector<8x16xf32> to vector<8x12xf32>
    %46 = arith.negf %45 : vector<8x12xf32>
    %47 = math.exp %46 : vector<8x12xf32>
    %cst_27 = arith.constant 1.000000e+00 : f32
    %48 = vector.broadcast %cst_27 : f32 to vector<8x12xf32>
    %49 = arith.addf %48, %47 : vector<8x12xf32>
    %50 = arith.divf %48, %49 : vector<8x12xf32>
    %51 = vector.extract_strided_slice %50 {offsets = [0, 0], sizes = [8, 4], strides = [1, 1]} : vector<8x12xf32> to vector<8x4xf32>
    %52 = vector.extract_strided_slice %50 {offsets = [0, 4], sizes = [8, 4], strides = [1, 1]} : vector<8x12xf32> to vector<8x4xf32>
    %53 = vector.extract_strided_slice %50 {offsets = [0, 8], sizes = [8, 4], strides = [1, 1]} : vector<8x12xf32> to vector<8x4xf32>
    %54 = vector.extract_strided_slice %44 {offsets = [0, 12], sizes = [8, 4], strides = [1, 1]} : vector<8x16xf32> to vector<8x4xf32>
    %55 = math.tanh %54 : vector<8x4xf32>
    %56 = arith.mulf %52, %17 : vector<8x4xf32>
    %57 = arith.mulf %51, %55 : vector<8x4xf32>
    %58 = arith.addf %56, %57 : vector<8x4xf32>
    %59 = math.tanh %58 : vector<8x4xf32>
    %60 = arith.mulf %53, %59 : vector<8x4xf32>
    %cst_28 = arith.constant 0.000000e+00 : f32
    %61 = vector.broadcast %cst_28 : f32 to vector<8x4xf32>
    %62 = arith.maximumf %60, %61 : vector<8x4xf32>
    %63 = vector.extract_strided_slice %13 {offsets = [0, 1, 0], sizes = [8, 1, 64], strides = [1, 1, 1]} : vector<8x8x64xf32> to vector<8x1x64xf32>
    %64 = vector.shape_cast %63 : vector<8x1x64xf32> to vector<8x64xf32>
    %cst_29 = arith.constant dense<0.000000e+00> : vector<8x64xf32>
    %65 = tpu.matmul %37, %2, %cst_29 {dimension_numbers = #tpu.dot_dimension_numbers<[1], [0], [0], [1], [0, 0, 1, 1], [], []>} : vector<8x16xf32>, vector<16x64xf32>, vector<8x64xf32> -> vector<8x64xf32>
    %66 = arith.addf %64, %65 : vector<8x64xf32>
    %67 = vector.extract_strided_slice %66 {offsets = [0, 0], sizes = [8, 48], strides = [1, 1]} : vector<8x64xf32> to vector<8x48xf32>
    %68 = arith.negf %67 : vector<8x48xf32>
    %69 = math.exp %68 : vector<8x48xf32>
    %cst_30 = arith.constant 1.000000e+00 : f32
    %70 = vector.broadcast %cst_30 : f32 to vector<8x48xf32>
    %71 = arith.addf %70, %69 : vector<8x48xf32>
    %72 = arith.divf %70, %71 : vector<8x48xf32>
    %73 = vector.extract_strided_slice %72 {offsets = [0, 0], sizes = [8, 16], strides = [1, 1]} : vector<8x48xf32> to vector<8x16xf32>
    %74 = vector.extract_strided_slice %72 {offsets = [0, 16], sizes = [8, 16], strides = [1, 1]} : vector<8x48xf32> to vector<8x16xf32>
    %75 = vector.extract_strided_slice %72 {offsets = [0, 32], sizes = [8, 16], strides = [1, 1]} : vector<8x48xf32> to vector<8x16xf32>
    %76 = vector.extract_strided_slice %66 {offsets = [0, 48], sizes = [8, 16], strides = [1, 1]} : vector<8x64xf32> to vector<8x16xf32>
    %77 = math.tanh %76 : vector<8x16xf32>
    %78 = arith.mulf %74, %35 : vector<8x16xf32>
    %79 = arith.mulf %73, %77 : vector<8x16xf32>
    %80 = arith.addf %78, %79 : vector<8x16xf32>
    %81 = math.tanh %80 : vector<8x16xf32>
    %82 = arith.mulf %75, %81 : vector<8x16xf32>
    %cst_31 = arith.constant 0.000000e+00 : f32
    %83 = vector.broadcast %cst_31 : f32 to vector<8x16xf32>
    %84 = arith.maximumf %82, %83 : vector<8x16xf32>
    %cst_32 = arith.constant dense<0.000000e+00> : vector<8x16xf32>
    %85 = tpu.matmul %84, %4, %cst_32 {dimension_numbers = #tpu.dot_dimension_numbers<[1], [0], [0], [1], [0, 0, 1, 1], [], []>} : vector<8x16xf32>, vector<16x16xf32>, vector<8x16xf32> -> vector<8x16xf32>
    %cst_33 = arith.constant dense<0.000000e+00> : vector<8x16xf32>
    %86 = tpu.matmul %60, %5, %cst_33 {dimension_numbers = #tpu.dot_dimension_numbers<[1], [0], [0], [1], [0, 0, 1, 1], [], []>} : vector<8x4xf32>, vector<4x16xf32>, vector<8x16xf32> -> vector<8x16xf32>
    %87 = arith.addf %85, %86 : vector<8x16xf32>
    %88 = vector.broadcast %6 : vector<1x16xf32> to vector<8x16xf32>
    %89 = arith.addf %87, %88 : vector<8x16xf32>
    %90 = vector.extract_strided_slice %89 {offsets = [0, 0], sizes = [8, 12], strides = [1, 1]} : vector<8x16xf32> to vector<8x12xf32>
    %91 = arith.negf %90 : vector<8x12xf32>
    %92 = math.exp %91 : vector<8x12xf32>
    %cst_34 = arith.constant 1.000000e+00 : f32
    %93 = vector.broadcast %cst_34 : f32 to vector<8x12xf32>
    %94 = arith.addf %93, %92 : vector<8x12xf32>
    %95 = arith.divf %93, %94 : vector<8x12xf32>
    %96 = vector.extract_strided_slice %95 {offsets = [0, 0], sizes = [8, 4], strides = [1, 1]} : vector<8x12xf32> to vector<8x4xf32>
    %97 = vector.extract_strided_slice %95 {offsets = [0, 4], sizes = [8, 4], strides = [1, 1]} : vector<8x12xf32> to vector<8x4xf32>
    %98 = vector.extract_strided_slice %95 {offsets = [0, 8], sizes = [8, 4], strides = [1, 1]} : vector<8x12xf32> to vector<8x4xf32>
    %99 = vector.extract_strided_slice %89 {offsets = [0, 12], sizes = [8, 4], strides = [1, 1]} : vector<8x16xf32> to vector<8x4xf32>
    %100 = math.tanh %99 : vector<8x4xf32>
    %101 = arith.mulf %97, %58 : vector<8x4xf32>
    %102 = arith.mulf %96, %100 : vector<8x4xf32>
    %103 = arith.addf %101, %102 : vector<8x4xf32>
    %104 = math.tanh %103 : vector<8x4xf32>
    %105 = arith.mulf %98, %104 : vector<8x4xf32>
    %cst_35 = arith.constant 0.000000e+00 : f32
    %106 = vector.broadcast %cst_35 : f32 to vector<8x4xf32>
    %107 = arith.maximumf %105, %106 : vector<8x4xf32>
    %108 = vector.extract_strided_slice %13 {offsets = [0, 2, 0], sizes = [8, 1, 64], strides = [1, 1, 1]} : vector<8x8x64xf32> to vector<8x1x64xf32>
    %109 = vector.shape_cast %108 : vector<8x1x64xf32> to vector<8x64xf32>
    %cst_36 = arith.constant dense<0.000000e+00> : vector<8x64xf32>
    %110 = tpu.matmul %82, %2, %cst_36 {dimension_numbers = #tpu.dot_dimension_numbers<[1], [0], [0], [1], [0, 0, 1, 1], [], []>} : vector<8x16xf32>, vector<16x64xf32>, vector<8x64xf32> -> vector<8x64xf32>
    %111 = arith.addf %109, %110 : vector<8x64xf32>
    %112 = vector.extract_strided_slice %111 {offsets = [0, 0], sizes = [8, 48], strides = [1, 1]} : vector<8x64xf32> to vector<8x48xf32>
    %113 = arith.negf %112 : vector<8x48xf32>
    %114 = math.exp %113 : vector<8x48xf32>
    %cst_37 = arith.constant 1.000000e+00 : f32
    %115 = vector.broadcast %cst_37 : f32 to vector<8x48xf32>
    %116 = arith.addf %115, %114 : vector<8x48xf32>
    %117 = arith.divf %115, %116 : vector<8x48xf32>
    %118 = vector.extract_strided_slice %117 {offsets = [0, 0], sizes = [8, 16], strides = [1, 1]} : vector<8x48xf32> to vector<8x16xf32>
    %119 = vector.extract_strided_slice %117 {offsets = [0, 16], sizes = [8, 16], strides = [1, 1]} : vector<8x48xf32> to vector<8x16xf32>
    %120 = vector.extract_strided_slice %117 {offsets = [0, 32], sizes = [8, 16], strides = [1, 1]} : vector<8x48xf32> to vector<8x16xf32>
    %121 = vector.extract_strided_slice %111 {offsets = [0, 48], sizes = [8, 16], strides = [1, 1]} : vector<8x64xf32> to vector<8x16xf32>
    %122 = math.tanh %121 : vector<8x16xf32>
    %123 = arith.mulf %119, %80 : vector<8x16xf32>
    %124 = arith.mulf %118, %122 : vector<8x16xf32>
    %125 = arith.addf %123, %124 : vector<8x16xf32>
    %126 = math.tanh %125 : vector<8x16xf32>
    %127 = arith.mulf %120, %126 : vector<8x16xf32>
    %cst_38 = arith.constant 0.000000e+00 : f32
    %128 = vector.broadcast %cst_38 : f32 to vector<8x16xf32>
    %129 = arith.maximumf %127, %128 : vector<8x16xf32>
    %cst_39 = arith.constant dense<0.000000e+00> : vector<8x16xf32>
    %130 = tpu.matmul %129, %4, %cst_39 {dimension_numbers = #tpu.dot_dimension_numbers<[1], [0], [0], [1], [0, 0, 1, 1], [], []>} : vector<8x16xf32>, vector<16x16xf32>, vector<8x16xf32> -> vector<8x16xf32>
    %cst_40 = arith.constant dense<0.000000e+00> : vector<8x16xf32>
    %131 = tpu.matmul %105, %5, %cst_40 {dimension_numbers = #tpu.dot_dimension_numbers<[1], [0], [0], [1], [0, 0, 1, 1], [], []>} : vector<8x4xf32>, vector<4x16xf32>, vector<8x16xf32> -> vector<8x16xf32>
    %132 = arith.addf %130, %131 : vector<8x16xf32>
    %133 = vector.broadcast %6 : vector<1x16xf32> to vector<8x16xf32>
    %134 = arith.addf %132, %133 : vector<8x16xf32>
    %135 = vector.extract_strided_slice %134 {offsets = [0, 0], sizes = [8, 12], strides = [1, 1]} : vector<8x16xf32> to vector<8x12xf32>
    %136 = arith.negf %135 : vector<8x12xf32>
    %137 = math.exp %136 : vector<8x12xf32>
    %cst_41 = arith.constant 1.000000e+00 : f32
    %138 = vector.broadcast %cst_41 : f32 to vector<8x12xf32>
    %139 = arith.addf %138, %137 : vector<8x12xf32>
    %140 = arith.divf %138, %139 : vector<8x12xf32>
    %141 = vector.extract_strided_slice %140 {offsets = [0, 0], sizes = [8, 4], strides = [1, 1]} : vector<8x12xf32> to vector<8x4xf32>
    %142 = vector.extract_strided_slice %140 {offsets = [0, 4], sizes = [8, 4], strides = [1, 1]} : vector<8x12xf32> to vector<8x4xf32>
    %143 = vector.extract_strided_slice %140 {offsets = [0, 8], sizes = [8, 4], strides = [1, 1]} : vector<8x12xf32> to vector<8x4xf32>
    %144 = vector.extract_strided_slice %134 {offsets = [0, 12], sizes = [8, 4], strides = [1, 1]} : vector<8x16xf32> to vector<8x4xf32>
    %145 = math.tanh %144 : vector<8x4xf32>
    %146 = arith.mulf %142, %103 : vector<8x4xf32>
    %147 = arith.mulf %141, %145 : vector<8x4xf32>
    %148 = arith.addf %146, %147 : vector<8x4xf32>
    %149 = math.tanh %148 : vector<8x4xf32>
    %150 = arith.mulf %143, %149 : vector<8x4xf32>
    %cst_42 = arith.constant 0.000000e+00 : f32
    %151 = vector.broadcast %cst_42 : f32 to vector<8x4xf32>
    %152 = arith.maximumf %150, %151 : vector<8x4xf32>
    %153 = vector.extract_strided_slice %13 {offsets = [0, 3, 0], sizes = [8, 1, 64], strides = [1, 1, 1]} : vector<8x8x64xf32> to vector<8x1x64xf32>
    %154 = vector.shape_cast %153 : vector<8x1x64xf32> to vector<8x64xf32>
    %cst_43 = arith.constant dense<0.000000e+00> : vector<8x64xf32>
    %155 = tpu.matmul %127, %2, %cst_43 {dimension_numbers = #tpu.dot_dimension_numbers<[1], [0], [0], [1], [0, 0, 1, 1], [], []>} : vector<8x16xf32>, vector<16x64xf32>, vector<8x64xf32> -> vector<8x64xf32>
    %156 = arith.addf %154, %155 : vector<8x64xf32>
    %157 = vector.extract_strided_slice %156 {offsets = [0, 0], sizes = [8, 48], strides = [1, 1]} : vector<8x64xf32> to vector<8x48xf32>
    %158 = arith.negf %157 : vector<8x48xf32>
    %159 = math.exp %158 : vector<8x48xf32>
    %cst_44 = arith.constant 1.000000e+00 : f32
    %160 = vector.broadcast %cst_44 : f32 to vector<8x48xf32>
    %161 = arith.addf %160, %159 : vector<8x48xf32>
    %162 = arith.divf %160, %161 : vector<8x48xf32>
    %163 = vector.extract_strided_slice %162 {offsets = [0, 0], sizes = [8, 16], strides = [1, 1]} : vector<8x48xf32> to vector<8x16xf32>
    %164 = vector.extract_strided_slice %162 {offsets = [0, 16], sizes = [8, 16], strides = [1, 1]} : vector<8x48xf32> to vector<8x16xf32>
    %165 = vector.extract_strided_slice %162 {offsets = [0, 32], sizes = [8, 16], strides = [1, 1]} : vector<8x48xf32> to vector<8x16xf32>
    %166 = vector.extract_strided_slice %156 {offsets = [0, 48], sizes = [8, 16], strides = [1, 1]} : vector<8x64xf32> to vector<8x16xf32>
    %167 = math.tanh %166 : vector<8x16xf32>
    %168 = arith.mulf %164, %125 : vector<8x16xf32>
    %169 = arith.mulf %163, %167 : vector<8x16xf32>
    %170 = arith.addf %168, %169 : vector<8x16xf32>
    %171 = math.tanh %170 : vector<8x16xf32>
    %172 = arith.mulf %165, %171 : vector<8x16xf32>
    %cst_45 = arith.constant 0.000000e+00 : f32
    %173 = vector.broadcast %cst_45 : f32 to vector<8x16xf32>
    %174 = arith.maximumf %172, %173 : vector<8x16xf32>
    %cst_46 = arith.constant dense<0.000000e+00> : vector<8x16xf32>
    %175 = tpu.matmul %174, %4, %cst_46 {dimension_numbers = #tpu.dot_dimension_numbers<[1], [0], [0], [1], [0, 0, 1, 1], [], []>} : vector<8x16xf32>, vector<16x16xf32>, vector<8x16xf32> -> vector<8x16xf32>
    %cst_47 = arith.constant dense<0.000000e+00> : vector<8x16xf32>
    %176 = tpu.matmul %150, %5, %cst_47 {dimension_numbers = #tpu.dot_dimension_numbers<[1], [0], [0], [1], [0, 0, 1, 1], [], []>} : vector<8x4xf32>, vector<4x16xf32>, vector<8x16xf32> -> vector<8x16xf32>
    %177 = arith.addf %175, %176 : vector<8x16xf32>
    %178 = vector.broadcast %6 : vector<1x16xf32> to vector<8x16xf32>
    %179 = arith.addf %177, %178 : vector<8x16xf32>
    %180 = vector.extract_strided_slice %179 {offsets = [0, 0], sizes = [8, 12], strides = [1, 1]} : vector<8x16xf32> to vector<8x12xf32>
    %181 = arith.negf %180 : vector<8x12xf32>
    %182 = math.exp %181 : vector<8x12xf32>
    %cst_48 = arith.constant 1.000000e+00 : f32
    %183 = vector.broadcast %cst_48 : f32 to vector<8x12xf32>
    %184 = arith.addf %183, %182 : vector<8x12xf32>
    %185 = arith.divf %183, %184 : vector<8x12xf32>
    %186 = vector.extract_strided_slice %185 {offsets = [0, 0], sizes = [8, 4], strides = [1, 1]} : vector<8x12xf32> to vector<8x4xf32>
    %187 = vector.extract_strided_slice %185 {offsets = [0, 4], sizes = [8, 4], strides = [1, 1]} : vector<8x12xf32> to vector<8x4xf32>
    %188 = vector.extract_strided_slice %185 {offsets = [0, 8], sizes = [8, 4], strides = [1, 1]} : vector<8x12xf32> to vector<8x4xf32>
    %189 = vector.extract_strided_slice %179 {offsets = [0, 12], sizes = [8, 4], strides = [1, 1]} : vector<8x16xf32> to vector<8x4xf32>
    %190 = math.tanh %189 : vector<8x4xf32>
    %191 = arith.mulf %187, %148 : vector<8x4xf32>
    %192 = arith.mulf %186, %190 : vector<8x4xf32>
    %193 = arith.addf %191, %192 : vector<8x4xf32>
    %194 = math.tanh %193 : vector<8x4xf32>
    %195 = arith.mulf %188, %194 : vector<8x4xf32>
    %cst_49 = arith.constant 0.000000e+00 : f32
    %196 = vector.broadcast %cst_49 : f32 to vector<8x4xf32>
    %197 = arith.maximumf %195, %196 : vector<8x4xf32>
    %198 = vector.extract_strided_slice %13 {offsets = [0, 4, 0], sizes = [8, 1, 64], strides = [1, 1, 1]} : vector<8x8x64xf32> to vector<8x1x64xf32>
    %199 = vector.shape_cast %198 : vector<8x1x64xf32> to vector<8x64xf32>
    %cst_50 = arith.constant dense<0.000000e+00> : vector<8x64xf32>
    %200 = tpu.matmul %172, %2, %cst_50 {dimension_numbers = #tpu.dot_dimension_numbers<[1], [0], [0], [1], [0, 0, 1, 1], [], []>} : vector<8x16xf32>, vector<16x64xf32>, vector<8x64xf32> -> vector<8x64xf32>
    %201 = arith.addf %199, %200 : vector<8x64xf32>
    %202 = vector.extract_strided_slice %201 {offsets = [0, 0], sizes = [8, 48], strides = [1, 1]} : vector<8x64xf32> to vector<8x48xf32>
    %203 = arith.negf %202 : vector<8x48xf32>
    %204 = math.exp %203 : vector<8x48xf32>
    %cst_51 = arith.constant 1.000000e+00 : f32
    %205 = vector.broadcast %cst_51 : f32 to vector<8x48xf32>
    %206 = arith.addf %205, %204 : vector<8x48xf32>
    %207 = arith.divf %205, %206 : vector<8x48xf32>
    %208 = vector.extract_strided_slice %207 {offsets = [0, 0], sizes = [8, 16], strides = [1, 1]} : vector<8x48xf32> to vector<8x16xf32>
    %209 = vector.extract_strided_slice %207 {offsets = [0, 16], sizes = [8, 16], strides = [1, 1]} : vector<8x48xf32> to vector<8x16xf32>
    %210 = vector.extract_strided_slice %207 {offsets = [0, 32], sizes = [8, 16], strides = [1, 1]} : vector<8x48xf32> to vector<8x16xf32>
    %211 = vector.extract_strided_slice %201 {offsets = [0, 48], sizes = [8, 16], strides = [1, 1]} : vector<8x64xf32> to vector<8x16xf32>
    %212 = math.tanh %211 : vector<8x16xf32>
    %213 = arith.mulf %209, %170 : vector<8x16xf32>
    %214 = arith.mulf %208, %212 : vector<8x16xf32>
    %215 = arith.addf %213, %214 : vector<8x16xf32>
    %216 = math.tanh %215 : vector<8x16xf32>
    %217 = arith.mulf %210, %216 : vector<8x16xf32>
    %cst_52 = arith.constant 0.000000e+00 : f32
    %218 = vector.broadcast %cst_52 : f32 to vector<8x16xf32>
    %219 = arith.maximumf %217, %218 : vector<8x16xf32>
    %cst_53 = arith.constant dense<0.000000e+00> : vector<8x16xf32>
    %220 = tpu.matmul %219, %4, %cst_53 {dimension_numbers = #tpu.dot_dimension_numbers<[1], [0], [0], [1], [0, 0, 1, 1], [], []>} : vector<8x16xf32>, vector<16x16xf32>, vector<8x16xf32> -> vector<8x16xf32>
    %cst_54 = arith.constant dense<0.000000e+00> : vector<8x16xf32>
    %221 = tpu.matmul %195, %5, %cst_54 {dimension_numbers = #tpu.dot_dimension_numbers<[1], [0], [0], [1], [0, 0, 1, 1], [], []>} : vector<8x4xf32>, vector<4x16xf32>, vector<8x16xf32> -> vector<8x16xf32>
    %222 = arith.addf %220, %221 : vector<8x16xf32>
    %223 = vector.broadcast %6 : vector<1x16xf32> to vector<8x16xf32>
    %224 = arith.addf %222, %223 : vector<8x16xf32>
    %225 = vector.extract_strided_slice %224 {offsets = [0, 0], sizes = [8, 12], strides = [1, 1]} : vector<8x16xf32> to vector<8x12xf32>
    %226 = arith.negf %225 : vector<8x12xf32>
    %227 = math.exp %226 : vector<8x12xf32>
    %cst_55 = arith.constant 1.000000e+00 : f32
    %228 = vector.broadcast %cst_55 : f32 to vector<8x12xf32>
    %229 = arith.addf %228, %227 : vector<8x12xf32>
    %230 = arith.divf %228, %229 : vector<8x12xf32>
    %231 = vector.extract_strided_slice %230 {offsets = [0, 0], sizes = [8, 4], strides = [1, 1]} : vector<8x12xf32> to vector<8x4xf32>
    %232 = vector.extract_strided_slice %230 {offsets = [0, 4], sizes = [8, 4], strides = [1, 1]} : vector<8x12xf32> to vector<8x4xf32>
    %233 = vector.extract_strided_slice %230 {offsets = [0, 8], sizes = [8, 4], strides = [1, 1]} : vector<8x12xf32> to vector<8x4xf32>
    %234 = vector.extract_strided_slice %224 {offsets = [0, 12], sizes = [8, 4], strides = [1, 1]} : vector<8x16xf32> to vector<8x4xf32>
    %235 = math.tanh %234 : vector<8x4xf32>
    %236 = arith.mulf %232, %193 : vector<8x4xf32>
    %237 = arith.mulf %231, %235 : vector<8x4xf32>
    %238 = arith.addf %236, %237 : vector<8x4xf32>
    %239 = math.tanh %238 : vector<8x4xf32>
    %240 = arith.mulf %233, %239 : vector<8x4xf32>
    %cst_56 = arith.constant 0.000000e+00 : f32
    %241 = vector.broadcast %cst_56 : f32 to vector<8x4xf32>
    %242 = arith.maximumf %240, %241 : vector<8x4xf32>
    %243 = vector.extract_strided_slice %13 {offsets = [0, 5, 0], sizes = [8, 1, 64], strides = [1, 1, 1]} : vector<8x8x64xf32> to vector<8x1x64xf32>
    %244 = vector.shape_cast %243 : vector<8x1x64xf32> to vector<8x64xf32>
    %cst_57 = arith.constant dense<0.000000e+00> : vector<8x64xf32>
    %245 = tpu.matmul %217, %2, %cst_57 {dimension_numbers = #tpu.dot_dimension_numbers<[1], [0], [0], [1], [0, 0, 1, 1], [], []>} : vector<8x16xf32>, vector<16x64xf32>, vector<8x64xf32> -> vector<8x64xf32>
    %246 = arith.addf %244, %245 : vector<8x64xf32>
    %247 = vector.extract_strided_slice %246 {offsets = [0, 0], sizes = [8, 48], strides = [1, 1]} : vector<8x64xf32> to vector<8x48xf32>
    %248 = arith.negf %247 : vector<8x48xf32>
    %249 = math.exp %248 : vector<8x48xf32>
    %cst_58 = arith.constant 1.000000e+00 : f32
    %250 = vector.broadcast %cst_58 : f32 to vector<8x48xf32>
    %251 = arith.addf %250, %249 : vector<8x48xf32>
    %252 = arith.divf %250, %251 : vector<8x48xf32>
    %253 = vector.extract_strided_slice %252 {offsets = [0, 0], sizes = [8, 16], strides = [1, 1]} : vector<8x48xf32> to vector<8x16xf32>
    %254 = vector.extract_strided_slice %252 {offsets = [0, 16], sizes = [8, 16], strides = [1, 1]} : vector<8x48xf32> to vector<8x16xf32>
    %255 = vector.extract_strided_slice %252 {offsets = [0, 32], sizes = [8, 16], strides = [1, 1]} : vector<8x48xf32> to vector<8x16xf32>
    %256 = vector.extract_strided_slice %246 {offsets = [0, 48], sizes = [8, 16], strides = [1, 1]} : vector<8x64xf32> to vector<8x16xf32>
    %257 = math.tanh %256 : vector<8x16xf32>
    %258 = arith.mulf %254, %215 : vector<8x16xf32>
    %259 = arith.mulf %253, %257 : vector<8x16xf32>
    %260 = arith.addf %258, %259 : vector<8x16xf32>
    %261 = math.tanh %260 : vector<8x16xf32>
    %262 = arith.mulf %255, %261 : vector<8x16xf32>
    %cst_59 = arith.constant 0.000000e+00 : f32
    %263 = vector.broadcast %cst_59 : f32 to vector<8x16xf32>
    %264 = arith.maximumf %262, %263 : vector<8x16xf32>
    %cst_60 = arith.constant dense<0.000000e+00> : vector<8x16xf32>
    %265 = tpu.matmul %264, %4, %cst_60 {dimension_numbers = #tpu.dot_dimension_numbers<[1], [0], [0], [1], [0, 0, 1, 1], [], []>} : vector<8x16xf32>, vector<16x16xf32>, vector<8x16xf32> -> vector<8x16xf32>
    %cst_61 = arith.constant dense<0.000000e+00> : vector<8x16xf32>
    %266 = tpu.matmul %240, %5, %cst_61 {dimension_numbers = #tpu.dot_dimension_numbers<[1], [0], [0], [1], [0, 0, 1, 1], [], []>} : vector<8x4xf32>, vector<4x16xf32>, vector<8x16xf32> -> vector<8x16xf32>
    %267 = arith.addf %265, %266 : vector<8x16xf32>
    %268 = vector.broadcast %6 : vector<1x16xf32> to vector<8x16xf32>
    %269 = arith.addf %267, %268 : vector<8x16xf32>
    %270 = vector.extract_strided_slice %269 {offsets = [0, 0], sizes = [8, 12], strides = [1, 1]} : vector<8x16xf32> to vector<8x12xf32>
    %271 = arith.negf %270 : vector<8x12xf32>
    %272 = math.exp %271 : vector<8x12xf32>
    %cst_62 = arith.constant 1.000000e+00 : f32
    %273 = vector.broadcast %cst_62 : f32 to vector<8x12xf32>
    %274 = arith.addf %273, %272 : vector<8x12xf32>
    %275 = arith.divf %273, %274 : vector<8x12xf32>
    %276 = vector.extract_strided_slice %275 {offsets = [0, 0], sizes = [8, 4], strides = [1, 1]} : vector<8x12xf32> to vector<8x4xf32>
    %277 = vector.extract_strided_slice %275 {offsets = [0, 4], sizes = [8, 4], strides = [1, 1]} : vector<8x12xf32> to vector<8x4xf32>
    %278 = vector.extract_strided_slice %275 {offsets = [0, 8], sizes = [8, 4], strides = [1, 1]} : vector<8x12xf32> to vector<8x4xf32>
    %279 = vector.extract_strided_slice %269 {offsets = [0, 12], sizes = [8, 4], strides = [1, 1]} : vector<8x16xf32> to vector<8x4xf32>
    %280 = math.tanh %279 : vector<8x4xf32>
    %281 = arith.mulf %277, %238 : vector<8x4xf32>
    %282 = arith.mulf %276, %280 : vector<8x4xf32>
    %283 = arith.addf %281, %282 : vector<8x4xf32>
    %284 = math.tanh %283 : vector<8x4xf32>
    %285 = arith.mulf %278, %284 : vector<8x4xf32>
    %cst_63 = arith.constant 0.000000e+00 : f32
    %286 = vector.broadcast %cst_63 : f32 to vector<8x4xf32>
    %287 = arith.maximumf %285, %286 : vector<8x4xf32>
    %288 = vector.extract_strided_slice %13 {offsets = [0, 6, 0], sizes = [8, 1, 64], strides = [1, 1, 1]} : vector<8x8x64xf32> to vector<8x1x64xf32>
    %289 = vector.shape_cast %288 : vector<8x1x64xf32> to vector<8x64xf32>
    %cst_64 = arith.constant dense<0.000000e+00> : vector<8x64xf32>
    %290 = tpu.matmul %262, %2, %cst_64 {dimension_numbers = #tpu.dot_dimension_numbers<[1], [0], [0], [1], [0, 0, 1, 1], [], []>} : vector<8x16xf32>, vector<16x64xf32>, vector<8x64xf32> -> vector<8x64xf32>
    %291 = arith.addf %289, %290 : vector<8x64xf32>
    %292 = vector.extract_strided_slice %291 {offsets = [0, 0], sizes = [8, 48], strides = [1, 1]} : vector<8x64xf32> to vector<8x48xf32>
    %293 = arith.negf %292 : vector<8x48xf32>
    %294 = math.exp %293 : vector<8x48xf32>
    %cst_65 = arith.constant 1.000000e+00 : f32
    %295 = vector.broadcast %cst_65 : f32 to vector<8x48xf32>
    %296 = arith.addf %295, %294 : vector<8x48xf32>
    %297 = arith.divf %295, %296 : vector<8x48xf32>
    %298 = vector.extract_strided_slice %297 {offsets = [0, 0], sizes = [8, 16], strides = [1, 1]} : vector<8x48xf32> to vector<8x16xf32>
    %299 = vector.extract_strided_slice %297 {offsets = [0, 16], sizes = [8, 16], strides = [1, 1]} : vector<8x48xf32> to vector<8x16xf32>
    %300 = vector.extract_strided_slice %297 {offsets = [0, 32], sizes = [8, 16], strides = [1, 1]} : vector<8x48xf32> to vector<8x16xf32>
    %301 = vector.extract_strided_slice %291 {offsets = [0, 48], sizes = [8, 16], strides = [1, 1]} : vector<8x64xf32> to vector<8x16xf32>
    %302 = math.tanh %301 : vector<8x16xf32>
    %303 = arith.mulf %299, %260 : vector<8x16xf32>
    %304 = arith.mulf %298, %302 : vector<8x16xf32>
    %305 = arith.addf %303, %304 : vector<8x16xf32>
    %306 = math.tanh %305 : vector<8x16xf32>
    %307 = arith.mulf %300, %306 : vector<8x16xf32>
    %cst_66 = arith.constant 0.000000e+00 : f32
    %308 = vector.broadcast %cst_66 : f32 to vector<8x16xf32>
    %309 = arith.maximumf %307, %308 : vector<8x16xf32>
    %cst_67 = arith.constant dense<0.000000e+00> : vector<8x16xf32>
    %310 = tpu.matmul %309, %4, %cst_67 {dimension_numbers = #tpu.dot_dimension_numbers<[1], [0], [0], [1], [0, 0, 1, 1], [], []>} : vector<8x16xf32>, vector<16x16xf32>, vector<8x16xf32> -> vector<8x16xf32>
    %cst_68 = arith.constant dense<0.000000e+00> : vector<8x16xf32>
    %311 = tpu.matmul %285, %5, %cst_68 {dimension_numbers = #tpu.dot_dimension_numbers<[1], [0], [0], [1], [0, 0, 1, 1], [], []>} : vector<8x4xf32>, vector<4x16xf32>, vector<8x16xf32> -> vector<8x16xf32>
    %312 = arith.addf %310, %311 : vector<8x16xf32>
    %313 = vector.broadcast %6 : vector<1x16xf32> to vector<8x16xf32>
    %314 = arith.addf %312, %313 : vector<8x16xf32>
    %315 = vector.extract_strided_slice %314 {offsets = [0, 0], sizes = [8, 12], strides = [1, 1]} : vector<8x16xf32> to vector<8x12xf32>
    %316 = arith.negf %315 : vector<8x12xf32>
    %317 = math.exp %316 : vector<8x12xf32>
    %cst_69 = arith.constant 1.000000e+00 : f32
    %318 = vector.broadcast %cst_69 : f32 to vector<8x12xf32>
    %319 = arith.addf %318, %317 : vector<8x12xf32>
    %320 = arith.divf %318, %319 : vector<8x12xf32>
    %321 = vector.extract_strided_slice %320 {offsets = [0, 0], sizes = [8, 4], strides = [1, 1]} : vector<8x12xf32> to vector<8x4xf32>
    %322 = vector.extract_strided_slice %320 {offsets = [0, 4], sizes = [8, 4], strides = [1, 1]} : vector<8x12xf32> to vector<8x4xf32>
    %323 = vector.extract_strided_slice %320 {offsets = [0, 8], sizes = [8, 4], strides = [1, 1]} : vector<8x12xf32> to vector<8x4xf32>
    %324 = vector.extract_strided_slice %314 {offsets = [0, 12], sizes = [8, 4], strides = [1, 1]} : vector<8x16xf32> to vector<8x4xf32>
    %325 = math.tanh %324 : vector<8x4xf32>
    %326 = arith.mulf %322, %283 : vector<8x4xf32>
    %327 = arith.mulf %321, %325 : vector<8x4xf32>
    %328 = arith.addf %326, %327 : vector<8x4xf32>
    %329 = math.tanh %328 : vector<8x4xf32>
    %330 = arith.mulf %323, %329 : vector<8x4xf32>
    %cst_70 = arith.constant 0.000000e+00 : f32
    %331 = vector.broadcast %cst_70 : f32 to vector<8x4xf32>
    %332 = arith.maximumf %330, %331 : vector<8x4xf32>
    %333 = vector.extract_strided_slice %13 {offsets = [0, 7, 0], sizes = [8, 1, 64], strides = [1, 1, 1]} : vector<8x8x64xf32> to vector<8x1x64xf32>
    %334 = vector.shape_cast %333 : vector<8x1x64xf32> to vector<8x64xf32>
    %cst_71 = arith.constant dense<0.000000e+00> : vector<8x64xf32>
    %335 = tpu.matmul %307, %2, %cst_71 {dimension_numbers = #tpu.dot_dimension_numbers<[1], [0], [0], [1], [0, 0, 1, 1], [], []>} : vector<8x16xf32>, vector<16x64xf32>, vector<8x64xf32> -> vector<8x64xf32>
    %336 = arith.addf %334, %335 : vector<8x64xf32>
    %337 = vector.extract_strided_slice %336 {offsets = [0, 0], sizes = [8, 48], strides = [1, 1]} : vector<8x64xf32> to vector<8x48xf32>
    %338 = arith.negf %337 : vector<8x48xf32>
    %339 = math.exp %338 : vector<8x48xf32>
    %cst_72 = arith.constant 1.000000e+00 : f32
    %340 = vector.broadcast %cst_72 : f32 to vector<8x48xf32>
    %341 = arith.addf %340, %339 : vector<8x48xf32>
    %342 = arith.divf %340, %341 : vector<8x48xf32>
    %343 = vector.extract_strided_slice %342 {offsets = [0, 0], sizes = [8, 16], strides = [1, 1]} : vector<8x48xf32> to vector<8x16xf32>
    %344 = vector.extract_strided_slice %342 {offsets = [0, 16], sizes = [8, 16], strides = [1, 1]} : vector<8x48xf32> to vector<8x16xf32>
    %345 = vector.extract_strided_slice %342 {offsets = [0, 32], sizes = [8, 16], strides = [1, 1]} : vector<8x48xf32> to vector<8x16xf32>
    %346 = vector.extract_strided_slice %336 {offsets = [0, 48], sizes = [8, 16], strides = [1, 1]} : vector<8x64xf32> to vector<8x16xf32>
    %347 = math.tanh %346 : vector<8x16xf32>
    %348 = arith.mulf %344, %305 : vector<8x16xf32>
    %349 = arith.mulf %343, %347 : vector<8x16xf32>
    %350 = arith.addf %348, %349 : vector<8x16xf32>
    %351 = math.tanh %350 : vector<8x16xf32>
    %352 = arith.mulf %345, %351 : vector<8x16xf32>
    %cst_73 = arith.constant 0.000000e+00 : f32
    %353 = vector.broadcast %cst_73 : f32 to vector<8x16xf32>
    %354 = arith.maximumf %352, %353 : vector<8x16xf32>
    %cst_74 = arith.constant dense<0.000000e+00> : vector<8x16xf32>
    %355 = tpu.matmul %354, %4, %cst_74 {dimension_numbers = #tpu.dot_dimension_numbers<[1], [0], [0], [1], [0, 0, 1, 1], [], []>} : vector<8x16xf32>, vector<16x16xf32>, vector<8x16xf32> -> vector<8x16xf32>
    %cst_75 = arith.constant dense<0.000000e+00> : vector<8x16xf32>
    %356 = tpu.matmul %330, %5, %cst_75 {dimension_numbers = #tpu.dot_dimension_numbers<[1], [0], [0], [1], [0, 0, 1, 1], [], []>} : vector<8x4xf32>, vector<4x16xf32>, vector<8x16xf32> -> vector<8x16xf32>
    %357 = arith.addf %355, %356 : vector<8x16xf32>
    %358 = vector.broadcast %6 : vector<1x16xf32> to vector<8x16xf32>
    %359 = arith.addf %357, %358 : vector<8x16xf32>
    %360 = vector.extract_strided_slice %359 {offsets = [0, 0], sizes = [8, 12], strides = [1, 1]} : vector<8x16xf32> to vector<8x12xf32>
    %361 = arith.negf %360 : vector<8x12xf32>
    %362 = math.exp %361 : vector<8x12xf32>
    %cst_76 = arith.constant 1.000000e+00 : f32
    %363 = vector.broadcast %cst_76 : f32 to vector<8x12xf32>
    %364 = arith.addf %363, %362 : vector<8x12xf32>
    %365 = arith.divf %363, %364 : vector<8x12xf32>
    %366 = vector.extract_strided_slice %365 {offsets = [0, 0], sizes = [8, 4], strides = [1, 1]} : vector<8x12xf32> to vector<8x4xf32>
    %367 = vector.extract_strided_slice %365 {offsets = [0, 4], sizes = [8, 4], strides = [1, 1]} : vector<8x12xf32> to vector<8x4xf32>
    %368 = vector.extract_strided_slice %365 {offsets = [0, 8], sizes = [8, 4], strides = [1, 1]} : vector<8x12xf32> to vector<8x4xf32>
    %369 = vector.extract_strided_slice %359 {offsets = [0, 12], sizes = [8, 4], strides = [1, 1]} : vector<8x16xf32> to vector<8x4xf32>
    %370 = math.tanh %369 : vector<8x4xf32>
    %371 = arith.mulf %367, %328 : vector<8x4xf32>
    %372 = arith.mulf %366, %370 : vector<8x4xf32>
    %373 = arith.addf %371, %372 : vector<8x4xf32>
    %374 = math.tanh %373 : vector<8x4xf32>
    %375 = arith.mulf %368, %374 : vector<8x4xf32>
    %cst_77 = arith.constant 0.000000e+00 : f32
    %376 = vector.broadcast %cst_77 : f32 to vector<8x4xf32>
    %377 = arith.maximumf %375, %376 : vector<8x4xf32>
    %378 = vector.shape_cast %62 : vector<8x4xf32> to vector<8x1x4xf32>
    %379 = vector.shape_cast %107 : vector<8x4xf32> to vector<8x1x4xf32>
    %380 = vector.shape_cast %152 : vector<8x4xf32> to vector<8x1x4xf32>
    %381 = vector.shape_cast %197 : vector<8x4xf32> to vector<8x1x4xf32>
    %382 = vector.shape_cast %242 : vector<8x4xf32> to vector<8x1x4xf32>
    %383 = vector.shape_cast %287 : vector<8x4xf32> to vector<8x1x4xf32>
    %384 = vector.shape_cast %332 : vector<8x4xf32> to vector<8x1x4xf32>
    %385 = vector.shape_cast %377 : vector<8x4xf32> to vector<8x1x4xf32>
    %386 = tpu.concatenate %378, %379, %380, %381, %382, %383, %384, %385 in 1 : vector<8x1x4xf32>, vector<8x1x4xf32>, vector<8x1x4xf32>, vector<8x1x4xf32>, vector<8x1x4xf32>, vector<8x1x4xf32>, vector<8x1x4xf32>, vector<8x1x4xf32> -> vector<8x8x4xf32>
    %387 = vector.shape_cast %386 : vector<8x8x4xf32> to vector<64x4xf32>
    %cst_78 = arith.constant dense<0.000000e+00> : vector<64x4xf32>
    %388 = tpu.matmul %387, %7, %cst_78 {dimension_numbers = #tpu.dot_dimension_numbers<[1], [0], [0], [1], [0, 0, 1, 1], [], []>} : vector<64x4xf32>, vector<4x4xf32>, vector<64x4xf32> -> vector<64x4xf32>
    %389 = vector.broadcast %8 : vector<1x4xf32> to vector<64x4xf32>
    %390 = arith.addf %388, %389 : vector<64x4xf32>
    %391 = arith.negf %390 : vector<64x4xf32>
    %392 = math.exp %391 : vector<64x4xf32>
    %cst_79 = arith.constant 1.000000e+00 : f32
    %393 = vector.broadcast %cst_79 : f32 to vector<64x4xf32>
    %394 = arith.addf %393, %392 : vector<64x4xf32>
    %395 = arith.divf %393, %394 : vector<64x4xf32>
    %396 = vector.shape_cast %395 : vector<64x4xf32> to vector<8x8x4xf32>
    %c0_80 = arith.constant 0 : index
    %c0_81 = arith.constant 0 : index
    %c0_82 = arith.constant 0 : index
    %397 = vector.load %arg9[%c0_80, %c0_81, %c0_82] : memref<8x8x4xf32, #tpu.memory_space<vmem>>, vector<8x8x4xf32>
    tpu.vector_store %arg9[%c0_80, %c0_81, %c0_82], %396 {strides = array<i32>} : memref<8x8x4xf32, #tpu.memory_space<vmem>>, vector<8x8x4xf32>,
    return
  }
}

</mosaic_0001>

<bundles_post_ra>
// kernel: tpu_custom_call.1
= control target key start
LH: loop header
LB: loop body
LE: loop exit
PB: predicated region body
PF: predicated region fallthrough
CT: control target
= control target key end

     0   :  { %14 = vsyncpa [#allocation3], 0  ;;  %s8341_s0 = inlined_call_operand.hbm [shape: f32[8,8,8], index: 0, kind: input, shape index: {}]   ;;  %s8342_s1 = inlined_call_operand.hbm [shape: f32[8,64], index: 1, kind: input, shape index: {}]   ;;  %s8343_s2 = inlined_call_operand.hbm [shape: f32[16,64], index: 2, kind: input, shape index: {}]   ;;  %s8344_s3 = inlined_call_operand.vmem [shape: f32[1,64], index: 3, kind: input, shape index: {}]   ;;  %s8345_s4 = inlined_call_operand.hbm [shape: f32[16,16], index: 4, kind: input, shape index: {}]   ;;  %s8346_s5 = inlined_call_operand.vmem [shape: f32[4,16], index: 5, kind: input, shape index: {}]   ;;  %s8347_s6 = inlined_call_operand.vmem [shape: f32[1,16], index: 6, kind: input, shape index: {}]   ;;  %s8348_s7 = inlined_call_operand.vmem [shape: f32[4,4], index: 7, kind: input, shape index: {}]   ;;  %s8349_s8 = inlined_call_operand.vmem [shape: f32[1,4], index: 8, kind: input, shape index: {}]   ;;  %s8350_s9 = inlined_call_operand.vmem [shape: f32[8,8,4], index: 9, kind: output, shape index: {}]  }
   0x1   :  { %15 = vsyncpa [#allocation5], 0 }
   0x2   :  { %16 = vsyncpa [#allocation8], 0  ;;  %s6624_s30 = smov [#allocation4]   ;;  %s6625_s11 = smov [#allocation2]  }
   0x3   :  { %s35_s10 = sshll.u32 %s6624_s30, 4  ;;  %s22_s12 = sshll.u32 %s6625_s11, 4  ;;  %s36_s10 = int_to_ptr.vmem [resolvable:$true] %s35_s10  ;;  %s23_s12 = int_to_ptr.vmem [resolvable:$true] %s22_s12 }
   0x4   :  { %s6546_s13 = scalar_lea.vmem %s36_s10, 128  ;;  %p6551_p1 = scmp.lt.s32.totalorder %s36_s10, %s36_s10 }
   0x5   :  { %p6547_p0 = scmp.ne.s32.totalorder %s36_s10, %s6546_s13  ;;  %p6552_p2 = scmp.lt.s32.totalorder %s6546_s13, %s6546_s13 }
   0x7   :  { %p6553_p3 = por %p6552_p2, %p6551_p1 }
   0x9   :  { %p6554_p4 = pnand %p6553_p3, %p6547_p0 }
   0xb   :  { %6557 = shalt.err (!%p6554_p4)
}
   0xc   :  { %38 = dma.hbm_to_vmem [thread:$0]  %s8342_s1, 128, %s36_s10, [#allocation5]  }
   0xd   :  { %s6566_s16 = scalar_lea.vmem %s23_s12, 1024  ;;  %p6571_p6 = scmp.lt.s32.totalorder %s23_s12, %s23_s12 }
   0xe   :  { %p6567_p5 = scmp.ne.s32.totalorder %s23_s12, %s6566_s16  ;;  %p6572_p7 = scmp.lt.s32.totalorder %s6566_s16, %s6566_s16 }
  0x10   :  { %p6573_p8 = por %p6572_p7, %p6571_p6 }
  0x12   :  { %p6574_p9 = pnand %p6573_p8, %p6567_p5 }
  0x14   :  { %6577 = shalt.err (!%p6574_p9)
}
  0x15   :  { %s6626_s17 = smov 128   ;;  %s6627_s18 = smov 8  }
  0x16   :  { %28 = dma.hbm_to_vmem [thread:$0]  %s8341_s0, 1024, %s23_s12, [#allocation3], %s6626_s17, %s6626_s17, %s6627_s18  }
  0x17   :  { %s6628_s21 = smov [#allocation6]   ;;  %s6629_s23 = smov [#allocation7]  }
  0x18   :  { %s44_s22 = sshll.u32 %s6628_s21, 4  ;;  %s58_s24 = sshll.u32 %s6629_s23, 4  ;;  %s45_s22 = int_to_ptr.vmem [resolvable:$true] %s44_s22  ;;  %s59_s24 = int_to_ptr.vmem [resolvable:$true] %s58_s24 }
  0x19   :  { %s6586_s1 = scalar_lea.vmem %s45_s22, 256  ;;  %p6591_p11 = scmp.lt.s32.totalorder %s45_s22, %s45_s22 }
  0x1a   :  { %p6587_p10 = scmp.ne.s32.totalorder %s45_s22, %s6586_s1  ;;  %p6592_p12 = scmp.lt.s32.totalorder %s6586_s1, %s6586_s1 }
  0x1c   :  { %p6593_p13 = por %p6592_p12, %p6591_p11 }
  0x1e   :  { %p6594_p0 = pnand %p6593_p13, %p6587_p10 }
  0x20   :  { %6597 = shalt.err (!%p6594_p0)
}
  0x21   :  { %50 = dma.hbm_to_vmem [thread:$0]  %s8343_s2, 256, %s45_s22, [#allocation5], %s6626_s17, %s6626_s17, %s6627_s18  }
  0x22   :  { %s6606_s27 = scalar_lea.vmem %s59_s24, 256  ;;  %p6611_p2 = scmp.lt.s32.totalorder %s59_s24, %s59_s24 }
  0x23   :  { %p6607_p1 = scmp.ne.s32.totalorder %s59_s24, %s6606_s27  ;;  %p6612_p3 = scmp.lt.s32.totalorder %s6606_s27, %s6606_s27 }
  0x25   :  { %p6613_p4 = por %p6612_p3, %p6611_p2 }
  0x27   :  { %p6614_p5 = pnand %p6613_p4, %p6607_p1 }
  0x29   :  { %6617 = shalt.err (!%p6614_p5)
}
  0x2a   :  { %64 = dma.hbm_to_vmem [thread:$0]  %s8345_s4, 256, %s59_s24, [#allocation8], %s6626_s17, %s6626_s17, %s6627_s18  }
  0x2b   :  { %6618 = dma.done.wait [#allocation3], 1024  }
  0x2c   :  { %6619 = vsyncadd [#allocation3], 4294966272 }
  0x2d   :  { %6620 = dma.done.wait [#allocation5], 384  }
  0x2e   :  { %6621 = vsyncadd [#allocation5], 4294966912 }
  0x2f   :  { %6622 = dma.done.wait [#allocation8], 256  }
  0x30   :  { %6623 = vsyncadd [#allocation8], 4294967040  ;;  %vm109_vm0 = vcmask 64512   ;;  %v93_v0 = vld [vmem:[#allocation4] sm:$0xff]  ;;  %v90_v2 = vld [vmem:[#allocation2 + $0x28] sm:$0xff]  ;;  %v6630_v6 = vmov 0.0  }
  0x31   :  { %v89_v1 = vld [vmem:[#allocation2 + $0x20] sm:$0xff]  ;;  %5895 = vmatprep.subr.mxu1 %v93_v0  ;;  %v6702_v3 = vld [vmem:[#allocation6 + $0x8] sm:$0xff]  ;;  %5715 = vmatprep.subr.mxu0 %v93_v0  ;;  %v86_v7 = vld [vmem:[#allocation2 + $0x8] sm:$0xff]  ;;  %vm6631_vm1 = vmmov 0   ;;  %s6633_s29 = smov 16   ;;  %vm540_vm2 = vcmask 1043456  }
  0x32   :  { %5723 = vmatprep.mubr.msk.f32.mxu1 %vm109_vm0, %v89_v1  ;;  %5896 = vmatpush3.msra.mxu1 %v93_v0  ;;  %v85_v4 = vld [vmem:[#allocation2] sm:$0xff]  ;;  %v91_v5 = vld [vmem:[#allocation2 + $0x30] sm:$0xff]  ;;  %v92_v8 = vld [vmem:[#allocation2 + $0x38] sm:$0xff]  ;;  %vm623_vm3 = vcmask 1041409   ;;  %vm626_vm4 = vcmask 1042434   ;;  %vm629_vm5 = vcmask 1043459  }
  0x33   :  { %5724 = vmatmul.mubr.msk.f32.vlgmr.msra.gmra.mxu1 %vm109_vm0, %v90_v2  ;;  %5729 = vmatprep.subr.mxu1 %v6630_v6  ;;  %v87_v9 = vld [vmem:[#allocation2 + $0x10] sm:$0xff]  ;;  %v6709_v10 = vld [vmem:[#allocation6] sm:$0xff]  ;;  %v88_v11 = vld [vmem:[#allocation2 + $0x18] sm:$0xff]  ;;  %vm632_vm6 = vcmask 1044484   ;;  %vm635_vm7 = vcmask 1045509   ;;  %vm638_vm8 = vcmask 1046534  }
  0x34   :  { %5730 = vmatpush3.msra.mxu1 %v6702_v3  ;;  %5716 = vmatpush3.msra.mxu0 %v93_v0  ;;  %v5503_v16 = vld [vmem:[%s8344_s3] ss:$0 sm:$0xff]  ;;  %s6632_s3 = smov 80   ;;  %vm641_vm9 = vcmask 1047559   ;;  %s6634_s11 = smov 96   ;;  %vm239_vm10 = vcmask 130048  }
  0x35   :  { %5717 = vmatprep.mubr.msk.f32.mxu0 %vm109_vm0, %v85_v4  ;;  %5726 = vmatprep.mubr.msk.f32.mxu1 %vm109_vm0, %v91_v5  ;;  %s6635_s14 = smov 116   ;;  %s6636_s15 = smov 4   ;;  %vm537_vm11 = vcmask 31744   ;;  %vm5224_vm12 = vcmask 1040384   ;;  %vm5233_vm13 = vcmask 1041408   ;;  %vm5242_vm14 = vcmask 1042432  }
  0x36   :  { %5718 = vmatmul.mubr.msk.f32.vlgmr.msra.gmra.mxu0 %vm109_vm0, %v86_v7  ;;  %5731 = vmatprep.subr.mxu1 %v6630_v6  ;;  %s6637_s16 = smov 120   ;;  %vm5259_vm15 = vcmask 1044480  }
  0x37   :  { %5727 = vmatmul.mubr.msk.f32.gmra.mxu1 %vm109_vm0, %v92_v8  ;;  %5720 = vmatprep.mubr.msk.f32.mxu0 %vm109_vm0, %v87_v9 }
  0x38   :  { %5732 = vmatpush3.msra.mxu1 %v6709_v10  ;;  %5733 = vmatprep.mubr.msk.f32.mxu1 %vm6631_vm1, %v6630_v6 }
  0x39   :  { %5736 = vmatprep.subr.mxu1 %v6630_v6  ;;  %5755 = vmatprep.subr.mxu0 %v6630_v6 }
  0x3a   :  { %5721 = vmatmul.mubr.msk.f32.gmra.mxu0 %vm109_vm0, %v88_v11  ;;  %vm5268_vm0 = vcmask 1045504  }
  0x3b   :  { %5734 = vmatmul.mubr.f32.vlgmr.msra.gmra.mxu1 %v6630_v6  ;;  %5757 = vmatprep.mubr.msk.f32.mxu0 %vm6631_vm1, %v6630_v6 }
  0x3c   :  { %5738 = vmatprep.mubr.msk.f32.mxu1 %vm6631_vm1, %v6630_v6 }
  0xf3   :  { %v5725_v12 = vpop.f32.mrf.mxu1 }
  0xf4   :  { %v6735_v28 = vadd.f32 %v5725_v12, %v5503_v16 }
  0xf5   :  { %v220_v13 = vpop.f32.mrf.mxu1 }
  0xf6   :  { %v5719_v14 = vpop.f32.mrf.mxu0  ;;  %v6748_v42 = vadd.f32 %v5503_v16, %v220_v13 }
  0xf7   :  { %v5728_v15 = vpop.f32.mrf.mxu1  ;;  %v6740_v34 = vadd.f32 %v5719_v14, %v5503_v16 }
  0xf8   :  { %v200_v17 = vpop.f32.mrf.mxu0  ;;  %v6738_v32 = vadd.f32 %v5728_v15, %v5503_v16 }
  0xf9   :  { %v6729_v18 = vadd.f32 %v5503_v16, %v200_v17  ;;  %v230_v19 = vpop.f32.mrf.mxu1 }
  0xfa   :  { %v5722_v20 = vpop.f32.mrf.mxu0  ;;  %v6752_v46 = vadd.f32 %v5503_v16, %v230_v19 }
  0xfb   :  { %v6731_v21 = vadd.f32 %v5722_v20, %v5503_v16  ;;  %v309_v22 = vpop.f32.mrf.mxu1 }
  0xfc   :  { %v316_v23 = vrot.slane %v309_v22, 3  ;;  %v329_v25 = vadd.f32 %v309_v22, %v6729_v18  ;;  %v318_v26 = vrot.slane %v309_v22, 5  ;;  %v320_v29 = vrot.slane %v309_v22, 7  ;;  %v210_v33 = vpop.f32.mrf.mxu0 }
  0xfd   :  { %v5735_v24 = vpop.f32.mrf.mxu1  ;;  %v314_v31 = vrot.slane %v309_v22, 1  ;;  %v315_v36 = vrot.slane %v309_v22, 2  ;;  %v6743_v37 = vadd.f32 %v5503_v16, %v210_v33  ;;  %v317_v40 = vrot.slane %v309_v22, 4 }
  0xfe   :  { %v332_v27 = vadd.f32 %v316_v23, %v6731_v21  ;;  %5912 = vtanh.f32 %v329_v25  ;;  %v334_v30 = vadd.f32 %v318_v26, %v6735_v28  ;;  %v336_v35 = vadd.f32 %v320_v29, %v6738_v32 }
  0xff   :  { %v330_v38 = vadd.f32 %v314_v31, %v6740_v34  ;;  %v331_v41 = vadd.f32 %v315_v36, %v6743_v37  ;;  %v319_v44 = vrot.slane %v309_v22, 6  ;;  %v333_v45 = vadd.f32 %v317_v40, %v6748_v42 }
 0x100   :  { %5914 = vtanh.f32 %v332_v27  ;;  %v5512_v54 = vmul.f32 -1.442695, %v329_v25  ;;  %v5515_v58 = vmul.f32 -1.442695, %v332_v27  ;;  %v5517_v61 = vmul.f32 -1.442695, %v334_v30 }
 0x101   :  { %5916 = vtanh.f32 %v334_v30  ;;  %v335_v48 = vadd.f32 %v319_v44, %v6752_v46  ;;  %v5513_v55 = vmul.f32 -1.442695, %v330_v38  ;;  %v5514_v57 = vmul.f32 -1.442695, %v331_v41 }
 0x102   :  { %5918 = vtanh.f32 %v336_v35  ;;  %v5516_v60 = vmul.f32 -1.442695, %v333_v45  ;;  %v5519_v63 = vmul.f32 -1.442695, %v336_v35 }
 0x103   :  { %5920 = vtanh.f32 %v330_v38  ;;  %v5518_v62 = vmul.f32 -1.442695, %v335_v48 }
 0x104   :  { %5922 = vtanh.f32 %v331_v41 }
 0x105   :  { %5924 = vtanh.f32 %v333_v45 }
 0x106   :  { %5926 = vtanh.f32 %v335_v48 }
 0x107   :  { %5928 = vpow2.f32 %v5512_v54 }
 0x108   :  { %5930 = vpow2.f32 %v5513_v55 }
 0x109   :  { %5932 = vpow2.f32 %v5514_v57 }
 0x10a   :  { %5934 = vpow2.f32 %v5515_v58 }
 0x10b   :  { %v5913_v39 = vpop.eup %5912 }
 0x10c   :  { %409 = vrot.lane.b32.xlu1 %v5913_v39, %s6632_s3 }
 0x10d   :  { %v5915_v43 = vpop.eup %5914 }
 0x10e   :  { %v5917_v47 = vpop.eup %5916 }
 0x10f   :  { %v5919_v49 = vpop.eup %5918 }
 0x110   :  { %415 = vrot.lane.b32.xlu1 %v5915_v43, %s6632_s3  ;;  %v5921_v50 = vpop.eup %5920 }
 0x111   :  { %411 = vrot.lane.b32.xlu0 %v5921_v50, %s6632_s3  ;;  %v5923_v51 = vpop.eup %5922 }
 0x112   :  { %v5925_v52 = vpop.eup %5924 }
 0x113   :  { %v5927_v53 = vpop.eup %5926 }
 0x114   :  { %419 = vrot.lane.b32.xlu1 %v5917_v47, %s6632_s3  ;;  %v5929_v56 = vpop.eup %5928 }
 0x115   :  { %413 = vrot.lane.b32.xlu0 %v5923_v51, %s6632_s3  ;;  %v361_v59 = vadd.f32 1.0, %v5929_v56  ;;  %v5931_v0 = vpop.eup %5930 }
 0x116   :  { %v362_v1 = vadd.f32 1.0, %v5931_v0  ;;  %v5933_v2 = vpop.eup %5932 }
 0x117   :  { %5936 = vrcp.f32 %v361_v59  ;;  %v5935_v4 = vpop.eup %5934  ;;  %v363_v8 = vadd.f32 1.0, %v5933_v2 }
 0x118   :  { %423 = vrot.lane.b32.xlu1 %v5919_v49, %s6632_s3  ;;  %5938 = vpow2.f32 %v5516_v60  ;;  %v364_v12 = vadd.f32 1.0, %v5935_v4 }
 0x119   :  { %417 = vrot.lane.b32.xlu0 %v5925_v52, %s6632_s3  ;;  %5940 = vpow2.f32 %v5517_v61 }
 0x11a   :  { %5942 = vpow2.f32 %v5518_v62 }
 0x11b   :  { %5944 = vpow2.f32 %v5519_v63 }
 0x11c   :  { %5946 = vrcp.f32 %v362_v1 }
 0x11d   :  { %421 = vrot.lane.b32.xlu0 %v5927_v53, %s6632_s3  ;;  %5948 = vrcp.f32 %v363_v8 }
 0x11e   :  { %5950 = vrcp.f32 %v364_v12 }
 0x124   :  { %v6761_v5 = vpop.eup %5936 }
 0x125   :  { %v5939_v9 = vpop.eup %5938  ;;  %v393_v49 = vmul.f32 0.0, %v6761_v5 }
 0x126   :  { %v5941_v13 = vpop.eup %5940  ;;  %v365_v14 = vadd.f32 1.0, %v5939_v9 }
 0x127   :  { %v5943_v15 = vpop.eup %5942  ;;  %v366_v16 = vadd.f32 1.0, %v5941_v13 }
 0x128   :  { %v367_v17 = vadd.f32 1.0, %v5943_v15  ;;  %5952 = vrcp.f32 %v365_v14  ;;  %v5945_v19 = vpop.eup %5944 }
 0x129   :  { %5954 = vrcp.f32 %v366_v16  ;;  %v368_v20 = vadd.f32 1.0, %v5945_v19  ;;  %v6765_v22 = vpop.eup %5946  ;;  %v6833_v19 = vld [vmem:[%s8346_s5] sm:$0xf] }
 0x12a   :  { %5956 = vrcp.f32 %v367_v17  ;;  %v6769_v26 = vpop.eup %5948  ;;  %v394_v52 = vmul.f32 0.0, %v6765_v22  ;;  %5737 = vmatpush3.msk.msra.mxu1 %vm540_vm2, %v6833_v19  ;;  %5756 = vmatpush3.msk.msra.mxu0 %vm540_vm2, %v6833_v19 }
 0x12b   :  { %5958 = vrcp.f32 %v368_v20  ;;  %v6772_v30 = vpop.eup %5950  ;;  %v395_v56 = vmul.f32 0.0, %v6769_v26  ;;  %5739 = vmatmul.mubr.f32.vlgmr.msra.gmra.mxu1 %v6630_v6  ;;  %5741 = vmatprep.subr.mxu1 %v6630_v6 }
 0x12c   :  { %v396_v59 = vmul.f32 0.0, %v6772_v30  ;;  %5745 = vmatprep.mubr.msk.f32.mxu1 %vm6631_vm1, %v6630_v6  ;;  %5767 = vmatprep.subr.mxu0 %v6630_v6 }
 0x135   :  { %v6775_v31 = vpop.eup %5952 }
 0x136   :  { %v6779_v39 = vpop.eup %5954  ;;  %v397_v60 = vmul.f32 0.0, %v6775_v31 }
 0x137   :  { %v6783_v40 = vpop.eup %5956  ;;  %v398_v1 = vmul.f32 0.0, %v6779_v39 }
 0x138   :  { %v6789_v47 = vpop.eup %5958  ;;  %v399_v2 = vmul.f32 0.0, %v6783_v40 }
 0x17e   :  { %v410_v7 = vpop.permute.xlu1 %409 }
 0x17f   :  { %v433_v11 = vmul.f32 %v6761_v5, %v410_v7 }
 0x181   :  { %449 = vrot.lane.b32.xlu0 %v433_v11, %s6633_s29  ;;  %v400_v11 = vmul.f32 0.0, %v6789_v47 }
 0x182   :  { %v416_v25 = vpop.permute.xlu1 %415 }
 0x183   :  { %v412_v23 = vpop.permute.xlu0 %411  ;;  %v436_v36 = vmul.f32 %v6772_v30, %v416_v25 }
 0x184   :  { %v434_v24 = vmul.f32 %v6765_v22, %v412_v23  ;;  %v6837_v23 = vld [vmem:[#allocation7 + $0x8] sm:$0xff] }
 0x185   :  { %5742 = vmatpush3.msra.mxu1 %v6837_v23 }
 0x186   :  { %451 = vrot.lane.b32.xlu0 %v434_v24, %s6633_s29  ;;  %v420_v33 = vpop.permute.xlu1 %419  ;;  %5743 = vmatprep.subr.mxu1 %v6630_v6 }
 0x187   :  { %v414_v27 = vpop.permute.xlu0 %413  ;;  %v438_v43 = vmul.f32 %v6779_v39, %v420_v33 }
 0x188   :  { %v435_v29 = vmul.f32 %v6769_v26, %v414_v27 }
 0x18a   :  { %453 = vrot.lane.b32.xlu1 %v435_v29, %s6633_s29  ;;  %v424_v45 = vpop.permute.xlu1 %423 }
 0x18b   :  { %v418_v35 = vpop.permute.xlu0 %417  ;;  %v440_v48 = vmul.f32 %v6789_v47, %v424_v45 }
 0x18c   :  { %v437_v38 = vmul.f32 %v6775_v31, %v418_v35 }
 0x18e   :  { %455 = vrot.lane.b32.xlu1 %v436_v36, %s6633_s29  ;;  %457 = vrot.lane.b32.xlu0 %v437_v38, %s6633_s29 }
 0x18f   :  { %v422_v41 = vpop.permute.xlu0 %421 }
 0x190   :  { %v439_v44 = vmul.f32 %v6783_v40, %v422_v41 }
 0x192   :  { %459 = vrot.lane.b32.xlu1 %v438_v43, %s6633_s29  ;;  %461 = vrot.lane.b32.xlu0 %v439_v44, %s6633_s29 }
 0x196   :  { %463 = vrot.lane.b32.xlu1 %v440_v48, %s6633_s29 }
 0x1f3   :  { %v450_v50 = vpop.permute.xlu0 %449 }
 0x1f4   :  { %v6794_v51 = vadd.f32 %v450_v50, %v393_v49  ;;  %v6854_v50 = vld [vmem:[#allocation7] sm:$0xff] }
 0x1f5   :  { %5744 = vmatpush3.msra.mxu1 %v6854_v50 }
 0x1f6   :  { %5960 = vtanh.f32 %v6794_v51  ;;  %5748 = vmatprep.subr.mxu1 %v6630_v6 }
 0x1f8   :  { %v452_v53 = vpop.permute.xlu0 %451 }
 0x1f9   :  { %v6798_v54 = vadd.f32 %v452_v53, %v394_v52 }
 0x1fb   :  { %5962 = vtanh.f32 %v6798_v54 }
 0x1fc   :  { %v454_v57 = vpop.permute.xlu1 %453 }
 0x1fd   :  { %v6803_v58 = vadd.f32 %v454_v57, %v395_v56 }
 0x1ff   :  { %5964 = vtanh.f32 %v6803_v58 }
 0x200   :  { %v456_v61 = vpop.permute.xlu1 %455  ;;  %v458_v62 = vpop.permute.xlu0 %457 }
 0x201   :  { %v6808_v63 = vadd.f32 %v456_v61, %v396_v59  ;;  %v6810_v0 = vadd.f32 %v458_v62, %v397_v60 }
 0x203   :  { %v5961_v55 = vpop.eup %5960  ;;  %5966 = vtanh.f32 %v6808_v63 }
 0x204   :  { %497 = vrot.lane.b32.xlu0 %v5961_v55, %s6633_s29  ;;  %5968 = vtanh.f32 %v6810_v0  ;;  %v460_v4 = vpop.permute.xlu1 %459  ;;  %v462_v7 = vpop.permute.xlu0 %461 }
 0x205   :  { %v6816_v8 = vadd.f32 %v460_v4, %v398_v1  ;;  %v6818_v9 = vadd.f32 %v462_v7, %v399_v2 }
 0x207   :  { %5970 = vtanh.f32 %v6816_v8 }
 0x208   :  { %v5963_v12 = vpop.eup %5962  ;;  %5972 = vtanh.f32 %v6818_v9  ;;  %v464_v13 = vpop.permute.xlu1 %463 }
 0x209   :  { %v6823_v14 = vadd.f32 %v464_v13, %v400_v11  ;;  %499 = vrot.lane.b32.xlu0 %v5963_v12, %s6633_s29 }
 0x20b   :  { %5974 = vtanh.f32 %v6823_v14 }
 0x20c   :  { %v5965_v15 = vpop.eup %5964 }
 0x20d   :  { %501 = vrot.lane.b32.xlu1 %v5965_v15, %s6633_s29 }
 0x210   :  { %v5967_v16 = vpop.eup %5966 }
 0x211   :  { %v5969_v17 = vpop.eup %5968  ;;  %503 = vrot.lane.b32.xlu1 %v5967_v16, %s6633_s29 }
 0x212   :  { %505 = vrot.lane.b32.xlu0 %v5969_v17, %s6633_s29 }
 0x214   :  { %v5971_v20 = vpop.eup %5970 }
 0x215   :  { %v5973_v24 = vpop.eup %5972  ;;  %507 = vrot.lane.b32.xlu1 %v5971_v20, %s6633_s29 }
 0x216   :  { %509 = vrot.lane.b32.xlu0 %v5973_v24, %s6633_s29 }
 0x218   :  { %v5975_v25 = vpop.eup %5974 }
 0x219   :  { %511 = vrot.lane.b32.xlu1 %v5975_v25, %s6633_s29 }
 0x276   :  { %v498_v27 = vpop.permute.xlu0 %497 }
 0x277   :  { %v521_v38 = vmul.f32 %v6761_v5, %v498_v27 }
 0x279   :  { %v529_v52 = vmax.f32 %v521_v38, 0.0 }
 0x27b   :  { %v500_v29 = vpop.permute.xlu0 %499 }
 0x27c   :  { %v522_v33 = vmul.f32 %v6765_v22, %v500_v29 }
 0x27e   :  { %v530_v35 = vmax.f32 %v522_v33, 0.0  ;;  %v757_v41 = vrot.slane %v522_v33, 7 }
 0x27f   :  { %v502_v36 = vpop.permute.xlu1 %501 }
 0x280   :  { %v523_v43 = vmul.f32 %v6769_v26, %v502_v36  ;;  %v622_v44 = vrot.slane %v530_v35, 7  ;;  %v758_v53 = vsel %vm623_vm3, %v757_v41, %v521_v38 }
 0x282   :  { %v531_v45 = vmax.f32 %v523_v43, 0.0  ;;  %v759_v48 = vrot.slane %v523_v43, 6  ;;  %v624_v56 = vsel %vm623_vm3, %v622_v44, %v529_v52 }
 0x283   :  { %v504_v49 = vpop.permute.xlu1 %503 }
 0x284   :  { %v524_v22 = vmul.f32 %v6772_v30, %v504_v49  ;;  %v506_v55 = vpop.permute.xlu0 %505  ;;  %v625_v5 = vrot.slane %v531_v45, 6  ;;  %v760_v60 = vsel %vm626_vm4, %v759_v48, %v758_v53  ;;  %v610_v48 = vpop.f32.mrf.mxu1 }
 0x285   :  { %v525_v26 = vmul.f32 %v6775_v31, %v506_v55 }
 0x286   :  { %v532_v57 = vmax.f32 %v524_v22, 0.0  ;;  %v761_v59 = vrot.slane %v524_v22, 5  ;;  %v627_v31 = vsel %vm626_vm4, %v625_v5, %v624_v56  ;;  %v5740_v49 = vpop.f32.mrf.mxu1 }
 0x287   :  { %v533_v61 = vmax.f32 %v525_v26, 0.0  ;;  %v763_v62 = vrot.slane %v525_v26, 4  ;;  %v508_v1 = vpop.permute.xlu1 %507 }
 0x288   :  { %v628_v2 = vrot.slane %v532_v57, 5  ;;  %v762_v30 = vsel %vm629_vm5, %v761_v59, %v760_v60  ;;  %v526_v4 = vmul.f32 %v6779_v39, %v508_v1  ;;  %v510_v7 = vpop.permute.xlu0 %509 }
 0x289   :  { %v631_v11 = vrot.slane %v533_v61, 4  ;;  %v527_v12 = vmul.f32 %v6783_v40, %v510_v7  ;;  %v764_v17 = vsel %vm632_vm6, %v763_v62, %v762_v30 }
 0x28a   :  { %v630_v13 = vsel %vm629_vm5, %v628_v2, %v627_v31  ;;  %v534_v15 = vmax.f32 %v526_v4, 0.0  ;;  %v765_v16 = vrot.slane %v526_v4, 3 }
 0x28b   :  { %v535_v20 = vmax.f32 %v527_v12, 0.0  ;;  %v767_v24 = vrot.slane %v527_v12, 2  ;;  %v512_v25 = vpop.permute.xlu1 %511  ;;  %v633_v40 = vsel %vm632_vm6, %v631_v11, %v630_v13 }
 0x28c   :  { %v634_v27 = vrot.slane %v534_v15, 3  ;;  %v528_v29 = vmul.f32 %v6789_v47, %v512_v25  ;;  %v766_v39 = vsel %vm635_vm7, %v765_v16, %v764_v17 }
 0x28d   :  { %v637_v33 = vrot.slane %v535_v20, 2  ;;  %v768_v41 = vsel %vm638_vm8, %v767_v24, %v766_v39 }
 0x28e   :  { %v536_v35 = vmax.f32 %v528_v29, 0.0  ;;  %v769_v36 = vrot.slane %v528_v29, 1  ;;  %v636_v38 = vsel %vm635_vm7, %v634_v27, %v633_v40 }
 0x28f   :  { %v639_v47 = vsel %vm638_vm8, %v637_v33, %v636_v38 }
 0x290   :  { %v640_v43 = vrot.slane %v536_v35, 1  ;;  %v770_v44 = vsel %vm641_vm9, %v769_v36, %v768_v41 }
 0x291   :  { %771 = vrot.lane.b32.xlu1 %v770_v44, %s6634_s11 }
 0x292   :  { %v642_v45 = vsel %vm641_vm9, %v640_v43, %v639_v47 }
 0x293   :  { %643 = vrot.lane.b32.xlu0 %v642_v45, %s6634_s11 }
 0x303   :  { %v772_v53 = vpop.permute.xlu1 %771 }
 0x305   :  { %v644_v52 = vpop.permute.xlu0 %643 }
 0x306   :  { %5746 = vmatmul.mubr.msk.f32.vlgmr.msra.gmra.mxu1 %vm239_vm10, %v644_v52 }
 0x307   :  { %5749 = vmatpush3.msra.mxu1 %v6702_v3  ;;  %5752 = vmatprep.mubr.msk.f32.mxu1 %vm6631_vm1, %v6630_v6  ;;  %v6896_v3 = vld [vmem:[%s8347_s6] ss:$0 sm:$0xff] }
 0x308   :  { %5750 = vmatprep.subr.mxu1 %v6630_v6 }
 0x309   :  { %5751 = vmatpush3.msra.mxu1 %v6709_v10 }
 0x30a   :  { %5753 = vmatmul.mubr.msk.f32.vlgmr.msra.gmra.mxu1 %vm239_vm10, %v772_v53  ;;  %5760 = vmatprep.subr.mxu1 %v6630_v6 }
 0x30b   :  { %5761 = vmatpush3.msra.mxu1 %v6837_v23  ;;  %5764 = vmatprep.mubr.msk.f32.mxu1 %vm6631_vm1, %v6630_v6 }
 0x30c   :  { %5762 = vmatprep.subr.mxu1 %v6630_v6 }
 0x30d   :  { %5763 = vmatpush3.msra.mxu1 %v6854_v50 }
 0x30e   :  { %5774 = vmatprep.subr.mxu1 %v6630_v6 }
 0x3c6   :  { %v713_v10 = vpop.f32.mrf.mxu1 }
 0x3c7   :  { %v714_v22 = vadd.f32 %v713_v10, %v610_v48 }
 0x3c8   :  { %v5747_v55 = vpop.f32.mrf.mxu1 }
 0x3c9   :  { %v723_v5 = vadd.f32 %v6896_v3, %v714_v22 }
 0x3ca   :  { %v841_v26 = vpop.f32.mrf.mxu1 }
 0x3cb   :  { %5976 = vtanh.f32 %v723_v5  ;;  %v847_v57 = vrot.slane %v841_v26, 1  ;;  %v846_v59 = vrot.slane %v841_v26, 7  ;;  %v862_v60 = vadd.f32 %v841_v26, %v6740_v34 }
 0x3cc   :  { %v5754_v56 = vpop.f32.mrf.mxu1  ;;  %v848_v61 = vrot.slane %v841_v26, 2  ;;  %v849_v2 = vrot.slane %v841_v26, 3  ;;  %v850_v4 = vrot.slane %v841_v26, 4  ;;  %v852_v31 = vrot.slane %v841_v26, 6 }
 0x3cd   :  { %v863_v62 = vadd.f32 %v847_v57, %v6743_v37  ;;  %v861_v30 = vadd.f32 %v846_v59, %v6729_v18  ;;  %5978 = vtanh.f32 %v862_v60  ;;  %v851_v12 = vrot.slane %v841_v26, 5 }
 0x3ce   :  { %v864_v7 = vadd.f32 %v848_v61, %v6731_v21  ;;  %v865_v11 = vadd.f32 %v849_v2, %v6748_v42  ;;  %v866_v13 = vadd.f32 %v850_v4, %v6735_v28  ;;  %v868_v15 = vadd.f32 %v852_v31, %v6738_v32 }
 0x3cf   :  { %5980 = vtanh.f32 %v863_v62  ;;  %v867_v16 = vadd.f32 %v851_v12, %v6752_v46  ;;  %v5523_v40 = vmul.f32 -1.442695, %v723_v5  ;;  %v5526_v35 = vmul.f32 -1.442695, %v862_v60 }
 0x3d0   :  { %5982 = vtanh.f32 %v861_v30  ;;  %v5527_v36 = vmul.f32 -1.442695, %v863_v62  ;;  %v5525_v41 = vmul.f32 -1.442695, %v861_v30  ;;  %v5528_v43 = vmul.f32 -1.442695, %v864_v7 }
 0x3d1   :  { %5984 = vtanh.f32 %v864_v7  ;;  %v5529_v47 = vmul.f32 -1.442695, %v865_v11  ;;  %v5530_v45 = vmul.f32 -1.442695, %v866_v13  ;;  %v5532_v48 = vmul.f32 -1.442695, %v868_v15 }
 0x3d2   :  { %5986 = vtanh.f32 %v865_v11  ;;  %v5531_v49 = vmul.f32 -1.442695, %v867_v16 }
 0x3d3   :  { %5988 = vtanh.f32 %v866_v13 }
 0x3d4   :  { %5990 = vtanh.f32 %v868_v15 }
 0x3d5   :  { %5992 = vtanh.f32 %v867_v16 }
 0x3d6   :  { %5994 = vpow2.f32 %v5523_v40 }
 0x3d7   :  { %5996 = vpow2.f32 %v5526_v35 }
 0x3d8   :  { %v5977_v1 = vpop.eup %5976  ;;  %5998 = vpow2.f32 %v5527_v36 }
 0x3d9   :  { %733 = vrot.lane.b32.xlu0 %v5977_v1, %s6635_s14  ;;  %6000 = vpow2.f32 %v5525_v41 }
 0x3da   :  { %v5979_v17 = vpop.eup %5978  ;;  %6002 = vpow2.f32 %v5528_v43 }
 0x3dc   :  { %v5981_v20 = vpop.eup %5980 }
 0x3dd   :  { %967 = vrot.lane.b32.xlu0 %v5979_v17, %s6632_s3  ;;  %969 = vrot.lane.b32.xlu1 %v5981_v20, %s6632_s3  ;;  %v5983_v24 = vpop.eup %5982 }
 0x3de   :  { %v5985_v25 = vpop.eup %5984 }
 0x3df   :  { %v5987_v27 = vpop.eup %5986 }
 0x3e0   :  { %v5989_v29 = vpop.eup %5988 }
 0x3e1   :  { %965 = vrot.lane.b32.xlu0 %v5983_v24, %s6632_s3  ;;  %971 = vrot.lane.b32.xlu1 %v5985_v25, %s6632_s3  ;;  %v5991_v39 = vpop.eup %5990 }
 0x3e2   :  { %v5993_v33 = vpop.eup %5992 }
 0x3e3   :  { %v5995_v38 = vpop.eup %5994 }
 0x3e4   :  { %v727_v44 = vadd.f32 1.0, %v5995_v38  ;;  %v5997_v52 = vpop.eup %5996 }
 0x3e5   :  { %973 = vrot.lane.b32.xlu0 %v5987_v27, %s6632_s3  ;;  %975 = vrot.lane.b32.xlu1 %v5989_v29, %s6632_s3  ;;  %v5999_v53 = vpop.eup %5998  ;;  %v894_v10 = vadd.f32 1.0, %v5997_v52 }
 0x3e6   :  { %6004 = vrcp.f32 %v727_v44  ;;  %v6001_v22 = vpop.eup %6000  ;;  %v895_v55 = vadd.f32 1.0, %v5999_v53 }
 0x3e7   :  { %6006 = vpow2.f32 %v5529_v47  ;;  %v6003_v5 = vpop.eup %6002  ;;  %v893_v57 = vadd.f32 1.0, %v6001_v22  ;;  %v934_v22 = vrot.slane %v6798_v54, 7 }
 0x3e8   :  { %6008 = vpow2.f32 %v5530_v45  ;;  %v896_v61 = vadd.f32 1.0, %v6003_v5 }
 0x3e9   :  { %979 = vrot.lane.b32.xlu0 %v5991_v39, %s6632_s3  ;;  %977 = vrot.lane.b32.xlu1 %v5993_v33, %s6632_s3  ;;  %6010 = vpow2.f32 %v5532_v48 }
 0x3ea   :  { %6012 = vpow2.f32 %v5531_v49 }
 0x3eb   :  { %6014 = vrcp.f32 %v894_v10 }
 0x3ec   :  { %6016 = vrcp.f32 %v895_v55  ;;  %v935_v55 = vrot.slane %v6803_v58, 7 }
 0x3ed   :  { %6018 = vrcp.f32 %v893_v57 }
 0x3ee   :  { %6020 = vrcp.f32 %v896_v61 }
 0x3f3   :  { %v6916_v26 = vpop.eup %6004 }
 0x3f4   :  { %v6007_v60 = vpop.eup %6006  ;;  %v731_v52 = vmul.f32 0.0, %v6916_v26 }
 0x3f5   :  { %v6009_v62 = vpop.eup %6008  ;;  %v897_v1 = vadd.f32 1.0, %v6007_v60 }
 0x3f6   :  { %v6011_v2 = vpop.eup %6010  ;;  %v898_v30 = vadd.f32 1.0, %v6009_v62 }
 0x3f7   :  { %v6013_v4 = vpop.eup %6012  ;;  %v900_v7 = vadd.f32 1.0, %v6011_v2  ;;  %6022 = vrcp.f32 %v897_v1  ;;  %v936_v1 = vrot.slane %v6808_v63, 7  ;;  %v938_v63 = vrot.slane %v6816_v8, 7 }
 0x3f8   :  { %v899_v31 = vadd.f32 1.0, %v6013_v4  ;;  %6024 = vrcp.f32 %v898_v30  ;;  %v6920_v11 = vpop.eup %6014 }
 0x3f9   :  { %6026 = vrcp.f32 %v900_v7  ;;  %v6922_v13 = vpop.eup %6016  ;;  %v950_v5 = vmul.f32 %v6920_v11, %v934_v22 }
 0x3fa   :  { %6028 = vrcp.f32 %v899_v31  ;;  %v6927_v20 = vpop.eup %6018  ;;  %v951_v57 = vmul.f32 %v6922_v13, %v935_v55 }
 0x3fb   :  { %v6930_v25 = vpop.eup %6020 }
 0x3fc   :  { %v952_v58 = vmul.f32 %v6930_v25, %v936_v1 }
 0x404   :  { %v6935_v33 = vpop.eup %6022 }
 0x405   :  { %v6938_v35 = vpop.eup %6024 }
 0x406   :  { %v6943_v43 = vpop.eup %6026 }
 0x407   :  { %v6946_v47 = vpop.eup %6028 }
 0x44b   :  { %v734_v56 = vpop.permute.xlu0 %733 }
 0x44c   :  { %v736_v59 = vmul.f32 %v6916_v26, %v734_v56 }
 0x44e   :  { %738 = vrot.lane.b32.xlu1 %v736_v59, %s6636_s15  ;;  %v933_v59 = vrot.slane %v6794_v51, 7  ;;  %v937_v51 = vrot.slane %v6810_v0, 7 }
 0x44f   :  { %v968_v12 = vpop.permute.xlu0 %967  ;;  %v970_v16 = vpop.permute.xlu1 %969 }
 0x450   :  { %v990_v15 = vmul.f32 %v6920_v11, %v968_v12  ;;  %v991_v17 = vmul.f32 %v6922_v13, %v970_v16  ;;  %v949_v54 = vmul.f32 %v6927_v20, %v933_v59  ;;  %v953_v12 = vmul.f32 %v6935_v33, %v937_v51 }
 0x452   :  { %1007 = vrot.lane.b32.xlu1 %v990_v15, %s6633_s29  ;;  %1009 = vrot.lane.b32.xlu0 %v991_v17, %s6633_s29  ;;  %v954_v15 = vmul.f32 %v6938_v35, %v938_v63  ;;  %v940_v17 = vrot.slane %v6823_v14, 7 }
 0x453   :  { %v966_v24 = vpop.permute.xlu0 %965  ;;  %v972_v27 = vpop.permute.xlu1 %971 }
 0x454   :  { %v989_v29 = vmul.f32 %v6927_v20, %v966_v24  ;;  %v992_v39 = vmul.f32 %v6930_v25, %v972_v27  ;;  %v939_v27 = vrot.slane %v6818_v9, 7  ;;  %v956_v8 = vmul.f32 %v6943_v43, %v940_v17 }
 0x456   :  { %1005 = vrot.lane.b32.xlu1 %v989_v29, %s6633_s29  ;;  %1011 = vrot.lane.b32.xlu0 %v992_v39, %s6633_s29  ;;  %v955_v39 = vmul.f32 %v6946_v47, %v939_v27 }
 0x457   :  { %v974_v40 = vpop.permute.xlu0 %973  ;;  %v976_v36 = vpop.permute.xlu1 %975 }
 0x458   :  { %v993_v38 = vmul.f32 %v6935_v33, %v974_v40  ;;  %v994_v41 = vmul.f32 %v6938_v35, %v976_v36 }
 0x45a   :  { %1013 = vrot.lane.b32.xlu1 %v993_v38, %s6633_s29  ;;  %1015 = vrot.lane.b32.xlu0 %v994_v41, %s6633_s29 }
 0x45b   :  { %v980_v44 = vpop.permute.xlu0 %979  ;;  %v978_v45 = vpop.permute.xlu1 %977 }
 0x45c   :  { %v996_v48 = vmul.f32 %v6943_v43, %v980_v44  ;;  %v995_v49 = vmul.f32 %v6946_v47, %v978_v45 }
 0x45e   :  { %1019 = vrot.lane.b32.xlu1 %v996_v48, %s6633_s29  ;;  %1017 = vrot.lane.b32.xlu0 %v995_v49, %s6633_s29 }
 0x4c0   :  { %v739_v53 = vpop.permute.xlu1 %738 }
 0x4c1   :  { %v6953_v10 = vadd.f32 %v739_v53, %v731_v52 }
 0x4c3   :  { %6030 = vtanh.f32 %v6953_v10 }
 0x4c4   :  { %v1008_v56 = vpop.permute.xlu1 %1007  ;;  %v1010_v61 = vpop.permute.xlu0 %1009 }
 0x4c5   :  { %v6961_v60 = vadd.f32 %v1008_v56, %v950_v5  ;;  %v6964_v2 = vadd.f32 %v1010_v61, %v951_v57 }
 0x4c7   :  { %6032 = vtanh.f32 %v6961_v60 }
 0x4c8   :  { %6034 = vtanh.f32 %v6964_v2  ;;  %v1006_v30 = vpop.permute.xlu1 %1005  ;;  %v1012_v4 = vpop.permute.xlu0 %1011 }
 0x4c9   :  { %v6972_v7 = vadd.f32 %v1006_v30, %v949_v54  ;;  %v6975_v31 = vadd.f32 %v1012_v4, %v952_v58 }
 0x4cb   :  { %6036 = vtanh.f32 %v6972_v7 }
 0x4cc   :  { %6038 = vtanh.f32 %v6975_v31  ;;  %v1014_v16 = vpop.permute.xlu1 %1013  ;;  %v1016_v24 = vpop.permute.xlu0 %1015 }
 0x4cd   :  { %v6982_v0 = vadd.f32 %v1014_v16, %v953_v12  ;;  %v6985_v29 = vadd.f32 %v1016_v24, %v954_v15 }
 0x4cf   :  { %6040 = vtanh.f32 %v6982_v0 }
 0x4d0   :  { %v6031_v62 = vpop.eup %6030  ;;  %6042 = vtanh.f32 %v6985_v29  ;;  %v1020_v40 = vpop.permute.xlu1 %1019 }
 0x4d1   :  { %744 = vrot.lane.b32.xlu0 %v6031_v62, %s6636_s15  ;;  %v1018_v36 = vpop.permute.xlu0 %1017  ;;  %v6991_v38 = vadd.f32 %v1020_v40, %v956_v8 }
 0x4d2   :  { %v6993_v14 = vadd.f32 %v1018_v36, %v955_v39 }
 0x4d3   :  { %6044 = vtanh.f32 %v6991_v38 }
 0x4d4   :  { %v6033_v41 = vpop.eup %6032  ;;  %6046 = vtanh.f32 %v6993_v14 }
 0x4d5   :  { %v6035_v9 = vpop.eup %6034  ;;  %1055 = vrot.lane.b32.xlu0 %v6033_v41, %s6633_s29 }
 0x4d6   :  { %1057 = vrot.lane.b32.xlu1 %v6035_v9, %s6633_s29 }
 0x4d8   :  { %v6037_v44 = vpop.eup %6036 }
 0x4d9   :  { %v6039_v45 = vpop.eup %6038  ;;  %1053 = vrot.lane.b32.xlu0 %v6037_v44, %s6633_s29 }
 0x4da   :  { %1059 = vrot.lane.b32.xlu1 %v6039_v45, %s6633_s29 }
 0x4dc   :  { %v6041_v48 = vpop.eup %6040 }
 0x4dd   :  { %v6043_v49 = vpop.eup %6042  ;;  %1061 = vrot.lane.b32.xlu0 %v6041_v48, %s6633_s29 }
 0x4de   :  { %1063 = vrot.lane.b32.xlu1 %v6043_v49, %s6633_s29 }
 0x4e0   :  { %v6045_v52 = vpop.eup %6044 }
 0x4e1   :  { %v6047_v53 = vpop.eup %6046  ;;  %1067 = vrot.lane.b32.xlu0 %v6045_v52, %s6633_s29 }
 0x4e2   :  { %1065 = vrot.lane.b32.xlu1 %v6047_v53, %s6633_s29 }
 0x543   :  { %v745_v22 = vpop.permute.xlu0 %744 }
 0x544   :  { %v7006_v55 = vmul.f32 %v6916_v26, %v745_v22 }
 0x546   :  { %1094 = vrot.lane.b32.xlu1 %v7006_v55, %s6637_s16 }
 0x547   :  { %v1056_v5 = vpop.permute.xlu0 %1055 }
 0x548   :  { %v1058_v56 = vpop.permute.xlu1 %1057  ;;  %v1078_v59 = vmul.f32 %v6920_v11, %v1056_v5 }
 0x549   :  { %v1079_v57 = vmul.f32 %v6922_v13, %v1058_v56 }
 0x54a   :  { %v1086_v51 = vmax.f32 %v1078_v59, 0.0 }
 0x54b   :  { %v1054_v61 = vpop.permute.xlu0 %1053  ;;  %v1087_v54 = vmax.f32 %v1079_v57, 0.0  ;;  %v1300_v4 = vrot.slane %v1079_v57, 7 }
 0x54c   :  { %v1060_v62 = vpop.permute.xlu1 %1059  ;;  %v1077_v1 = vmul.f32 %v6927_v20, %v1054_v61 }
 0x54d   :  { %v1080_v58 = vmul.f32 %v6930_v25, %v1060_v62  ;;  %v1178_v24 = vrot.slane %v1087_v54, 7 }
 0x54e   :  { %v1085_v30 = vmax.f32 %v1077_v1, 0.0  ;;  %v1298_v26 = vrot.slane %v1077_v1, 1 }
 0x54f   :  { %v1088_v63 = vmax.f32 %v1080_v58, 0.0  ;;  %v1062_v12 = vpop.permute.xlu0 %1061  ;;  %v1302_v15 = vrot.slane %v1080_v58, 6 }
 0x550   :  { %v1176_v16 = vrot.slane %v1085_v30, 1  ;;  %v1299_v17 = vsel %vm623_vm3, %v1078_v59, %v1298_v26  ;;  %v1064_v13 = vpop.permute.xlu1 %1063  ;;  %v1081_v11 = vmul.f32 %v6935_v33, %v1062_v12 }
 0x551   :  { %v1180_v27 = vrot.slane %v1088_v63, 6  ;;  %v1301_v20 = vsel %vm626_vm4, %v1300_v4, %v1299_v17  ;;  %v1082_v8 = vmul.f32 %v6938_v35, %v1064_v13  ;;  %v7035_v4 = vld [vmem:[#allocation6 + $0x8] sm:$0xff]  ;;  %v7041_v63 = vld [vmem:[#allocation6] sm:$0xff] }
 0x552   :  { %v1177_v25 = vsel %vm623_vm3, %v1086_v51, %v1176_v16  ;;  %v1303_v39 = vsel %vm629_vm5, %v1302_v15, %v1301_v20  ;;  %v1089_v40 = vmax.f32 %v1081_v11, 0.0  ;;  %v1304_v36 = vrot.slane %v1081_v11, 5 }
 0x553   :  { %v1179_v41 = vsel %vm626_vm4, %v1178_v24, %v1177_v25  ;;  %v1090_v9 = vmax.f32 %v1082_v8, 0.0  ;;  %v1068_v44 = vpop.permute.xlu0 %1067  ;;  %v1306_v45 = vrot.slane %v1082_v8, 4 }
 0x554   :  { %v1182_v48 = vrot.slane %v1089_v40, 5  ;;  %v1066_v49 = vpop.permute.xlu1 %1065  ;;  %v1084_v33 = vmul.f32 %v6943_v43, %v1068_v44  ;;  %v1181_v52 = vsel %vm629_vm5, %v1180_v27, %v1179_v41  ;;  %v1305_v53 = vsel %vm632_vm6, %v1304_v36, %v1303_v39 }
 0x555   :  { %v1083_v35 = vmul.f32 %v6946_v47, %v1066_v49  ;;  %v1184_v22 = vrot.slane %v1090_v9, 4  ;;  %v1307_v1 = vsel %vm635_vm7, %v1306_v45, %v1305_v53 }
 0x556   :  { %v1092_v5 = vmax.f32 %v1084_v33, 0.0  ;;  %v1310_v56 = vrot.slane %v1084_v33, 2  ;;  %v1183_v61 = vsel %vm632_vm6, %v1182_v48, %v1181_v52 }
 0x557   :  { %v1091_v57 = vmax.f32 %v1083_v35, 0.0  ;;  %v1308_v59 = vrot.slane %v1083_v35, 3  ;;  %v1185_v30 = vsel %vm635_vm7, %v1184_v22, %v1183_v61 }
 0x558   :  { %v1188_v62 = vrot.slane %v1092_v5, 2 }
 0x559   :  { %v1186_v54 = vrot.slane %v1091_v57, 3  ;;  %v1309_v58 = vsel %vm638_vm8, %v1308_v59, %v1307_v1 }
 0x55a   :  { %v1311_v43 = vsel %vm641_vm9, %v1310_v56, %v1309_v58 }
 0x55b   :  { %1312 = vrot.lane.b32.xlu0 %v1311_v43, %s6634_s11  ;;  %v1187_v47 = vsel %vm638_vm8, %v1186_v54, %v1185_v30 }
 0x55c   :  { %v1189_v26 = vsel %vm641_vm9, %v1188_v62, %v1187_v47 }
 0x55d   :  { %1190 = vrot.lane.b32.xlu1 %v1189_v26, %s6634_s11 }
 0x5b8   :  { %v1095_v51 = vpop.permute.xlu1 %1094 }
 0x5b9   :  { %5758 = vmatmul.mubr.msk.f32.vlgmr.msra.gmra.mxu0 %vm537_vm11, %v1095_v51 }
 0x5ba   :  { %5768 = vmatpush3.msra.mxu0 %v7035_v4  ;;  %5771 = vmatprep.mubr.msk.f32.mxu0 %vm6631_vm1, %v6630_v6 }
 0x5bb   :  { %5769 = vmatprep.subr.mxu0 %v6630_v6 }
 0x5bc   :  { %5770 = vmatpush3.msra.mxu0 %v7041_v63 }
 0x5bd   :  { %5779 = vmatprep.subr.mxu0 %v6630_v6 }
 0x5cd   :  { %v1313_v12 = vpop.permute.xlu0 %1312 }
 0x5ce   :  { %5772 = vmatmul.mubr.msk.f32.vlgmr.msra.gmra.mxu0 %vm239_vm10, %v1313_v12 }
 0x5cf   :  { %v1191_v15 = vpop.permute.xlu1 %1190  ;;  %5780 = vmatpush3.msra.mxu0 %v6837_v23  ;;  %5783 = vmatprep.mubr.msk.f32.mxu0 %vm6631_vm1, %v6630_v6 }
 0x5d0   :  { %5765 = vmatmul.mubr.msk.f32.vlgmr.msra.gmra.mxu1 %vm239_vm10, %v1191_v15  ;;  %5781 = vmatprep.subr.mxu0 %v6630_v6 }
 0x5d1   :  { %5775 = vmatpush3.msk.msra.mxu1 %vm540_vm2, %v6833_v19  ;;  %5776 = vmatprep.mubr.msk.f32.mxu1 %vm6631_vm1, %v6630_v6 }
 0x5d2   :  { %5786 = vmatprep.subr.mxu1 %v6630_v6  ;;  %5782 = vmatpush3.msra.mxu0 %v6854_v50 }
 0x5d3   :  { %5793 = vmatprep.subr.mxu0 %v6630_v6 }
 0x679   :  { %v1164_v23 = vpop.f32.mrf.mxu0 }
 0x67b   :  { %v5759_v16 = vpop.f32.mrf.mxu0 }
 0x68e   :  { %v1382_v17 = vpop.f32.mrf.mxu0 }
 0x68f   :  { %v1387_v13 = vrot.slane %v1382_v17, 6  ;;  %v1389_v19 = vrot.slane %v1382_v17, 1  ;;  %v1388_v8 = vrot.slane %v1382_v17, 7  ;;  %v1404_v25 = vadd.f32 %v1382_v17, %v6743_v37 }
 0x690   :  { %v1260_v11 = vpop.f32.mrf.mxu1  ;;  %v5773_v24 = vpop.f32.mrf.mxu0  ;;  %v1390_v39 = vrot.slane %v1382_v17, 2  ;;  %v1391_v50 = vrot.slane %v1382_v17, 3  ;;  %v1392_v44 = vrot.slane %v1382_v17, 4  ;;  %v1393_v33 = vrot.slane %v1382_v17, 5 }
 0x691   :  { %v1402_v27 = vadd.f32 %v1387_v13, %v6729_v18  ;;  %v1405_v40 = vadd.f32 %v1389_v19, %v6731_v21  ;;  %v1403_v36 = vadd.f32 %v1388_v8, %v6740_v34  ;;  %v1261_v48 = vadd.f32 %v1260_v11, %v1164_v23 }
 0x692   :  { %v5766_v20 = vpop.f32.mrf.mxu1  ;;  %v1406_v41 = vadd.f32 %v1390_v39, %v6748_v42  ;;  %v1407_v45 = vadd.f32 %v1391_v50, %v6735_v28  ;;  %v1408_v49 = vadd.f32 %v1392_v44, %v6752_v46  ;;  %v1409_v22 = vadd.f32 %v1393_v33, %v6738_v32 }
 0x693   :  { %6048 = vtanh.f32 %v1402_v27  ;;  %v1264_v52 = vadd.f32 %v6896_v3, %v1261_v48  ;;  %v5538_v62 = vmul.f32 -1.442695, %v1402_v27  ;;  %v5540_v1 = vmul.f32 -1.442695, %v1404_v25 }
 0x694   :  { %6050 = vtanh.f32 %v1404_v25  ;;  %v5541_v54 = vmul.f32 -1.442695, %v1405_v40  ;;  %v5539_v58 = vmul.f32 -1.442695, %v1403_v36  ;;  %v5542_v43 = vmul.f32 -1.442695, %v1406_v41 }
 0x695   :  { %6052 = vtanh.f32 %v1405_v40  ;;  %v5543_v47 = vmul.f32 -1.442695, %v1407_v45  ;;  %v5544_v51 = vmul.f32 -1.442695, %v1408_v49  ;;  %v5536_v12 = vmul.f32 -1.442695, %v1264_v52 }
 0x696   :  { %6054 = vtanh.f32 %v1403_v36  ;;  %v5545_v16 = vmul.f32 -1.442695, %v1409_v22 }
 0x697   :  { %6056 = vtanh.f32 %v1406_v41 }
 0x698   :  { %6058 = vtanh.f32 %v1407_v45 }
 0x699   :  { %6060 = vtanh.f32 %v1408_v49 }
 0x69a   :  { %6062 = vtanh.f32 %v1264_v52 }
 0x69b   :  { %6064 = vtanh.f32 %v1409_v22 }
 0x69c   :  { %6066 = vpow2.f32 %v5538_v62 }
 0x69d   :  { %6068 = vpow2.f32 %v5540_v1 }
 0x69e   :  { %6070 = vpow2.f32 %v5541_v54 }
 0x69f   :  { %6072 = vpow2.f32 %v5539_v58 }
 0x6a0   :  { %v6049_v9 = vpop.eup %6048  ;;  %6074 = vpow2.f32 %v5542_v43 }
 0x6a1   :  { %1506 = vrot.lane.b32.xlu0 %v6049_v9, %s6632_s3  ;;  %v6051_v53 = vpop.eup %6050  ;;  %6076 = vpow2.f32 %v5543_v47 }
 0x6a2   :  { %v6053_v35 = vpop.eup %6052  ;;  %1510 = vrot.lane.b32.xlu1 %v6051_v53, %s6632_s3 }
 0x6a3   :  { %v6055_v5 = vpop.eup %6054 }
 0x6a4   :  { %v6057_v56 = vpop.eup %6056 }
 0x6a5   :  { %1512 = vrot.lane.b32.xlu0 %v6053_v35, %s6632_s3  ;;  %v6059_v57 = vpop.eup %6058 }
 0x6a6   :  { %1508 = vrot.lane.b32.xlu1 %v6055_v5, %s6632_s3  ;;  %v6061_v3 = vpop.eup %6060 }
 0x6a7   :  { %v6063_v59 = vpop.eup %6062 }
 0x6a8   :  { %v6065_v61 = vpop.eup %6064 }
 0x6a9   :  { %1514 = vrot.lane.b32.xlu0 %v6057_v56, %s6632_s3  ;;  %v6067_v30 = vpop.eup %6066 }
 0x6aa   :  { %1516 = vrot.lane.b32.xlu1 %v6059_v57, %s6632_s3  ;;  %v1434_v26 = vadd.f32 1.0, %v6067_v30  ;;  %v6069_v15 = vpop.eup %6068 }
 0x6ab   :  { %v6071_v23 = vpop.eup %6070  ;;  %v1436_v17 = vadd.f32 1.0, %v6069_v15 }
 0x6ac   :  { %6078 = vrcp.f32 %v1434_v26  ;;  %v6073_v13 = vpop.eup %6072  ;;  %v1437_v11 = vadd.f32 1.0, %v6071_v23  ;;  %v1474_v23 = vrot.slane %v6972_v7, 7 }
 0x6ad   :  { %1274 = vrot.lane.b32.xlu0 %v6063_v59, %s6635_s14  ;;  %6080 = vpow2.f32 %v5544_v51  ;;  %v6075_v24 = vpop.eup %6074  ;;  %v1435_v27 = vadd.f32 1.0, %v6073_v13 }
 0x6ae   :  { %1518 = vrot.lane.b32.xlu1 %v6061_v3, %s6632_s3  ;;  %6082 = vpow2.f32 %v5536_v12  ;;  %v6077_v20 = vpop.eup %6076  ;;  %v1438_v19 = vadd.f32 1.0, %v6075_v24  ;;  %v1477_v24 = vrot.slane %v6975_v31, 7 }
 0x6af   :  { %6084 = vpow2.f32 %v5545_v16  ;;  %v1439_v39 = vadd.f32 1.0, %v6077_v20 }
 0x6b0   :  { %6086 = vrcp.f32 %v1436_v17 }
 0x6b1   :  { %1520 = vrot.lane.b32.xlu0 %v6065_v61, %s6632_s3  ;;  %6088 = vrcp.f32 %v1437_v11  ;;  %v1476_v11 = vrot.slane %v6964_v2, 7 }
 0x6b2   :  { %6090 = vrcp.f32 %v1435_v27 }
 0x6b3   :  { %6092 = vrcp.f32 %v1438_v19 }
 0x6b4   :  { %6094 = vrcp.f32 %v1439_v39 }
 0x6b9   :  { %v7076_v8 = vpop.eup %6078 }
 0x6ba   :  { %v6081_v50 = vpop.eup %6080  ;;  %v1490_v16 = vmul.f32 %v7076_v8, %v1474_v23 }
 0x6bb   :  { %v6083_v36 = vpop.eup %6082  ;;  %v1440_v41 = vadd.f32 1.0, %v6081_v50 }
 0x6bc   :  { %v1268_v9 = vadd.f32 1.0, %v6083_v36  ;;  %v6085_v44 = vpop.eup %6084 }
 0x6bd   :  { %6096 = vrcp.f32 %v1440_v41  ;;  %v7080_v45 = vpop.eup %6086  ;;  %v1441_v53 = vadd.f32 1.0, %v6085_v44  ;;  %v1479_v41 = vrot.slane %v6985_v29, 7 }
 0x6be   :  { %v7082_v49 = vpop.eup %6088  ;;  %6098 = vrcp.f32 %v1268_v9  ;;  %v1492_v27 = vmul.f32 %v7080_v45, %v1476_v11 }
 0x6bf   :  { %v7087_v22 = vpop.eup %6090  ;;  %6100 = vrcp.f32 %v1441_v53  ;;  %v1493_v19 = vmul.f32 %v7082_v49, %v1477_v24  ;;  %v4541_v24 = vlaneseq }
 0x6c0   :  { %v7090_v56 = vpop.eup %6092 }
 0x6c1   :  { %v7095_v61 = vpop.eup %6094 }
 0x6ca   :  { %v7100_v54 = vpop.eup %6096 }
 0x6cb   :  { %v7103_v30 = vpop.eup %6098 }
 0x6cc   :  { %v7108_v51 = vpop.eup %6100 }
 0x713   :  { %v1507_v25 = vpop.permute.xlu0 %1506 }
 0x714   :  { %v1530_v40 = vmul.f32 %v7076_v8, %v1507_v25  ;;  %v1511_v48 = vpop.permute.xlu1 %1510  ;;  %v1475_v25 = vrot.slane %v6961_v60, 7 }
 0x715   :  { %v1532_v33 = vmul.f32 %v7080_v45, %v1511_v48 }
 0x716   :  { %1546 = vrot.lane.b32.xlu1 %v1530_v40, %s6633_s29  ;;  %v1478_v40 = vrot.slane %v6982_v0, 7  ;;  %v1491_v2 = vmul.f32 %v7087_v22, %v1475_v25  ;;  %v1495_v0 = vmul.f32 %v7095_v61, %v1479_v41 }
 0x717   :  { %v1513_v52 = vpop.permute.xlu0 %1512  ;;  %1550 = vrot.lane.b32.xlu0 %v1532_v33, %s6633_s29 }
 0x718   :  { %v1533_v35 = vmul.f32 %v7082_v49, %v1513_v52  ;;  %v1509_v5 = vpop.permute.xlu1 %1508  ;;  %v1494_v31 = vmul.f32 %v7090_v56, %v1478_v40  ;;  %v1480_v52 = vrot.slane %v6993_v14, 7  ;;  %v748_v40 = vmax.f32 %v7006_v55, 0.0 }
 0x719   :  { %v1531_v57 = vmul.f32 %v7087_v22, %v1509_v5 }
 0x71a   :  { %1552 = vrot.lane.b32.xlu1 %v1533_v35, %s6633_s29  ;;  %v1496_v29 = vmul.f32 %v7100_v54, %v1480_v52 }
 0x71b   :  { %v1515_v3 = vpop.permute.xlu0 %1514  ;;  %1548 = vrot.lane.b32.xlu0 %v1531_v57, %s6633_s29  ;;  %v1272_v57 = vmul.f32 %v7103_v30, %v6953_v10 }
 0x71c   :  { %v1534_v59 = vmul.f32 %v7090_v56, %v1515_v3  ;;  %v1517_v62 = vpop.permute.xlu1 %1516 }
 0x71d   :  { %v1535_v1 = vmul.f32 %v7095_v61, %v1517_v62  ;;  %v1481_v62 = vrot.slane %v6991_v38, 7 }
 0x71e   :  { %1554 = vrot.lane.b32.xlu1 %v1534_v59, %s6633_s29 }
 0x71f   :  { %1556 = vrot.lane.b32.xlu0 %v1535_v1, %s6633_s29  ;;  %v1275_v47 = vpop.permute.xlu0 %1274 }
 0x720   :  { %v1519_v58 = vpop.permute.xlu1 %1518  ;;  %v1277_v26 = vmul.f32 %v7103_v30, %v1275_v47 }
 0x721   :  { %v1536_v43 = vmul.f32 %v7100_v54, %v1519_v58  ;;  %v1497_v58 = vmul.f32 %v7108_v51, %v1481_v62 }
 0x722   :  { %1279 = vrot.lane.b32.xlu1 %v1277_v26, %s6636_s15 }
 0x723   :  { %1558 = vrot.lane.b32.xlu0 %v1536_v43, %s6633_s29  ;;  %v1521_v12 = vpop.permute.xlu0 %1520 }
 0x724   :  { %v1537_v15 = vmul.f32 %v7108_v51, %v1521_v12 }
 0x726   :  { %1560 = vrot.lane.b32.xlu1 %v1537_v15, %s6633_s29 }
 0x788   :  { %v1547_v17 = vpop.permute.xlu1 %1546 }
 0x789   :  { %v7114_v13 = vadd.f32 %v1547_v17, %v1490_v16  ;;  %v1551_v20 = vpop.permute.xlu0 %1550  ;;  %v6638_v17 = vmov 1966171168  }
 0x78a   :  { %v7122_v39 = vadd.f32 %v1551_v20, %v1492_v27  ;;  %v4539_v11 = vunpack.c.l.s4 %v6638_v17 }
 0x78b   :  { %6102 = vtanh.f32 %v7114_v13 }
 0x78c   :  { %v1553_v7 = vpop.permute.xlu1 %1552  ;;  %6104 = vtanh.f32 %v7122_v39  ;;  %v4540_v25 = vunpack.c.0.s8 %v4539_v11 }
 0x78d   :  { %v7125_v50 = vadd.f32 %v1553_v7, %v1493_v19  ;;  %v1549_v36 = vpop.permute.xlu0 %1548  ;;  %v4542_v7 = vshrl.u32 %v4541_v24, 7 }
 0x78e   :  { %v7132_v9 = vadd.f32 %v1549_v36, %v1491_v2 }
 0x78f   :  { %6106 = vtanh.f32 %v7125_v50 }
 0x790   :  { %v1555_v60 = vpop.permute.xlu1 %1554  ;;  %6108 = vtanh.f32 %v7132_v9 }
 0x791   :  { %v7134_v48 = vadd.f32 %v1555_v60, %v1494_v31  ;;  %v1557_v33 = vpop.permute.xlu0 %1556 }
 0x792   :  { %v7141_v53 = vadd.f32 %v1557_v33, %v1495_v0  ;;  %v4537_v33 = vcombine.high %v748_v40, %v748_v40 }
 0x793   :  { %6110 = vtanh.f32 %v7134_v48 }
 0x794   :  { %6112 = vtanh.f32 %v7141_v53  ;;  %v1280_v3 = vpop.permute.xlu1 %1279 }
 0x795   :  { %v1559_v35 = vpop.permute.xlu0 %1558  ;;  %v7151_v1 = vadd.f32 %v1280_v3, %v1272_v57 }
 0x796   :  { %v7145_v5 = vadd.f32 %v1559_v35, %v1496_v29 }
 0x798   :  { %v6103_v44 = vpop.eup %6102  ;;  %6114 = vtanh.f32 %v7145_v5  ;;  %v1561_v43 = vpop.permute.xlu1 %1560 }
 0x799   :  { %1594 = vrot.lane.b32.xlu0 %v6103_v44, %s6633_s29  ;;  %v6105_v59 = vpop.eup %6104  ;;  %6116 = vtanh.f32 %v7151_v1  ;;  %v7157_v10 = vadd.f32 %v1561_v43, %v1497_v58  ;;  %v7170_v44 = vsub.s32 %v4540_v25, %v4542_v7 }
 0x79a   :  { %1598 = vrot.lane.b32.xlu1 %v6105_v59, %s6633_s29 }
 0x79b   :  { %6118 = vtanh.f32 %v7157_v10  ;;  %v4544_v62 = vrot.slane %v748_v40, %v7170_v44 }
 0x79c   :  { %v6107_v14 = vpop.eup %6106 }
 0x79d   :  { %1600 = vrot.lane.b32.xlu0 %v6107_v14, %s6633_s29  ;;  %v6109_v47 = vpop.eup %6108  ;;  %v4551_v14 = vrot.slane %v4537_v33, %v7170_v44  ;;  %v4560_v24 = vrot.slane %v4544_v62, %v7170_v44 }
 0x79e   :  { %1596 = vrot.lane.b32.xlu1 %v6109_v47, %s6633_s29 }
 0x79f   :  { %v4553_v11 = vcombine.high %v4551_v14, %v4551_v14  ;;  %v4567_v25 = vrot.slane %v4551_v14, %v7170_v44  ;;  %v4582_v33 = vcombine.high %v4560_v24, %v4560_v24 }
 0x7a0   :  { %v6111_v26 = vpop.eup %6110 }
 0x7a1   :  { %1602 = vrot.lane.b32.xlu0 %v6111_v26, %s6633_s29  ;;  %v6113_v38 = vpop.eup %6112 }
 0x7a2   :  { %1604 = vrot.lane.b32.xlu1 %v6113_v38, %s6633_s29 }
 0x7a5   :  { %v6115_v12 = vpop.eup %6114 }
 0x7a6   :  { %1606 = vrot.lane.b32.xlu1 %v6115_v12, %s6633_s29  ;;  %v6117_v15 = vpop.eup %6116 }
 0x7a7   :  { %1285 = vrot.lane.b32.xlu0 %v6117_v15, %s6636_s15 }
 0x7a8   :  { %v6119_v23 = vpop.eup %6118 }
 0x7ab   :  { %1608 = vrot.lane.b32.xlu0 %v6119_v23, %s6633_s29  ;;  %v4552_v23 = vcombine.high %v4544_v62, %v4544_v62  ;;  %v7195_v62 = vsub.s32 0, %v4542_v7 }
 0x80b   :  { %v1595_v16 = vpop.permute.xlu0 %1594 }
 0x80c   :  { %v1599_v27 = vpop.permute.xlu1 %1598  ;;  %v1618_v20 = vmul.f32 %v7076_v8, %v1595_v16 }
 0x80d   :  { %v1620_v8 = vmul.f32 %v7080_v45, %v1599_v27 }
 0x80e   :  { %v1626_v36 = vmax.f32 %v1618_v20, 0.0  ;;  %v1839_v35 = vrot.slane %v1618_v20, 2 }
 0x80f   :  { %v1601_v19 = vpop.permute.xlu0 %1600  ;;  %v1628_v43 = vmax.f32 %v1620_v8, 0.0 }
 0x810   :  { %v1597_v2 = vpop.permute.xlu1 %1596  ;;  %v1621_v41 = vmul.f32 %v7082_v49, %v1601_v19  ;;  %v1717_v3 = vrot.slane %v1626_v36, 2  ;;  %v4574_v36 = vrot.slane %v4552_v23, %v7170_v44 }
 0x811   :  { %v1619_v31 = vmul.f32 %v7087_v22, %v1597_v2 }
 0x812   :  { %v1629_v59 = vmax.f32 %v1621_v41, 0.0  ;;  %v1843_v47 = vrot.slane %v1621_v41, 7 }
 0x813   :  { %v1603_v60 = vpop.permute.xlu0 %1602  ;;  %v1627_v52 = vmax.f32 %v1619_v31, 0.0  ;;  %v1840_v29 = vrot.slane %v1619_v31, 1 }
 0x814   :  { %v1622_v0 = vmul.f32 %v7090_v56, %v1603_v60  ;;  %v1605_v57 = vpop.permute.xlu1 %1604  ;;  %v1721_v45 = vrot.slane %v1629_v59, 7 }
 0x815   :  { %v1718_v55 = vrot.slane %v1627_v52, 1  ;;  %v1841_v22 = vsel %vm623_vm3, %v1840_v29, %v1839_v35  ;;  %v1623_v56 = vmul.f32 %v7095_v61, %v1605_v57 }
 0x816   :  { %v1630_v49 = vmax.f32 %v1622_v0, 0.0  ;;  %v1842_v38 = vsel %vm626_vm4, %v1620_v8, %v1841_v22  ;;  %v1845_v12 = vrot.slane %v1622_v0, 6  ;;  %v4581_v0 = vrot.slane %v4553_v11, %v7170_v44 }
 0x817   :  { %v1719_v58 = vsel %vm623_vm3, %v1718_v55, %v1717_v3  ;;  %v1631_v27 = vmax.f32 %v1623_v56, 0.0  ;;  %v1844_v61 = vsel %vm629_vm5, %v1843_v47, %v1842_v38  ;;  %v1847_v31 = vrot.slane %v1623_v56, 5 }
 0x818   :  { %v1607_v26 = vpop.permute.xlu1 %1606  ;;  %v1720_v16 = vsel %vm626_vm4, %v1628_v43, %v1719_v58  ;;  %v1723_v17 = vrot.slane %v1630_v49, 6  ;;  %v1846_v2 = vsel %vm632_vm6, %v1845_v12, %v1844_v61  ;;  %v4583_v55 = vcombine.high %v4567_v25, %v4567_v25 }
 0x819   :  { %v1624_v15 = vmul.f32 %v7100_v54, %v1607_v26  ;;  %v1286_v20 = vpop.permute.xlu0 %1285  ;;  %v1722_v40 = vsel %vm629_vm5, %v1721_v45, %v1720_v16  ;;  %v1725_v52 = vrot.slane %v1631_v27, 5  ;;  %v1848_v3 = vsel %vm635_vm7, %v1847_v31, %v1846_v2 }
 0x81a   :  { %v1288_v19 = vmul.f32 %v7103_v30, %v1286_v20  ;;  %v1724_v60 = vsel %vm632_vm6, %v1723_v17, %v1722_v40  ;;  %v4584_v43 = vcombine.high %v4574_v36, %v4574_v36 }
 0x81b   :  { %v1632_v54 = vmax.f32 %v1624_v15, 0.0  ;;  %v1849_v30 = vrot.slane %v1624_v15, 4  ;;  %v1726_v22 = vsel %vm635_vm7, %v1725_v52, %v1724_v60  ;;  %v4585_v52 = vcombine.high %v4581_v0, %v4581_v0 }
 0x81c   :  { %v1289_v41 = vmax.f32 %v1288_v19, 0.0  ;;  %1635 = vrot.lane.b32.xlu1 %v1288_v19, %s6637_s16 }
 0x81d   :  { %v1609_v29 = vpop.permute.xlu0 %1608  ;;  %v1727_v59 = vrot.slane %v1632_v54, 4  ;;  %v1850_v26 = vsel %vm638_vm8, %v1849_v30, %v1848_v3 }
 0x81e   :  { %v4595_v8 = vcombine.high %v1289_v41, %v1289_v41  ;;  %v4602_v35 = vrot.slane %v1289_v41, %v7170_v44  ;;  %v1625_v57 = vmul.f32 %v7108_v51, %v1609_v29 }
 0x81f   :  { %v1728_v16 = vsel %vm638_vm8, %v1727_v59, %v1726_v22 }
 0x820   :  { %v4609_v49 = vrot.slane %v4595_v8, %v7170_v44  ;;  %v4610_v14 = vcombine.high %v4602_v35, %v4602_v35  ;;  %v4618_v58 = vrot.slane %v4602_v35, %v7170_v44  ;;  %v1633_v56 = vmax.f32 %v1625_v57, 0.0 }
 0x821   :  { %v1851_v47 = vrot.slane %v1625_v57, 3 }
 0x822   :  { %v4611_v51 = vcombine.high %v4609_v49, %v4609_v49  ;;  %v4625_v45 = vrot.slane %v4609_v49, %v7170_v44  ;;  %v4632_v38 = vrot.slane %v4610_v14, %v7170_v44  ;;  %v4640_v7 = vcombine.high %v4618_v58, %v4618_v58 }
 0x823   :  { %v4947_v12 = vrot.slane %v4618_v58, %v7195_v62  ;;  %v1729_v15 = vrot.slane %v1633_v56, 3  ;;  %v1852_v23 = vsel %vm641_vm9, %v1851_v47, %v1850_v26 }
 0x824   :  { %v4639_v17 = vrot.slane %v4611_v51, %v7170_v44  ;;  %v4641_v11 = vcombine.high %v4625_v45, %v4625_v45  ;;  %v4642_v27 = vcombine.high %v4632_v38, %v4632_v38  ;;  %v4951_v20 = vrot.slane %v4632_v38, %v7195_v62  ;;  %1853 = vrot.lane.b32.xlu0 %v1852_v23, %s6634_s11 }
 0x825   :  { %v4955_v61 = vrot.slane %v4640_v7, %v7195_v62  ;;  %v4963_v19 = vrot.slane %v4625_v45, %v7195_v62  ;;  %v7212_v40 = vsel %vm5224_vm12, %v4560_v24, %v4947_v12  ;;  %v1730_v2 = vsel %vm641_vm9, %v1729_v15, %v1728_v16 }
 0x826   :  { %v4643_v54 = vcombine.high %v4639_v17, %v4639_v17  ;;  %v4959_v31 = vrot.slane %v4642_v27, %v7195_v62  ;;  %v4967_v41 = vrot.slane %v4639_v17, %v7195_v62  ;;  %v4971_v60 = vrot.slane %v4641_v11, %v7195_v62  ;;  %1731 = vrot.lane.b32.xlu1 %v1730_v2, %s6634_s11 }
 0x827   :  { %v7220_v30 = vsel %vm5224_vm12, %v4574_v36, %v4951_v20  ;;  %v7223_v29 = vsel %vm5224_vm12, %v4582_v33, %v4955_v61  ;;  %v7226_v24 = vsel %vm5224_vm12, %v4567_v25, %v4963_v19  ;;  %v7249_v33 = vld [vmem:[#allocation7 + $0x8] sm:$0xff] }
 0x828   :  { %v4975_v8 = vrot.slane %v4643_v54, %v7195_v62  ;;  %v7230_v35 = vsel %vm5224_vm12, %v4584_v43, %v4959_v31  ;;  %v7233_v57 = vsel %vm5224_vm12, %v4581_v0, %v4967_v41  ;;  %v7236_v3 = vsel %vm5224_vm12, %v4583_v55, %v4971_v60  ;;  %v7280_v61 = vld [vmem:[%s8347_s6] ss:$0 sm:$0xff] }
 0x82a   :  { %v7239_v36 = vsel %vm5224_vm12, %v4585_v52, %v4975_v8 }
 0x88e   :  { %v1636_v59 = vpop.permute.xlu1 %1635 }
 0x88f   :  { %5777 = vmatmul.mubr.msk.f32.vlgmr.msra.gmra.mxu1 %vm537_vm11, %v1636_v59 }
 0x890   :  { %5787 = vmatpush3.msra.mxu1 %v7035_v4  ;;  %5790 = vmatprep.mubr.msk.f32.mxu1 %vm6631_vm1, %v6630_v6  ;;  %v7259_v4 = vld [vmem:[%s8346_s5] sm:$0xf] }
 0x891   :  { %5788 = vmatprep.subr.mxu1 %v6630_v6 }
 0x892   :  { %5789 = vmatpush3.msra.mxu1 %v7041_v63  ;;  %v7266_v63 = vld [vmem:[#allocation7] sm:$0xff] }
 0x893   :  { %5798 = vmatprep.subr.mxu1 %v6630_v6 }
 0x896   :  { %v1854_v25 = vpop.permute.xlu0 %1853 }
 0x897   :  { %5791 = vmatmul.mubr.msk.f32.vlgmr.msra.gmra.mxu1 %vm239_vm10, %v1854_v25 }
 0x898   :  { %v1732_v0 = vpop.permute.xlu1 %1731  ;;  %5799 = vmatpush3.msra.mxu1 %v7249_v33  ;;  %5802 = vmatprep.mubr.msk.f32.mxu1 %vm6631_vm1, %v6630_v6 }
 0x899   :  { %5784 = vmatmul.mubr.msk.f32.vlgmr.msra.gmra.mxu0 %vm239_vm10, %v1732_v0  ;;  %5800 = vmatprep.subr.mxu1 %v6630_v6 }
 0x89a   :  { %5794 = vmatpush3.msk.msra.mxu0 %vm540_vm2, %v7259_v4  ;;  %5795 = vmatprep.mubr.msk.f32.mxu0 %vm6631_vm1, %v6630_v6 }
 0x89b   :  { %5805 = vmatprep.subr.mxu0 %v6630_v6  ;;  %5801 = vmatpush3.msra.mxu1 %v7266_v63 }
 0x89c   :  { %5812 = vmatprep.subr.mxu1 %v6630_v6 }
 0x94f   :  { %v1705_v55 = vpop.f32.mrf.mxu1 }
 0x951   :  { %v5778_v22 = vpop.f32.mrf.mxu1 }
 0x957   :  { %v1923_v49 = vpop.f32.mrf.mxu1 }
 0x958   :  { %v1929_v43 = vrot.slane %v1923_v49, 6  ;;  %v1931_v47 = vrot.slane %v1923_v49, 1  ;;  %v1928_v51 = vrot.slane %v1923_v49, 5  ;;  %v1946_v45 = vadd.f32 %v1923_v49, %v6731_v21 }
 0x959   :  { %v1801_v14 = vpop.f32.mrf.mxu0  ;;  %v5792_v58 = vpop.f32.mrf.mxu1  ;;  %v1932_v38 = vrot.slane %v1923_v49, 2  ;;  %v1930_v12 = vrot.slane %v1923_v49, 7  ;;  %v1933_v23 = vrot.slane %v1923_v49, 3  ;;  %v1934_v20 = vrot.slane %v1923_v49, 4 }
 0x95a   :  { %v1944_v26 = vadd.f32 %v1929_v43, %v6740_v34  ;;  %v1947_v7 = vadd.f32 %v1931_v47, %v6748_v42  ;;  %v1943_v15 = vadd.f32 %v1928_v51, %v6729_v18  ;;  %v1802_v27 = vadd.f32 %v1801_v14, %v1705_v55 }
 0x95b   :  { %v5785_v56 = vpop.f32.mrf.mxu0  ;;  %v1948_v16 = vadd.f32 %v1932_v38, %v6735_v28  ;;  %v1945_v17 = vadd.f32 %v1930_v12, %v6743_v37  ;;  %v1949_v11 = vadd.f32 %v1933_v23, %v6752_v46  ;;  %v1950_v31 = vadd.f32 %v1934_v20, %v6738_v32 }
 0x95c   :  { %6120 = vtanh.f32 %v1944_v26  ;;  %v1805_v19 = vadd.f32 %v7280_v61, %v1802_v27  ;;  %v5552_v55 = vmul.f32 -1.442695, %v1944_v26  ;;  %v5554_v22 = vmul.f32 -1.442695, %v1946_v45 }
 0x95d   :  { %6122 = vtanh.f32 %v1946_v45  ;;  %v5555_v49 = vmul.f32 -1.442695, %v1947_v7  ;;  %v5551_v14 = vmul.f32 -1.442695, %v1943_v15  ;;  %v5556_v58 = vmul.f32 -1.442695, %v1948_v16 }
 0x95e   :  { %6124 = vtanh.f32 %v1947_v7  ;;  %v5553_v56 = vmul.f32 -1.442695, %v1945_v17  ;;  %v5557_v43 = vmul.f32 -1.442695, %v1949_v11  ;;  %v5549_v47 = vmul.f32 -1.442695, %v1805_v19 }
 0x95f   :  { %6126 = vtanh.f32 %v1943_v15  ;;  %v5558_v12 = vmul.f32 -1.442695, %v1950_v31 }
 0x960   :  { %6128 = vtanh.f32 %v1948_v16 }
 0x961   :  { %6130 = vtanh.f32 %v1945_v17 }
 0x962   :  { %6132 = vtanh.f32 %v1949_v11 }
 0x963   :  { %6134 = vtanh.f32 %v1805_v19 }
 0x964   :  { %6136 = vtanh.f32 %v1950_v31 }
 0x965   :  { %6138 = vpow2.f32 %v5552_v55 }
 0x966   :  { %6140 = vpow2.f32 %v5554_v22 }
 0x967   :  { %6142 = vpow2.f32 %v5555_v49 }
 0x968   :  { %6144 = vpow2.f32 %v5551_v14 }
 0x969   :  { %v6121_v2 = vpop.eup %6120  ;;  %6146 = vpow2.f32 %v5556_v58 }
 0x96a   :  { %2049 = vrot.lane.b32.xlu1 %v6121_v2, %s6632_s3  ;;  %v6123_v54 = vpop.eup %6122  ;;  %6148 = vpow2.f32 %v5553_v56 }
 0x96b   :  { %2053 = vrot.lane.b32.xlu0 %v6123_v54, %s6632_s3  ;;  %v6125_v41 = vpop.eup %6124  ;;  %6150 = vpow2.f32 %v5557_v43 }
 0x96c   :  { %v6127_v60 = vpop.eup %6126  ;;  %6152 = vpow2.f32 %v5549_v47 }
 0x96d   :  { %v6129_v52 = vpop.eup %6128  ;;  %6154 = vpow2.f32 %v5558_v12 }
 0x96e   :  { %2055 = vrot.lane.b32.xlu1 %v6125_v41, %s6632_s3  ;;  %v6131_v8 = vpop.eup %6130 }
 0x96f   :  { %2047 = vrot.lane.b32.xlu0 %v6127_v60, %s6632_s3  ;;  %v6133_v59 = vpop.eup %6132 }
 0x970   :  { %v6135_v25 = vpop.eup %6134 }
 0x971   :  { %v6137_v0 = vpop.eup %6136 }
 0x972   :  { %2057 = vrot.lane.b32.xlu1 %v6129_v52, %s6632_s3  ;;  %v6139_v51 = vpop.eup %6138 }
 0x973   :  { %2051 = vrot.lane.b32.xlu0 %v6131_v8, %s6632_s3  ;;  %v6141_v38 = vpop.eup %6140  ;;  %v1976_v23 = vadd.f32 1.0, %v6139_v51 }
 0x974   :  { %v6143_v26 = vpop.eup %6142  ;;  %v1978_v45 = vadd.f32 1.0, %v6141_v38 }
 0x975   :  { %v6145_v27 = vpop.eup %6144  ;;  %v1979_v7 = vadd.f32 1.0, %v6143_v26  ;;  %6156 = vrcp.f32 %v1976_v23 }
 0x976   :  { %2059 = vrot.lane.b32.xlu1 %v6133_v59, %s6632_s3  ;;  %v6147_v15 = vpop.eup %6146  ;;  %v1975_v16 = vadd.f32 1.0, %v6145_v27  ;;  %6158 = vrcp.f32 %v1978_v45 }
 0x977   :  { %1815 = vrot.lane.b32.xlu0 %v6135_v25, %s6635_s14  ;;  %v6149_v17 = vpop.eup %6148  ;;  %v1980_v20 = vadd.f32 1.0, %v6147_v15  ;;  %6160 = vrcp.f32 %v1979_v7 }
 0x978   :  { %v6151_v11 = vpop.eup %6150  ;;  %v1977_v2 = vadd.f32 1.0, %v6149_v17  ;;  %6162 = vrcp.f32 %v1975_v16 }
 0x979   :  { %v1981_v19 = vadd.f32 1.0, %v6151_v11  ;;  %6164 = vrcp.f32 %v1980_v20  ;;  %v6153_v54 = vpop.eup %6152 }
 0x97a   :  { %6166 = vrcp.f32 %v1977_v2  ;;  %v6155_v31 = vpop.eup %6154  ;;  %v1809_v41 = vadd.f32 1.0, %v6153_v54  ;;  %v2018_v54 = vrot.slane %v7125_v50, 7  ;;  %v2020_v50 = vrot.slane %v7141_v53, 7 }
 0x97b   :  { %2061 = vrot.lane.b32.xlu0 %v6137_v0, %s6632_s3  ;;  %6168 = vrcp.f32 %v1981_v19  ;;  %v1982_v0 = vadd.f32 1.0, %v6155_v31  ;;  %v2016_v19 = vrot.slane %v7132_v9, 7 }
 0x97c   :  { %6170 = vrcp.f32 %v1809_v41 }
 0x97d   :  { %6172 = vrcp.f32 %v1982_v0 }
 0x982   :  { %v7293_v60 = vpop.eup %6156 }
 0x983   :  { %v7296_v59 = vpop.eup %6158  ;;  %v2032_v31 = vmul.f32 %v7293_v60, %v2016_v19 }
 0x984   :  { %v7300_v22 = vpop.eup %6160 }
 0x985   :  { %v7304_v58 = vpop.eup %6162 }
 0x986   :  { %v7308_v47 = vpop.eup %6164 }
 0x987   :  { %v7312_v12 = vpop.eup %6166 }
 0x988   :  { %v7316_v45 = vpop.eup %6168 }
 0x989   :  { %v7321_v15 = vpop.eup %6170 }
 0x98a   :  { %v7325_v20 = vpop.eup %6172 }
 0x9dc   :  { %v2050_v52 = vpop.permute.xlu1 %2049 }
 0x9dd   :  { %v2072_v8 = vmul.f32 %v7293_v60, %v2050_v52  ;;  %v2054_v25 = vpop.permute.xlu0 %2053  ;;  %v2019_v52 = vrot.slane %v7134_v48, 7 }
 0x9de   :  { %v2074_v55 = vmul.f32 %v7296_v59, %v2054_v25 }
 0x9df   :  { %2089 = vrot.lane.b32.xlu0 %v2072_v8, %s6633_s29  ;;  %v2034_v8 = vmul.f32 %v7296_v59, %v2018_v54  ;;  %v2035_v9 = vmul.f32 %v7300_v22, %v2019_v52  ;;  %v2022_v54 = vrot.slane %v7157_v10, 7 }
 0x9e0   :  { %v2056_v49 = vpop.permute.xlu1 %2055  ;;  %2093 = vrot.lane.b32.xlu1 %v2074_v55, %s6633_s29  ;;  %v2015_v55 = vrot.slane %v7114_v13, 7  ;;  %v2036_v13 = vmul.f32 %v7308_v47, %v2020_v50 }
 0x9e1   :  { %v2075_v14 = vmul.f32 %v7300_v22, %v2056_v49  ;;  %v2048_v56 = vpop.permute.xlu0 %2047  ;;  %v2038_v52 = vmul.f32 %v7325_v20, %v2022_v54 }
 0x9e2   :  { %v2071_v43 = vmul.f32 %v7304_v58, %v2048_v56  ;;  %v2031_v48 = vmul.f32 %v7304_v58, %v2015_v55 }
 0x9e3   :  { %2095 = vrot.lane.b32.xlu0 %v2075_v14, %s6633_s29 }
 0x9e4   :  { %v2058_v51 = vpop.permute.xlu1 %2057  ;;  %2087 = vrot.lane.b32.xlu1 %v2071_v43, %s6633_s29 }
 0x9e5   :  { %v2076_v38 = vmul.f32 %v7308_v47, %v2058_v51  ;;  %v2052_v23 = vpop.permute.xlu0 %2051  ;;  %v2017_v51 = vrot.slane %v7122_v39, 7 }
 0x9e6   :  { %v2073_v26 = vmul.f32 %v7312_v12, %v2052_v23 }
 0x9e7   :  { %2097 = vrot.lane.b32.xlu0 %v2076_v38, %s6633_s29  ;;  %v2033_v53 = vmul.f32 %v7312_v12, %v2017_v51 }
 0x9e8   :  { %v2060_v27 = vpop.permute.xlu1 %2059  ;;  %2091 = vrot.lane.b32.xlu1 %v2073_v26, %s6633_s29  ;;  %v2021_v26 = vrot.slane %v7145_v5, 7  ;;  %v1813_v5 = vmul.f32 %v7321_v15, %v7151_v1 }
 0x9e9   :  { %v2077_v7 = vmul.f32 %v7316_v45, %v2060_v27  ;;  %v1816_v16 = vpop.permute.xlu0 %1815 }
 0x9ea   :  { %v1818_v17 = vmul.f32 %v7321_v15, %v1816_v16  ;;  %v2037_v39 = vmul.f32 %v7316_v45, %v2021_v26 }
 0x9eb   :  { %2099 = vrot.lane.b32.xlu0 %v2077_v7, %s6633_s29 }
 0x9ec   :  { %1820 = vrot.lane.b32.xlu1 %v1818_v17, %s6636_s15 }
 0x9ed   :  { %v2062_v11 = vpop.permute.xlu0 %2061 }
 0x9ee   :  { %v2078_v2 = vmul.f32 %v7325_v20, %v2062_v11 }
 0x9f0   :  { %2101 = vrot.lane.b32.xlu1 %v2078_v2, %s6633_s29 }
 0xa51   :  { %v2090_v41 = vpop.permute.xlu0 %2089 }
 0xa52   :  { %v7334_v25 = vadd.f32 %v2090_v41, %v2032_v31  ;;  %v2094_v0 = vpop.permute.xlu1 %2093 }
 0xa53   :  { %v7337_v49 = vadd.f32 %v2094_v0, %v2034_v8 }
 0xa54   :  { %6174 = vtanh.f32 %v7334_v25 }
 0xa55   :  { %v2096_v14 = vpop.permute.xlu0 %2095  ;;  %6176 = vtanh.f32 %v7337_v49 }
 0xa56   :  { %v7344_v56 = vadd.f32 %v2096_v14, %v2035_v9  ;;  %v2088_v43 = vpop.permute.xlu1 %2087 }
 0xa57   :  { %v7347_v38 = vadd.f32 %v2088_v43, %v2031_v48 }
 0xa58   :  { %6178 = vtanh.f32 %v7344_v56 }
 0xa59   :  { %v2098_v23 = vpop.permute.xlu0 %2097  ;;  %6180 = vtanh.f32 %v7347_v38 }
 0xa5a   :  { %v7354_v27 = vadd.f32 %v2098_v23, %v2036_v13  ;;  %v2092_v7 = vpop.permute.xlu1 %2091 }
 0xa5b   :  { %v7356_v16 = vadd.f32 %v2092_v7, %v2033_v53 }
 0xa5c   :  { %6182 = vtanh.f32 %v7354_v27 }
 0xa5d   :  { %v2100_v17 = vpop.permute.xlu0 %2099  ;;  %6184 = vtanh.f32 %v7356_v16 }
 0xa5e   :  { %v7361_v11 = vadd.f32 %v2100_v17, %v2037_v39  ;;  %v1821_v19 = vpop.permute.xlu1 %1820 }
 0xa5f   :  { %v7367_v31 = vadd.f32 %v1821_v19, %v1813_v5 }
 0xa60   :  { %6186 = vtanh.f32 %v7361_v11 }
 0xa61   :  { %v6175_v2 = vpop.eup %6174  ;;  %6188 = vtanh.f32 %v7367_v31 }
 0xa62   :  { %2137 = vrot.lane.b32.xlu1 %v6175_v2, %s6633_s29  ;;  %v6177_v41 = vpop.eup %6176  ;;  %v2102_v0 = vpop.permute.xlu1 %2101 }
 0xa63   :  { %2141 = vrot.lane.b32.xlu0 %v6177_v41, %s6633_s29  ;;  %v7373_v1 = vadd.f32 %v2102_v0, %v2038_v52 }
 0xa65   :  { %v6179_v8 = vpop.eup %6178  ;;  %6190 = vtanh.f32 %v7373_v1 }
 0xa66   :  { %2143 = vrot.lane.b32.xlu1 %v6179_v8, %s6633_s29  ;;  %v6181_v55 = vpop.eup %6180 }
 0xa67   :  { %2135 = vrot.lane.b32.xlu0 %v6181_v55, %s6633_s29 }
 0xa69   :  { %v6183_v10 = vpop.eup %6182 }
 0xa6a   :  { %2145 = vrot.lane.b32.xlu1 %v6183_v10, %s6633_s29  ;;  %v6185_v9 = vpop.eup %6184 }
 0xa6b   :  { %2139 = vrot.lane.b32.xlu0 %v6185_v9, %s6633_s29 }
 0xa6d   :  { %v6187_v14 = vpop.eup %6186 }
 0xa6e   :  { %2147 = vrot.lane.b32.xlu1 %v6187_v14, %s6633_s29  ;;  %v6189_v50 = vpop.eup %6188 }
 0xa6f   :  { %1826 = vrot.lane.b32.xlu0 %v6189_v50, %s6636_s15 }
 0xa72   :  { %v6191_v48 = vpop.eup %6190 }
 0xa73   :  { %2149 = vrot.lane.b32.xlu0 %v6191_v48, %s6633_s29 }
 0xad4   :  { %v2138_v43 = vpop.permute.xlu1 %2137 }
 0xad5   :  { %v2142_v51 = vpop.permute.xlu0 %2141  ;;  %v2160_v23 = vmul.f32 %v7293_v60, %v2138_v43 }
 0xad6   :  { %v2162_v41 = vmul.f32 %v7296_v59, %v2142_v51 }
 0xad7   :  { %v2168_v5 = vmax.f32 %v2160_v23, 0.0  ;;  %v2381_v8 = vrot.slane %v2160_v23, 2 }
 0xad8   :  { %v2144_v13 = vpop.permute.xlu1 %2143  ;;  %v2170_v48 = vmax.f32 %v2162_v41, 0.0 }
 0xad9   :  { %v2136_v26 = vpop.permute.xlu0 %2135  ;;  %v2163_v17 = vmul.f32 %v7300_v22, %v2144_v13 }
 0xada   :  { %v2159_v53 = vmul.f32 %v7304_v58, %v2136_v26  ;;  %v2259_v58 = vrot.slane %v2168_v5, 2 }
 0xadb   :  { %v2171_v60 = vmax.f32 %v2163_v17, 0.0  ;;  %v2386_v51 = vrot.slane %v2163_v17, 7 }
 0xadc   :  { %v2146_v7 = vpop.permute.xlu1 %2145  ;;  %v2167_v39 = vmax.f32 %v2159_v53, 0.0  ;;  %v2380_v2 = vrot.slane %v2159_v53, 3 }
 0xadd   :  { %v2140_v19 = vpop.permute.xlu0 %2139  ;;  %v2164_v54 = vmul.f32 %v7308_v47, %v2146_v7  ;;  %v2264_v26 = vrot.slane %v2171_v60, 7 }
 0xade   :  { %v2161_v52 = vmul.f32 %v7312_v12, %v2140_v19  ;;  %v2258_v0 = vrot.slane %v2167_v39, 3  ;;  %v2382_v14 = vsel %vm623_vm3, %v2381_v8, %v2380_v2 }
 0xadf   :  { %v2172_v50 = vmax.f32 %v2164_v54, 0.0  ;;  %v2388_v7 = vrot.slane %v2164_v54, 6 }
 0xae0   :  { %v2148_v55 = vpop.permute.xlu1 %2147  ;;  %v2169_v10 = vmax.f32 %v2161_v52, 0.0  ;;  %v2383_v9 = vrot.slane %v2161_v52, 1  ;;  %v2260_v59 = vsel %vm623_vm3, %v2259_v58, %v2258_v0 }
 0xae1   :  { %v2165_v22 = vmul.f32 %v7316_v45, %v2148_v55  ;;  %v1827_v13 = vpop.permute.xlu0 %1826  ;;  %v2266_v45 = vrot.slane %v2172_v50, 6 }
 0xae2   :  { %v2261_v43 = vrot.slane %v2169_v10, 1  ;;  %v2384_v47 = vsel %vm626_vm4, %v2383_v9, %v2382_v14  ;;  %v1829_v39 = vmul.f32 %v7321_v15, %v1827_v13 }
 0xae3   :  { %v2385_v12 = vsel %vm629_vm5, %v2162_v41, %v2384_v47  ;;  %v2173_v23 = vmax.f32 %v2165_v22, 0.0  ;;  %v2390_v2 = vrot.slane %v2165_v22, 5 }
 0xae4   :  { %v2262_v53 = vsel %vm626_vm4, %v2261_v43, %v2260_v59  ;;  %v2387_v19 = vsel %vm632_vm6, %v2386_v51, %v2385_v12  ;;  %v1830_v52 = vmax.f32 %v1829_v39, 0.0  ;;  %2176 = vrot.lane.b32.xlu1 %v1829_v39, %s6637_s16 }
 0xae5   :  { %v2263_v5 = vsel %vm629_vm5, %v2170_v48, %v2262_v53  ;;  %v2268_v41 = vrot.slane %v2173_v23, 5  ;;  %v2150_v8 = vpop.permute.xlu0 %2149  ;;  %v2389_v15 = vsel %vm635_vm7, %v2388_v7, %v2387_v19 }
 0xae6   :  { %v2265_v17 = vsel %vm632_vm6, %v2264_v26, %v2263_v5  ;;  %v4645_v0 = vcombine.high %v1830_v52, %v1830_v52  ;;  %v4652_v55 = vrot.slane %v1830_v52, %v7170_v44  ;;  %v2166_v54 = vmul.f32 %v7325_v20, %v2150_v8 }
 0xae7   :  { %v2391_v60 = vsel %vm638_vm8, %v2390_v2, %v2389_v15  ;;  %v2267_v10 = vsel %vm635_vm7, %v2266_v45, %v2265_v17 }
 0xae8   :  { %v4659_v9 = vrot.slane %v4645_v0, %v7170_v44  ;;  %v4660_v58 = vcombine.high %v4652_v55, %v4652_v55  ;;  %v4668_v14 = vrot.slane %v4652_v55, %v7170_v44  ;;  %v2174_v50 = vmax.f32 %v2166_v54, 0.0 }
 0xae9   :  { %v2392_v22 = vrot.slane %v2166_v54, 4  ;;  %v2269_v48 = vsel %vm638_vm8, %v2268_v41, %v2267_v10 }
 0xaea   :  { %v4661_v43 = vcombine.high %v4659_v9, %v4659_v9  ;;  %v4675_v47 = vrot.slane %v4659_v9, %v7170_v44  ;;  %v4682_v20 = vrot.slane %v4660_v58, %v7170_v44  ;;  %v4690_v59 = vcombine.high %v4668_v14, %v4668_v14 }
 0xaeb   :  { %v4987_v51 = vrot.slane %v4668_v14, %v7195_v62  ;;  %v2270_v12 = vrot.slane %v2174_v50, 4  ;;  %v2393_v13 = vsel %vm641_vm9, %v2392_v22, %v2391_v60  ;;  %v7456_v60 = vld [vmem:[#allocation6 + $0x8] sm:$0xff] }
 0xaec   :  { %v4689_v23 = vrot.slane %v4661_v43, %v7170_v44  ;;  %v4691_v26 = vcombine.high %v4675_v47, %v4675_v47  ;;  %v4692_v53 = vcombine.high %v4682_v20, %v4682_v20  ;;  %v4991_v7 = vrot.slane %v4682_v20, %v7195_v62  ;;  %2394 = vrot.lane.b32.xlu0 %v2393_v13, %s6634_s11 }
 0xaed   :  { %v4995_v39 = vrot.slane %v4690_v59, %v7195_v62  ;;  %v5003_v5 = vrot.slane %v4675_v47, %v7195_v62  ;;  %v7419_v45 = vsel %vm5233_vm13, %v7212_v40, %v4987_v51  ;;  %v2271_v2 = vsel %vm641_vm9, %v2270_v12, %v2269_v48 }
 0xaee   :  { %v4693_v19 = vcombine.high %v4689_v23, %v4689_v23  ;;  %v4999_v52 = vrot.slane %v4692_v53, %v7195_v62  ;;  %v5007_v17 = vrot.slane %v4689_v23, %v7195_v62  ;;  %v5011_v41 = vrot.slane %v4691_v26, %v7195_v62  ;;  %2272 = vrot.lane.b32.xlu1 %v2271_v2, %s6634_s11 }
 0xaef   :  { %v7428_v8 = vsel %vm5233_vm13, %v7220_v30, %v4991_v7  ;;  %v7432_v0 = vsel %vm5233_vm13, %v7223_v29, %v4995_v39  ;;  %v7436_v40 = vsel %vm5233_vm13, %v7226_v24, %v5003_v5 }
 0xaf0   :  { %v5015_v55 = vrot.slane %v4693_v19, %v7195_v62  ;;  %v7441_v54 = vsel %vm5233_vm13, %v7230_v35, %v4999_v52  ;;  %v7445_v15 = vsel %vm5233_vm13, %v7233_v57, %v5007_v17  ;;  %v7449_v30 = vsel %vm5233_vm13, %v7236_v3, %v5011_v41  ;;  %v7462_v35 = vld [vmem:[#allocation6] sm:$0xff] }
 0xaf2   :  { %v7453_v29 = vsel %vm5233_vm13, %v7239_v36, %v5015_v55 }
 0xb56   :  { %v2177_v24 = vpop.permute.xlu1 %2176 }
 0xb57   :  { %5796 = vmatmul.mubr.msk.f32.vlgmr.msra.gmra.mxu0 %vm537_vm11, %v2177_v24 }
 0xb58   :  { %5806 = vmatpush3.msra.mxu0 %v7456_v60  ;;  %5809 = vmatprep.mubr.msk.f32.mxu0 %vm6631_vm1, %v6630_v6 }
 0xb59   :  { %5807 = vmatprep.subr.mxu0 %v6630_v6 }
 0xb5a   :  { %5808 = vmatpush3.msra.mxu0 %v7462_v35 }
 0xb5b   :  { %5817 = vmatprep.subr.mxu0 %v6630_v6 }
 0xb5e   :  { %v2395_v57 = vpop.permute.xlu0 %2394 }
 0xb5f   :  { %5810 = vmatmul.mubr.msk.f32.vlgmr.msra.gmra.mxu0 %vm239_vm10, %v2395_v57 }
 0xb60   :  { %v2273_v3 = vpop.permute.xlu1 %2272  ;;  %5818 = vmatpush3.msra.mxu0 %v7249_v33  ;;  %5821 = vmatprep.mubr.msk.f32.mxu0 %vm6631_vm1, %v6630_v6 }
 0xb61   :  { %5803 = vmatmul.mubr.msk.f32.vlgmr.msra.gmra.mxu1 %vm239_vm10, %v2273_v3  ;;  %5819 = vmatprep.subr.mxu0 %v6630_v6 }
 0xb62   :  { %5813 = vmatpush3.msk.msra.mxu1 %vm540_vm2, %v7259_v4  ;;  %5814 = vmatprep.mubr.msk.f32.mxu1 %vm6631_vm1, %v6630_v6 }
 0xb63   :  { %5824 = vmatprep.subr.mxu1 %v6630_v6  ;;  %5820 = vmatpush3.msra.mxu0 %v7266_v63 }
 0xb64   :  { %5831 = vmatprep.subr.mxu0 %v6630_v6 }
 0xc17   :  { %v2246_v36 = vpop.f32.mrf.mxu0 }
 0xc19   :  { %v5797_v33 = vpop.f32.mrf.mxu0 }
 0xc1f   :  { %v2464_v10 = vpop.f32.mrf.mxu0 }
 0xc20   :  { %v2470_v50 = vrot.slane %v2464_v10, 5  ;;  %v2472_v22 = vrot.slane %v2464_v10, 7  ;;  %v2469_v4 = vrot.slane %v2464_v10, 4  ;;  %v2488_v43 = vadd.f32 %v2464_v10, %v6748_v42 }
 0xc21   :  { %v2342_v9 = vpop.f32.mrf.mxu1  ;;  %v5811_v58 = vpop.f32.mrf.mxu0  ;;  %v2471_v20 = vrot.slane %v2464_v10, 6  ;;  %v2473_v59 = vrot.slane %v2464_v10, 1  ;;  %v2475_v13 = vrot.slane %v2464_v10, 3  ;;  %v2474_v26 = vrot.slane %v2464_v10, 2 }
 0xc22   :  { %v2485_v48 = vadd.f32 %v2470_v50, %v6740_v34  ;;  %v2487_v47 = vadd.f32 %v2472_v22, %v6731_v21  ;;  %v2484_v63 = vadd.f32 %v2469_v4, %v6729_v18  ;;  %v2343_v12 = vadd.f32 %v2342_v9, %v2246_v36 }
 0xc23   :  { %v5804_v14 = vpop.f32.mrf.mxu1  ;;  %v2486_v51 = vadd.f32 %v2471_v20, %v6743_v37  ;;  %v2489_v23 = vadd.f32 %v2473_v59, %v6735_v28  ;;  %v2491_v39 = vadd.f32 %v2475_v13, %v6738_v32  ;;  %v2490_v2 = vadd.f32 %v2474_v26, %v6752_v46 }
 0xc24   :  { %6192 = vtanh.f32 %v2485_v48  ;;  %v2346_v53 = vadd.f32 %v7280_v61, %v2343_v12  ;;  %v5565_v57 = vmul.f32 -1.442695, %v2485_v48  ;;  %v5568_v3 = vmul.f32 -1.442695, %v2488_v43 }
 0xc25   :  { %6194 = vtanh.f32 %v2488_v43  ;;  %v5567_v36 = vmul.f32 -1.442695, %v2487_v47  ;;  %v5564_v33 = vmul.f32 -1.442695, %v2484_v63  ;;  %v5566_v10 = vmul.f32 -1.442695, %v2486_v51 }
 0xc26   :  { %6196 = vtanh.f32 %v2487_v47  ;;  %v5569_v9 = vmul.f32 -1.442695, %v2489_v23  ;;  %v5562_v58 = vmul.f32 -1.442695, %v2346_v53  ;;  %v5570_v50 = vmul.f32 -1.442695, %v2490_v2 }
 0xc27   :  { %6198 = vtanh.f32 %v2484_v63  ;;  %v5571_v22 = vmul.f32 -1.442695, %v2491_v39 }
 0xc28   :  { %6200 = vtanh.f32 %v2486_v51 }
 0xc29   :  { %6202 = vtanh.f32 %v2489_v23 }
 0xc2a   :  { %6204 = vtanh.f32 %v2346_v53 }
 0xc2b   :  { %6206 = vtanh.f32 %v2491_v39 }
 0xc2c   :  { %6208 = vtanh.f32 %v2490_v2 }
 0xc2d   :  { %6210 = vpow2.f32 %v5565_v57 }
 0xc2e   :  { %6212 = vpow2.f32 %v5568_v3 }
 0xc2f   :  { %6214 = vpow2.f32 %v5567_v36 }
 0xc30   :  { %6216 = vpow2.f32 %v5564_v33 }
 0xc31   :  { %v6193_v7 = vpop.eup %6192  ;;  %6218 = vpow2.f32 %v5566_v10 }
 0xc32   :  { %2590 = vrot.lane.b32.xlu1 %v6193_v7, %s6632_s3  ;;  %v6195_v5 = vpop.eup %6194  ;;  %6220 = vpow2.f32 %v5569_v9 }
 0xc33   :  { %v6197_v19 = vpop.eup %6196  ;;  %2596 = vrot.lane.b32.xlu0 %v6195_v5, %s6632_s3  ;;  %6222 = vpow2.f32 %v5562_v58 }
 0xc34   :  { %v6199_v52 = vpop.eup %6198  ;;  %6224 = vpow2.f32 %v5570_v50 }
 0xc35   :  { %v6201_v61 = vpop.eup %6200  ;;  %6226 = vpow2.f32 %v5571_v22 }
 0xc36   :  { %2594 = vrot.lane.b32.xlu1 %v6197_v19, %s6632_s3  ;;  %v6203_v17 = vpop.eup %6202 }
 0xc37   :  { %2588 = vrot.lane.b32.xlu0 %v6199_v52, %s6632_s3  ;;  %v6205_v41 = vpop.eup %6204 }
 0xc38   :  { %v6207_v55 = vpop.eup %6206 }
 0xc39   :  { %v6209_v24 = vpop.eup %6208 }
 0xc3a   :  { %2356 = vrot.lane.b32.xlu1 %v6205_v41, %s6635_s14  ;;  %v6211_v14 = vpop.eup %6210 }
 0xc3b   :  { %2592 = vrot.lane.b32.xlu0 %v6201_v61, %s6632_s3  ;;  %v6213_v4 = vpop.eup %6212  ;;  %v2517_v20 = vadd.f32 1.0, %v6211_v14 }
 0xc3c   :  { %v6215_v59 = vpop.eup %6214  ;;  %v2520_v48 = vadd.f32 1.0, %v6213_v4 }
 0xc3d   :  { %v6217_v43 = vpop.eup %6216  ;;  %v2519_v47 = vadd.f32 1.0, %v6215_v59  ;;  %6228 = vrcp.f32 %v2517_v20 }
 0xc3e   :  { %2600 = vrot.lane.b32.xlu1 %v6209_v24, %s6632_s3  ;;  %v2516_v63 = vadd.f32 1.0, %v6217_v43  ;;  %6230 = vrcp.f32 %v2520_v48  ;;  %v6219_v51 = vpop.eup %6218 }
 0xc3f   :  { %2598 = vrot.lane.b32.xlu0 %v6203_v17, %s6632_s3  ;;  %6232 = vrcp.f32 %v2519_v47  ;;  %v2518_v12 = vadd.f32 1.0, %v6219_v51  ;;  %v6221_v13 = vpop.eup %6220 }
 0xc40   :  { %6234 = vrcp.f32 %v2516_v63  ;;  %v6223_v23 = vpop.eup %6222  ;;  %v2521_v53 = vadd.f32 1.0, %v6221_v13 }
 0xc41   :  { %v6225_v26 = vpop.eup %6224  ;;  %6236 = vrcp.f32 %v2518_v12  ;;  %v2350_v39 = vadd.f32 1.0, %v6223_v23  ;;  %v2557_v23 = vrot.slane %v7334_v25, 7 }
 0xc42   :  { %v6227_v7 = vpop.eup %6226  ;;  %6238 = vrcp.f32 %v2521_v53  ;;  %v2522_v17 = vadd.f32 1.0, %v6225_v26  ;;  %v2560_v53 = vrot.slane %v7344_v56, 7 }
 0xc43   :  { %2602 = vrot.lane.b32.xlu0 %v6207_v55, %s6632_s3  ;;  %v2523_v52 = vadd.f32 1.0, %v6227_v7  ;;  %6240 = vrcp.f32 %v2350_v39  ;;  %v2559_v39 = vrot.slane %v7337_v49, 7 }
 0xc45   :  { %6242 = vrcp.f32 %v2523_v52 }
 0xc46   :  { %6244 = vrcp.f32 %v2522_v17 }
 0xc4a   :  { %v7497_v5 = vpop.eup %6228 }
 0xc4b   :  { %v7500_v61 = vpop.eup %6230  ;;  %v2573_v26 = vmul.f32 %v7497_v5, %v2557_v23 }
 0xc4c   :  { %v7503_v55 = vpop.eup %6232 }
 0xc4d   :  { %v7508_v36 = vpop.eup %6234  ;;  %v2575_v17 = vmul.f32 %v7503_v55, %v2559_v39 }
 0xc4e   :  { %v7513_v9 = vpop.eup %6236 }
 0xc4f   :  { %v7517_v50 = vpop.eup %6238 }
 0xc50   :  { %v7519_v4 = vpop.eup %6240 }
 0xc52   :  { %v7524_v43 = vpop.eup %6242 }
 0xc53   :  { %v7527_v63 = vpop.eup %6244 }
 0xca4   :  { %v2591_v2 = vpop.permute.xlu1 %2590 }
 0xca5   :  { %v2613_v19 = vmul.f32 %v7497_v5, %v2591_v2  ;;  %v2597_v41 = vpop.permute.xlu0 %2596 }
 0xca6   :  { %v2616_v24 = vmul.f32 %v7500_v61, %v2597_v41  ;;  %v2556_v41 = vrot.slane %v7347_v38, 7 }
 0xca7   :  { %2630 = vrot.lane.b32.xlu0 %v2613_v19, %s6633_s29  ;;  %v2576_v19 = vmul.f32 %v7500_v61, %v2560_v53 }
 0xca8   :  { %v2595_v57 = vpop.permute.xlu1 %2594  ;;  %2636 = vrot.lane.b32.xlu1 %v2616_v24, %s6633_s29  ;;  %v2572_v49 = vmul.f32 %v7508_v36, %v2556_v41 }
 0xca9   :  { %v2615_v3 = vmul.f32 %v7503_v55, %v2595_v57  ;;  %v2589_v33 = vpop.permute.xlu0 %2588 }
 0xcaa   :  { %v2612_v10 = vmul.f32 %v7508_v36, %v2589_v33 }
 0xcab   :  { %2634 = vrot.lane.b32.xlu0 %v2615_v3, %s6633_s29  ;;  %v2558_v3 = vrot.slane %v7356_v16, 7 }
 0xcac   :  { %2628 = vrot.lane.b32.xlu1 %v2612_v10, %s6633_s29  ;;  %v2357_v20 = vpop.permute.xlu1 %2356 }
 0xcad   :  { %v2593_v58 = vpop.permute.xlu0 %2592  ;;  %v2359_v48 = vmul.f32 %v7519_v4, %v2357_v20  ;;  %v2574_v38 = vmul.f32 %v7513_v9, %v2558_v3  ;;  %v2354_v20 = vmul.f32 %v7519_v4, %v7367_v31 }
 0xcae   :  { %v2614_v14 = vmul.f32 %v7513_v9, %v2593_v58  ;;  %v2561_v58 = vrot.slane %v7354_v27, 7 }
 0xcaf   :  { %2361 = vrot.lane.b32.xlu0 %v2359_v48, %s6636_s15  ;;  %v2563_v48 = vrot.slane %v7373_v1, 7 }
 0xcb0   :  { %2632 = vrot.lane.b32.xlu1 %v2614_v14, %s6633_s29  ;;  %v2601_v51 = vpop.permute.xlu1 %2600 }
 0xcb1   :  { %v2599_v22 = vpop.permute.xlu0 %2598  ;;  %v2618_v13 = vmul.f32 %v7527_v63, %v2601_v51  ;;  %v2579_v27 = vmul.f32 %v7524_v43, %v2563_v48 }
 0xcb2   :  { %v2617_v59 = vmul.f32 %v7517_v50, %v2599_v22  ;;  %v2577_v22 = vmul.f32 %v7517_v50, %v2561_v58 }
 0xcb3   :  { %2640 = vrot.lane.b32.xlu0 %v2618_v13, %s6633_s29 }
 0xcb4   :  { %2638 = vrot.lane.b32.xlu1 %v2617_v59, %s6633_s29 }
 0xcb5   :  { %v2603_v47 = vpop.permute.xlu0 %2602 }
 0xcb6   :  { %v2619_v12 = vmul.f32 %v7524_v43, %v2603_v47 }
 0xcb8   :  { %2642 = vrot.lane.b32.xlu1 %v2619_v12, %s6633_s29  ;;  %v2562_v12 = vrot.slane %v7361_v11, 7 }
 0xcba   :  { %v2578_v31 = vmul.f32 %v7527_v63, %v2562_v12 }
 0xd19   :  { %v2631_v7 = vpop.permute.xlu0 %2630 }
 0xd1a   :  { %v7537_v2 = vadd.f32 %v2631_v7, %v2573_v26  ;;  %v2637_v52 = vpop.permute.xlu1 %2636 }
 0xd1b   :  { %v7543_v24 = vadd.f32 %v2637_v52, %v2576_v19 }
 0xd1c   :  { %6246 = vtanh.f32 %v7537_v2 }
 0xd1d   :  { %v2635_v25 = vpop.permute.xlu0 %2634  ;;  %6248 = vtanh.f32 %v7543_v24 }
 0xd1e   :  { %v7545_v57 = vadd.f32 %v2635_v25, %v2575_v17  ;;  %v2629_v56 = vpop.permute.xlu1 %2628 }
 0xd1f   :  { %v7551_v33 = vadd.f32 %v2629_v56, %v2572_v49 }
 0xd20   :  { %6250 = vtanh.f32 %v7545_v57 }
 0xd21   :  { %6252 = vtanh.f32 %v7551_v33  ;;  %v2362_v47 = vpop.permute.xlu0 %2361 }
 0xd22   :  { %v2633_v10 = vpop.permute.xlu1 %2632  ;;  %v7566_v13 = vadd.f32 %v2362_v47, %v2354_v20 }
 0xd23   :  { %v7556_v14 = vadd.f32 %v2633_v10, %v2574_v38 }
 0xd25   :  { %6254 = vtanh.f32 %v7556_v14  ;;  %v2641_v53 = vpop.permute.xlu0 %2640 }
 0xd26   :  { %v2639_v59 = vpop.permute.xlu1 %2638  ;;  %v7576_v11 = vadd.f32 %v2641_v53, %v2578_v31 }
 0xd27   :  { %v7563_v51 = vadd.f32 %v2639_v59, %v2577_v22 }
 0xd29   :  { %v6247_v16 = vpop.eup %6246  ;;  %6256 = vtanh.f32 %v7563_v51 }
 0xd2a   :  { %2678 = vrot.lane.b32.xlu1 %v6247_v16, %s6633_s29  ;;  %v6249_v23 = vpop.eup %6248  ;;  %6258 = vtanh.f32 %v7566_v13  ;;  %v2643_v26 = vpop.permute.xlu1 %2642 }
 0xd2b   :  { %v7573_v7 = vadd.f32 %v2643_v26, %v2579_v27  ;;  %2684 = vrot.lane.b32.xlu0 %v6249_v23, %s6633_s29 }
 0xd2d   :  { %v6251_v1 = vpop.eup %6250  ;;  %6260 = vtanh.f32 %v7573_v7 }
 0xd2e   :  { %2682 = vrot.lane.b32.xlu1 %v6251_v1, %s6633_s29  ;;  %v6253_v39 = vpop.eup %6252  ;;  %6262 = vtanh.f32 %v7576_v11 }
 0xd2f   :  { %2676 = vrot.lane.b32.xlu0 %v6253_v39, %s6633_s29 }
 0xd32   :  { %v6255_v19 = vpop.eup %6254 }
 0xd33   :  { %2680 = vrot.lane.b32.xlu0 %v6255_v19, %s6633_s29 }
 0xd36   :  { %v6257_v52 = vpop.eup %6256 }
 0xd37   :  { %v6259_v17 = vpop.eup %6258  ;;  %2686 = vrot.lane.b32.xlu0 %v6257_v52, %s6633_s29 }
 0xd38   :  { %2367 = vrot.lane.b32.xlu1 %v6259_v17, %s6636_s15 }
 0xd3a   :  { %v6261_v41 = vpop.eup %6260 }
 0xd3b   :  { %v6263_v25 = vpop.eup %6262  ;;  %2690 = vrot.lane.b32.xlu0 %v6261_v41, %s6633_s29 }
 0xd3c   :  { %2688 = vrot.lane.b32.xlu1 %v6263_v25, %s6633_s29 }
 0xd9c   :  { %v2679_v49 = vpop.permute.xlu1 %2678 }
 0xd9d   :  { %v2685_v56 = vpop.permute.xlu0 %2684  ;;  %v2701_v38 = vmul.f32 %v7497_v5, %v2679_v49 }
 0xd9e   :  { %v2704_v1 = vmul.f32 %v7500_v61, %v2685_v56 }
 0xd9f   :  { %v2709_v59 = vmax.f32 %v2701_v38, 0.0  ;;  %v2922_v12 = vrot.slane %v2701_v38, 3 }
 0xda0   :  { %v2683_v3 = vpop.permute.xlu1 %2682  ;;  %v2712_v38 = vmax.f32 %v2704_v1, 0.0 }
 0xda1   :  { %v2677_v10 = vpop.permute.xlu0 %2676  ;;  %v2703_v22 = vmul.f32 %v7503_v55, %v2683_v3  ;;  %v2800_v53 = vrot.slane %v2709_v59, 3 }
 0xda2   :  { %v2700_v58 = vmul.f32 %v7508_v36, %v2677_v10 }
 0xda3   :  { %v2711_v23 = vmax.f32 %v2703_v22, 0.0  ;;  %v2926_v39 = vrot.slane %v2703_v22, 1 }
 0xda4   :  { %v2708_v20 = vmax.f32 %v2700_v58, 0.0  ;;  %v2921_v16 = vrot.slane %v2700_v58, 4 }
 0xda5   :  { %v2681_v48 = vpop.permute.xlu0 %2680  ;;  %v2804_v41 = vrot.slane %v2711_v23, 1 }
 0xda6   :  { %v2702_v47 = vmul.f32 %v7513_v9, %v2681_v48  ;;  %v2799_v27 = vrot.slane %v2708_v20, 4  ;;  %v2923_v5 = vsel %vm623_vm3, %v2922_v12, %v2921_v16 }
 0xda8   :  { %v2710_v31 = vmax.f32 %v2702_v47, 0.0  ;;  %v2924_v26 = vrot.slane %v2702_v47, 2  ;;  %v2801_v9 = vsel %vm623_vm3, %v2800_v53, %v2799_v27 }
 0xda9   :  { %v2687_v36 = vpop.permute.xlu0 %2686 }
 0xdaa   :  { %v2802_v19 = vrot.slane %v2710_v31, 2  ;;  %v2925_v55 = vsel %vm626_vm4, %v2924_v26, %v2923_v5  ;;  %v2368_v52 = vpop.permute.xlu1 %2367  ;;  %v2705_v17 = vmul.f32 %v7517_v50, %v2687_v36 }
 0xdab   :  { %v2927_v25 = vsel %vm629_vm5, %v2926_v39, %v2925_v55  ;;  %v2370_v49 = vmul.f32 %v7519_v4, %v2368_v52 }
 0xdac   :  { %v2803_v61 = vsel %vm626_vm4, %v2802_v19, %v2801_v9  ;;  %v2713_v56 = vmax.f32 %v2705_v17, 0.0  ;;  %v2929_v3 = vrot.slane %v2705_v17, 7  ;;  %v2928_v50 = vsel %vm632_vm6, %v2704_v1, %v2927_v25 }
 0xdad   :  { %v2805_v10 = vsel %vm629_vm5, %v2804_v41, %v2803_v61  ;;  %v2371_v58 = vmax.f32 %v2370_v49, 0.0  ;;  %2717 = vrot.lane.b32.xlu1 %v2370_v49, %s6637_s16  ;;  %v2691_v22 = vpop.permute.xlu0 %2690 }
 0xdae   :  { %v2807_v20 = vrot.slane %v2713_v56, 7  ;;  %v2689_v59 = vpop.permute.xlu1 %2688  ;;  %v2707_v16 = vmul.f32 %v7524_v43, %v2691_v22  ;;  %v2806_v12 = vsel %vm632_vm6, %v2712_v38, %v2805_v10  ;;  %v2930_v23 = vsel %vm635_vm7, %v2929_v3, %v2928_v50 }
 0xdaf   :  { %v4695_v48 = vcombine.high %v2371_v58, %v2371_v58  ;;  %v4702_v4 = vrot.slane %v2371_v58, %v7170_v44  ;;  %v2706_v47 = vmul.f32 %v7527_v63, %v2689_v59 }
 0xdb0   :  { %v2715_v27 = vmax.f32 %v2707_v16, 0.0  ;;  %v2933_v39 = vrot.slane %v2707_v16, 5  ;;  %v2808_v43 = vsel %vm635_vm7, %v2807_v20, %v2806_v12 }
 0xdb1   :  { %v4709_v31 = vrot.slane %v4695_v48, %v7170_v44  ;;  %v4710_v26 = vcombine.high %v4702_v4, %v4702_v4  ;;  %v4718_v53 = vrot.slane %v4702_v4, %v7170_v44  ;;  %v2714_v1 = vmax.f32 %v2706_v47, 0.0 }
 0xdb2   :  { %v2931_v5 = vrot.slane %v2706_v47, 6  ;;  %v2811_v9 = vrot.slane %v2715_v27, 5 }
 0xdb3   :  { %v4711_v36 = vcombine.high %v4709_v31, %v4709_v31  ;;  %v4725_v19 = vrot.slane %v4709_v31, %v7170_v44  ;;  %v4732_v63 = vrot.slane %v4710_v26, %v7170_v44  ;;  %v4740_v55 = vcombine.high %v4718_v53, %v4718_v53 }
 0xdb4   :  { %v5027_v52 = vrot.slane %v4718_v53, %v7195_v62  ;;  %v2809_v17 = vrot.slane %v2714_v1, 6  ;;  %v2932_v41 = vsel %vm638_vm8, %v2931_v5, %v2930_v23 }
 0xdb5   :  { %v4739_v25 = vrot.slane %v4711_v36, %v7170_v44  ;;  %v4741_v49 = vcombine.high %v4725_v19, %v4725_v19  ;;  %v4742_v61 = vcombine.high %v4732_v63, %v4732_v63  ;;  %v5031_v56 = vrot.slane %v4732_v63, %v7195_v62 }
 0xdb6   :  { %v5035_v3 = vrot.slane %v4740_v55, %v7195_v62  ;;  %v5043_v38 = vrot.slane %v4725_v19, %v7195_v62  ;;  %v2934_v10 = vsel %vm641_vm9, %v2933_v39, %v2932_v41  ;;  %v2810_v58 = vsel %vm638_vm8, %v2809_v17, %v2808_v43 }
 0xdb7   :  { %v4743_v22 = vcombine.high %v4739_v25, %v4739_v25  ;;  %v5039_v50 = vrot.slane %v4742_v61, %v7195_v62  ;;  %v5047_v20 = vrot.slane %v4739_v25, %v7195_v62  ;;  %v5051_v59 = vrot.slane %v4741_v49, %v7195_v62  ;;  %2935 = vrot.lane.b32.xlu0 %v2934_v10, %s6634_s11  ;;  %v7699_v10 = vld [vmem:[%s8347_s6] ss:$0 sm:$0xff] }
 0xdb8   :  { %v2812_v16 = vsel %vm641_vm9, %v2811_v9, %v2810_v58  ;;  %v7627_v48 = vsel %vm5242_vm14, %v7419_v45, %v5027_v52  ;;  %v7631_v4 = vsel %vm5242_vm14, %v7428_v8, %v5031_v56  ;;  %v7635_v47 = vsel %vm5242_vm14, %v7432_v0, %v5035_v3 }
 0xdb9   :  { %v5055_v12 = vrot.slane %v4743_v22, %v7195_v62  ;;  %2813 = vrot.lane.b32.xlu1 %v2812_v16, %s6634_s11  ;;  %v7641_v27 = vsel %vm5242_vm14, %v7441_v54, %v5039_v50  ;;  %v7645_v45 = vsel %vm5242_vm14, %v7436_v40, %v5043_v38  ;;  %v7649_v8 = vsel %vm5242_vm14, %v7445_v15, %v5047_v20  ;;  %v7667_v15 = vld [vmem:[#allocation7 + $0x8] sm:$0xff] }
 0xdba   :  { %v7653_v0 = vsel %vm5242_vm14, %v7449_v30, %v5051_v59  ;;  %v7677_v30 = vld [vmem:[%s8346_s5] sm:$0xf] }
 0xdbb   :  { %v7657_v23 = vsel %vm5242_vm14, %v7453_v29, %v5055_v12  ;;  %v7684_v29 = vld [vmem:[#allocation7] sm:$0xff] }
 0xe1f   :  { %v2718_v31 = vpop.permute.xlu1 %2717 }
 0xe20   :  { %5815 = vmatmul.mubr.msk.f32.vlgmr.msra.gmra.mxu1 %vm537_vm11, %v2718_v31 }
 0xe21   :  { %5825 = vmatpush3.msra.mxu1 %v7456_v60  ;;  %5828 = vmatprep.mubr.msk.f32.mxu1 %vm6631_vm1, %v6630_v6 }
 0xe22   :  { %5826 = vmatprep.subr.mxu1 %v6630_v6 }
 0xe23   :  { %5827 = vmatpush3.msra.mxu1 %v7462_v35 }
 0xe24   :  { %5836 = vmatprep.subr.mxu1 %v6630_v6 }
 0xe29   :  { %v2936_v40 = vpop.permute.xlu0 %2935 }
 0xe2a   :  { %5829 = vmatmul.mubr.msk.f32.vlgmr.msra.gmra.mxu1 %vm239_vm10, %v2936_v40 }
 0xe2b   :  { %v2814_v54 = vpop.permute.xlu1 %2813  ;;  %5837 = vmatpush3.msra.mxu1 %v7667_v15  ;;  %5840 = vmatprep.mubr.msk.f32.mxu1 %vm6631_vm1, %v6630_v6 }
 0xe2c   :  { %5822 = vmatmul.mubr.msk.f32.vlgmr.msra.gmra.mxu0 %vm239_vm10, %v2814_v54  ;;  %5838 = vmatprep.subr.mxu1 %v6630_v6 }
 0xe2d   :  { %5832 = vmatpush3.msk.msra.mxu0 %vm540_vm2, %v7677_v30  ;;  %5833 = vmatprep.mubr.msk.f32.mxu0 %vm6631_vm1, %v6630_v6 }
 0xe2e   :  { %5843 = vmatprep.subr.mxu0 %v6630_v6  ;;  %5839 = vmatpush3.msra.mxu1 %v7684_v29 }
 0xe2f   :  { %5850 = vmatprep.subr.mxu1 %v6630_v6 }
 0xee0   :  { %v2787_v60 = vpop.f32.mrf.mxu1 }
 0xee2   :  { %v5816_v35 = vpop.f32.mrf.mxu1 }
 0xeea   :  { %v3005_v26 = vpop.f32.mrf.mxu1 }
 0xeeb   :  { %v3010_v53 = vrot.slane %v3005_v26, 3  ;;  %v3011_v36 = vrot.slane %v3005_v26, 4  ;;  %v3012_v19 = vrot.slane %v3005_v26, 5  ;;  %v3013_v63 = vrot.slane %v3005_v26, 6 }
 0xeec   :  { %v2883_v1 = vpop.f32.mrf.mxu0  ;;  %v5830_v5 = vpop.f32.mrf.mxu1  ;;  %v3014_v52 = vrot.slane %v3005_v26, 7  ;;  %v3015_v41 = vrot.slane %v3005_v26, 1  ;;  %v3016_v61 = vrot.slane %v3005_v26, 2  ;;  %v3030_v20 = vadd.f32 %v3005_v26, %v6735_v28 }
 0xeed   :  { %v3025_v39 = vadd.f32 %v3010_v53, %v6729_v18  ;;  %v3026_v55 = vadd.f32 %v3011_v36, %v6740_v34  ;;  %v3027_v17 = vadd.f32 %v3012_v19, %v6743_v37  ;;  %v3028_v9 = vadd.f32 %v3013_v63, %v6731_v21 }
 0xeee   :  { %v5823_v43 = vpop.f32.mrf.mxu0  ;;  %v3029_v25 = vadd.f32 %v3014_v52, %v6748_v42  ;;  %v3031_v56 = vadd.f32 %v3015_v41, %v6752_v46  ;;  %v2884_v3 = vadd.f32 %v2883_v1, %v2787_v60  ;;  %v3032_v38 = vadd.f32 %v3016_v61, %v6738_v32 }
 0xeef   :  { %6264 = vtanh.f32 %v3025_v39  ;;  %v5577_v60 = vmul.f32 -1.442695, %v3025_v39  ;;  %v5578_v35 = vmul.f32 -1.442695, %v3026_v55  ;;  %v5579_v26 = vmul.f32 -1.442695, %v3027_v17 }
 0xef0   :  { %6266 = vtanh.f32 %v3026_v55  ;;  %v2887_v58 = vadd.f32 %v7699_v10, %v2884_v3  ;;  %v5580_v53 = vmul.f32 -1.442695, %v3028_v9  ;;  %v5581_v1 = vmul.f32 -1.442695, %v3029_v25 }
 0xef1   :  { %6268 = vtanh.f32 %v3027_v17  ;;  %v5583_v43 = vmul.f32 -1.442695, %v3031_v56  ;;  %v5584_v19 = vmul.f32 -1.442695, %v3032_v38  ;;  %v5582_v39 = vmul.f32 -1.442695, %v3030_v20 }
 0xef2   :  { %6270 = vtanh.f32 %v3028_v9  ;;  %v5575_v63 = vmul.f32 -1.442695, %v2887_v58 }
 0xef3   :  { %6272 = vtanh.f32 %v3029_v25 }
 0xef4   :  { %6274 = vtanh.f32 %v3031_v56 }
 0xef5   :  { %6276 = vtanh.f32 %v3032_v38 }
 0xef6   :  { %6278 = vtanh.f32 %v2887_v58 }
 0xef7   :  { %6280 = vtanh.f32 %v3030_v20 }
 0xef8   :  { %6282 = vpow2.f32 %v5577_v60 }
 0xef9   :  { %6284 = vpow2.f32 %v5578_v35 }
 0xefa   :  { %6286 = vpow2.f32 %v5579_v26 }
 0xefb   :  { %6288 = vpow2.f32 %v5580_v53 }
 0xefc   :  { %v6265_v49 = vpop.eup %6264  ;;  %6290 = vpow2.f32 %v5581_v1 }
 0xefd   :  { %3129 = vrot.lane.b32.xlu0 %v6265_v49, %s6632_s3  ;;  %v6267_v22 = vpop.eup %6266  ;;  %6292 = vpow2.f32 %v5583_v43 }
 0xefe   :  { %v6269_v50 = vpop.eup %6268  ;;  %3131 = vrot.lane.b32.xlu1 %v6267_v22, %s6632_s3 }
 0xeff   :  { %v6271_v59 = vpop.eup %6270 }
 0xf00   :  { %v6273_v16 = vpop.eup %6272 }
 0xf01   :  { %3133 = vrot.lane.b32.xlu0 %v6269_v50, %s6632_s3  ;;  %v6275_v12 = vpop.eup %6274 }
 0xf02   :  { %3135 = vrot.lane.b32.xlu1 %v6271_v59, %s6632_s3  ;;  %v6277_v31 = vpop.eup %6276 }
 0xf03   :  { %v6279_v40 = vpop.eup %6278 }
 0xf04   :  { %v6281_v54 = vpop.eup %6280 }
 0xf05   :  { %3137 = vrot.lane.b32.xlu0 %v6273_v16, %s6632_s3  ;;  %v6283_v5 = vpop.eup %6282 }
 0xf06   :  { %2897 = vrot.lane.b32.xlu1 %v6279_v40, %s6635_s14  ;;  %v3057_v36 = vadd.f32 1.0, %v6283_v5  ;;  %v6285_v52 = vpop.eup %6284 }
 0xf07   :  { %v6287_v41 = vpop.eup %6286  ;;  %v3058_v49 = vadd.f32 1.0, %v6285_v52 }
 0xf08   :  { %6294 = vrcp.f32 %v3057_v36  ;;  %v6289_v55 = vpop.eup %6288  ;;  %v3059_v17 = vadd.f32 1.0, %v6287_v41 }
 0xf09   :  { %3141 = vrot.lane.b32.xlu0 %v6275_v12, %s6632_s3  ;;  %6296 = vpow2.f32 %v5584_v19  ;;  %v6291_v9 = vpop.eup %6290  ;;  %v3060_v25 = vadd.f32 1.0, %v6289_v55 }
 0xf0a   :  { %3139 = vrot.lane.b32.xlu1 %v6281_v54, %s6632_s3  ;;  %6298 = vpow2.f32 %v5575_v63  ;;  %v3061_v61 = vadd.f32 1.0, %v6291_v9  ;;  %v6293_v56 = vpop.eup %6292 }
 0xf0b   :  { %6300 = vpow2.f32 %v5582_v39  ;;  %v3063_v58 = vadd.f32 1.0, %v6293_v56 }
 0xf0c   :  { %6302 = vrcp.f32 %v3058_v49 }
 0xf0d   :  { %3143 = vrot.lane.b32.xlu0 %v6277_v31, %s6632_s3  ;;  %6304 = vrcp.f32 %v3059_v17 }
 0xf0e   :  { %6306 = vrcp.f32 %v3060_v25 }
 0xf0f   :  { %6308 = vrcp.f32 %v3061_v61 }
 0xf10   :  { %6310 = vrcp.f32 %v3063_v58 }
 0xf15   :  { %v7711_v3 = vpop.eup %6294 }
 0xf16   :  { %v6297_v50 = vpop.eup %6296 }
 0xf17   :  { %v6299_v20 = vpop.eup %6298  ;;  %v3064_v59 = vadd.f32 1.0, %v6297_v50 }
 0xf18   :  { %v6301_v16 = vpop.eup %6300  ;;  %v2891_v12 = vadd.f32 1.0, %v6299_v20 }
 0xf19   :  { %v7715_v31 = vpop.eup %6302  ;;  %6312 = vrcp.f32 %v3064_v59  ;;  %v3062_v53 = vadd.f32 1.0, %v6301_v16  ;;  %v3098_v16 = vrot.slane %v7537_v2, 7 }
 0xf1a   :  { %v7717_v54 = vpop.eup %6304  ;;  %6314 = vrcp.f32 %v2891_v12  ;;  %v3099_v12 = vrot.slane %v7556_v14, 7 }
 0xf1b   :  { %v7722_v1 = vpop.eup %6306  ;;  %6316 = vrcp.f32 %v3062_v53 }
 0xf1c   :  { %v7725_v43 = vpop.eup %6308 }
 0xf1d   :  { %v7731_v52 = vpop.eup %6310 }
 0xf26   :  { %v7735_v49 = vpop.eup %6312 }
 0xf27   :  { %v7738_v9 = vpop.eup %6314 }
 0xf28   :  { %v7743_v56 = vpop.eup %6316 }
 0xf6f   :  { %v3130_v38 = vpop.permute.xlu0 %3129 }
 0xf70   :  { %v3153_v22 = vmul.f32 %v7711_v3, %v3130_v38  ;;  %v3132_v40 = vpop.permute.xlu1 %3131 }
 0xf71   :  { %v3154_v60 = vmul.f32 %v7715_v31, %v3132_v40  ;;  %v3114_v40 = vmul.f32 %v7715_v31, %v3098_v16 }
 0xf72   :  { %3169 = vrot.lane.b32.xlu1 %v3153_v22, %s6633_s29  ;;  %v3097_v22 = vrot.slane %v7551_v33, 7 }
 0xf73   :  { %v3134_v35 = vpop.permute.xlu0 %3133  ;;  %3171 = vrot.lane.b32.xlu0 %v3154_v60, %s6633_s29 }
 0xf74   :  { %v3155_v26 = vmul.f32 %v7717_v54, %v3134_v35  ;;  %v3136_v5 = vpop.permute.xlu1 %3135  ;;  %v3113_v50 = vmul.f32 %v7711_v3, %v3097_v22  ;;  %v3115_v35 = vmul.f32 %v7717_v54, %v3099_v12  ;;  %v2895_v22 = vmul.f32 %v7738_v9, %v7566_v13 }
 0xf75   :  { %v3156_v36 = vmul.f32 %v7722_v1, %v3136_v5  ;;  %v3101_v5 = vrot.slane %v7543_v24, 7  ;;  %v3102_v12 = vrot.slane %v7563_v51, 7 }
 0xf76   :  { %3173 = vrot.lane.b32.xlu1 %v3155_v26, %s6633_s29  ;;  %v3100_v26 = vrot.slane %v7545_v57, 7  ;;  %v3103_v57 = vrot.slane %v7576_v11, 7 }
 0xf77   :  { %v3138_v19 = vpop.permute.xlu0 %3137  ;;  %3175 = vrot.lane.b32.xlu0 %v3156_v36, %s6633_s29  ;;  %v3117_v14 = vmul.f32 %v7725_v43, %v3101_v5 }
 0xf78   :  { %v3157_v63 = vmul.f32 %v7725_v43, %v3138_v19  ;;  %v2898_v25 = vpop.permute.xlu1 %2897  ;;  %v3116_v2 = vmul.f32 %v7722_v1, %v3100_v26  ;;  %v3119_v24 = vmul.f32 %v7731_v52, %v3103_v57 }
 0xf79   :  { %v2900_v61 = vmul.f32 %v7738_v9, %v2898_v25  ;;  %v3104_v25 = vrot.slane %v7573_v7, 7 }
 0xf7a   :  { %3177 = vrot.lane.b32.xlu1 %v3157_v63, %s6633_s29 }
 0xf7b   :  { %v3142_v41 = vpop.permute.xlu0 %3141  ;;  %2902 = vrot.lane.b32.xlu0 %v2900_v61, %s6636_s15  ;;  %v3120_v11 = vmul.f32 %v7735_v49, %v3104_v25 }
 0xf7c   :  { %v3159_v39 = vmul.f32 %v7731_v52, %v3142_v41  ;;  %v3140_v38 = vpop.permute.xlu1 %3139 }
 0xf7d   :  { %v3158_v58 = vmul.f32 %v7743_v56, %v3140_v38 }
 0xf7e   :  { %3181 = vrot.lane.b32.xlu1 %v3159_v39, %s6633_s29 }
 0xf7f   :  { %v3144_v55 = vpop.permute.xlu0 %3143  ;;  %3179 = vrot.lane.b32.xlu0 %v3158_v58, %s6633_s29 }
 0xf80   :  { %v3160_v17 = vmul.f32 %v7735_v49, %v3144_v55 }
 0xf82   :  { %3183 = vrot.lane.b32.xlu1 %v3160_v17, %s6633_s29 }
 0xfe4   :  { %v3170_v20 = vpop.permute.xlu1 %3169 }
 0xfe5   :  { %v7749_v59 = vadd.f32 %v3170_v20, %v3113_v50  ;;  %v3172_v60 = vpop.permute.xlu0 %3171 }
 0xfe6   :  { %v7757_v53 = vadd.f32 %v3172_v60, %v3114_v40  ;;  %v3118_v40 = vmul.f32 %v7743_v56, %v3102_v12 }
 0xfe7   :  { %6318 = vtanh.f32 %v7749_v59 }
 0xfe8   :  { %v3174_v33 = vpop.permute.xlu1 %3173  ;;  %6320 = vtanh.f32 %v7757_v53 }
 0xfe9   :  { %v7760_v36 = vadd.f32 %v3174_v33, %v3115_v35  ;;  %v3176_v19 = vpop.permute.xlu0 %3175 }
 0xfea   :  { %v7766_v63 = vadd.f32 %v3176_v19, %v3116_v2 }
 0xfeb   :  { %6322 = vtanh.f32 %v7760_v36 }
 0xfec   :  { %v3178_v41 = vpop.permute.xlu1 %3177  ;;  %6324 = vtanh.f32 %v7766_v63 }
 0xfed   :  { %v7769_v39 = vadd.f32 %v3178_v41, %v3117_v14  ;;  %v2903_v20 = vpop.permute.xlu0 %2902 }
 0xfee   :  { %v7786_v7 = vadd.f32 %v2903_v20, %v2895_v22 }
 0xfef   :  { %6326 = vtanh.f32 %v7769_v39 }
 0xff0   :  { %v3182_v17 = vpop.permute.xlu1 %3181 }
 0xff1   :  { %v7776_v61 = vadd.f32 %v3182_v17, %v3119_v24  ;;  %v3180_v35 = vpop.permute.xlu0 %3179 }
 0xff2   :  { %v7792_v26 = vadd.f32 %v3180_v35, %v3118_v40 }
 0xff3   :  { %6328 = vtanh.f32 %v7776_v61 }
 0xff4   :  { %v6319_v55 = vpop.eup %6318  ;;  %v3184_v38 = vpop.permute.xlu1 %3183 }
 0xff5   :  { %3217 = vrot.lane.b32.xlu0 %v6319_v55, %s6633_s29  ;;  %v7780_v58 = vadd.f32 %v3184_v38, %v3120_v11  ;;  %v6321_v50 = vpop.eup %6320 }
 0xff6   :  { %3219 = vrot.lane.b32.xlu1 %v6321_v50, %s6633_s29 }
 0xff7   :  { %6330 = vtanh.f32 %v7780_v58 }
 0xff8   :  { %v6323_v16 = vpop.eup %6322  ;;  %6332 = vtanh.f32 %v7786_v7 }
 0xff9   :  { %3221 = vrot.lane.b32.xlu0 %v6323_v16, %s6633_s29  ;;  %v6325_v60 = vpop.eup %6324  ;;  %6334 = vtanh.f32 %v7792_v26 }
 0xffa   :  { %3223 = vrot.lane.b32.xlu1 %v6325_v60, %s6633_s29 }
 0xffc   :  { %v6327_v13 = vpop.eup %6326 }
 0xffd   :  { %3225 = vrot.lane.b32.xlu0 %v6327_v13, %s6633_s29 }
0x1000   :  { %v6329_v51 = vpop.eup %6328 }
0x1001   :  { %3229 = vrot.lane.b32.xlu0 %v6329_v51, %s6633_s29 }
0x1004   :  { %v6331_v33 = vpop.eup %6330 }
0x1005   :  { %3231 = vrot.lane.b32.xlu0 %v6331_v33, %s6633_s29  ;;  %v6333_v5 = vpop.eup %6332 }
0x1006   :  { %2908 = vrot.lane.b32.xlu1 %v6333_v5, %s6636_s15  ;;  %v6335_v2 = vpop.eup %6334 }
0x100a   :  { %3227 = vrot.lane.b32.xlu1 %v6335_v2, %s6633_s29 }
0x1067   :  { %v3218_v19 = vpop.permute.xlu0 %3217 }
0x1068   :  { %v3220_v14 = vpop.permute.xlu1 %3219  ;;  %v3241_v55 = vmul.f32 %v7711_v3, %v3218_v19 }
0x1069   :  { %v3242_v57 = vmul.f32 %v7715_v31, %v3220_v14 }
0x106a   :  { %v3249_v38 = vmax.f32 %v3241_v55, 0.0  ;;  %v3462_v40 = vrot.slane %v3241_v55, 5 }
0x106b   :  { %v3222_v41 = vpop.permute.xlu0 %3221  ;;  %v3250_v11 = vmax.f32 %v3242_v57, 0.0  ;;  %v3463_v12 = vrot.slane %v3242_v57, 4 }
0x106c   :  { %v3224_v17 = vpop.permute.xlu1 %3223  ;;  %v3243_v25 = vmul.f32 %v7717_v54, %v3222_v41  ;;  %v3340_v13 = vrot.slane %v3249_v38, 5 }
0x106d   :  { %v3244_v22 = vmul.f32 %v7722_v1, %v3224_v17  ;;  %v3341_v35 = vrot.slane %v3250_v11, 4  ;;  %v3464_v33 = vsel %vm623_vm3, %v3463_v12, %v3462_v40 }
0x106e   :  { %v3251_v20 = vmax.f32 %v3243_v25, 0.0  ;;  %v3465_v60 = vrot.slane %v3243_v25, 3 }
0x106f   :  { %v3226_v24 = vpop.permute.xlu0 %3225  ;;  %v3252_v31 = vmax.f32 %v3244_v22, 0.0  ;;  %v3467_v5 = vrot.slane %v3244_v22, 2 }
0x1070   :  { %v3245_v16 = vmul.f32 %v7725_v43, %v3226_v24  ;;  %v3343_v51 = vrot.slane %v3251_v20, 3  ;;  %v3466_v2 = vsel %vm626_vm4, %v3465_v60, %v3464_v33  ;;  %v3342_v43 = vsel %vm623_vm3, %v3341_v35, %v3340_v13 }
0x1071   :  { %v3345_v41 = vrot.slane %v3252_v31, 2  ;;  %v3468_v11 = vsel %vm629_vm5, %v3467_v5, %v3466_v2 }
0x1072   :  { %v3253_v3 = vmax.f32 %v3245_v16, 0.0  ;;  %v3469_v1 = vrot.slane %v3245_v16, 1  ;;  %v3344_v55 = vsel %vm626_vm4, %v3343_v51, %v3342_v43 }
0x1073   :  { %v3230_v50 = vpop.permute.xlu0 %3229  ;;  %v3346_v16 = vsel %vm629_vm5, %v3345_v41, %v3344_v55 }
0x1074   :  { %v3247_v14 = vmul.f32 %v7731_v52, %v3230_v50  ;;  %v3347_v24 = vrot.slane %v3253_v3, 1  ;;  %v3470_v38 = vsel %vm632_vm6, %v3469_v1, %v3468_v11 }
0x1076   :  { %v3255_v20 = vmax.f32 %v3247_v14, 0.0  ;;  %v3348_v12 = vsel %vm632_vm6, %v3347_v24, %v3346_v16  ;;  %v3472_v40 = vrot.slane %v3247_v14, 7 }
0x1077   :  { %v3232_v54 = vpop.permute.xlu0 %3231 }
0x1078   :  { %v2909_v19 = vpop.permute.xlu1 %2908  ;;  %v3248_v17 = vmul.f32 %v7735_v49, %v3232_v54  ;;  %v3350_v3 = vrot.slane %v3255_v20, 7 }
0x1079   :  { %v2911_v57 = vmul.f32 %v7738_v9, %v2909_v19 }
0x107a   :  { %v3256_v49 = vmax.f32 %v3248_v17, 0.0  ;;  %v3474_v33 = vrot.slane %v3248_v17, 6 }
0x107b   :  { %v2912_v25 = vmax.f32 %v2911_v57, 0.0  ;;  %3258 = vrot.lane.b32.xlu1 %v2911_v57, %s6637_s16 }
0x107c   :  { %v3228_v22 = vpop.permute.xlu1 %3227  ;;  %v3352_v14 = vrot.slane %v3256_v49, 6 }
0x107d   :  { %v4745_v52 = vcombine.high %v2912_v25, %v2912_v25  ;;  %v4752_v50 = vrot.slane %v2912_v25, %v7170_v44  ;;  %v3246_v9 = vmul.f32 %v7743_v56, %v3228_v22 }
0x107f   :  { %v4759_v60 = vrot.slane %v4745_v52, %v7170_v44  ;;  %v4760_v35 = vcombine.high %v4752_v50, %v4752_v50  ;;  %v4768_v13 = vrot.slane %v4752_v50, %v7170_v44  ;;  %v3254_v31 = vmax.f32 %v3246_v9, 0.0 }
0x1080   :  { %v3471_v51 = vsel %vm635_vm7, %v3246_v9, %v3470_v38 }
0x1081   :  { %v4761_v5 = vcombine.high %v4759_v60, %v4759_v60  ;;  %v4775_v54 = vrot.slane %v4759_v60, %v7170_v44  ;;  %v4782_v2 = vrot.slane %v4760_v35, %v7170_v44  ;;  %v4790_v56 = vcombine.high %v4768_v13, %v4768_v13 }
0x1082   :  { %v5067_v19 = vrot.slane %v4768_v13, %v7195_v62  ;;  %v3349_v1 = vsel %vm635_vm7, %v3254_v31, %v3348_v12  ;;  %v3473_v43 = vsel %vm638_vm8, %v3472_v40, %v3471_v51 }
0x1083   :  { %v4789_v41 = vrot.slane %v4761_v5, %v7170_v44  ;;  %v4791_v57 = vcombine.high %v4775_v54, %v4775_v54  ;;  %v4792_v55 = vcombine.high %v4782_v2, %v4782_v2  ;;  %v5071_v24 = vrot.slane %v4782_v2, %v7195_v62 }
0x1084   :  { %v5075_v17 = vrot.slane %v4790_v56, %v7195_v62  ;;  %v5083_v25 = vrot.slane %v4775_v54, %v7195_v62  ;;  %v3475_v11 = vsel %vm641_vm9, %v3474_v33, %v3473_v43  ;;  %v3351_v38 = vsel %vm638_vm8, %v3350_v3, %v3349_v1 }
0x1085   :  { %v4793_v22 = vcombine.high %v4789_v41, %v4789_v41  ;;  %v5079_v20 = vrot.slane %v4792_v55, %v7195_v62  ;;  %v5087_v52 = vrot.slane %v4789_v41, %v7195_v62  ;;  %v5091_v50 = vrot.slane %v4791_v57, %v7195_v62  ;;  %3476 = vrot.lane.b32.xlu0 %v3475_v11, %s6634_s11 }
0x1086   :  { %v3353_v16 = vsel %vm641_vm9, %v3352_v14, %v3351_v38  ;;  %v7841_v9 = vsel %vm540_vm2, %v7627_v48, %v5067_v19  ;;  %v7845_v12 = vsel %vm540_vm2, %v7631_v4, %v5071_v24  ;;  %v7849_v40 = vsel %vm540_vm2, %v7635_v47, %v5075_v17 }
0x1087   :  { %v5095_v49 = vrot.slane %v4793_v22, %v7195_v62  ;;  %3354 = vrot.lane.b32.xlu1 %v3353_v16, %s6634_s11  ;;  %v7855_v60 = vsel %vm540_vm2, %v7641_v27, %v5079_v20  ;;  %v7859_v48 = vsel %vm540_vm2, %v7645_v45, %v5083_v25  ;;  %v7863_v4 = vsel %vm540_vm2, %v7649_v8, %v5087_v52  ;;  %v7874_v27 = vld [vmem:[#allocation6 + $0x8] sm:$0xff]  ;;  %v7880_v45 = vld [vmem:[#allocation6] sm:$0xff] }
0x1088   :  { %v7867_v47 = vsel %vm540_vm2, %v7653_v0, %v5091_v50 }
0x1089   :  { %v7871_v35 = vsel %vm540_vm2, %v7657_v23, %v5095_v49 }
0x10ed   :  { %v3259_v13 = vpop.permute.xlu1 %3258 }
0x10ee   :  { %5834 = vmatmul.mubr.msk.f32.vlgmr.msra.gmra.mxu0 %vm537_vm11, %v3259_v13 }
0x10ef   :  { %5844 = vmatpush3.msra.mxu0 %v7874_v27  ;;  %5847 = vmatprep.mubr.msk.f32.mxu0 %vm6631_vm1, %v6630_v6 }
0x10f0   :  { %5845 = vmatprep.subr.mxu0 %v6630_v6 }
0x10f1   :  { %5846 = vmatpush3.msra.mxu0 %v7880_v45 }
0x10f2   :  { %5855 = vmatprep.subr.mxu0 %v6630_v6 }
0x10f7   :  { %v3477_v8 = vpop.permute.xlu0 %3476 }
0x10f8   :  { %5848 = vmatmul.mubr.msk.f32.vlgmr.msra.gmra.mxu0 %vm239_vm10, %v3477_v8 }
0x10f9   :  { %v3355_v0 = vpop.permute.xlu1 %3354  ;;  %5856 = vmatpush3.msra.mxu0 %v7667_v15  ;;  %5859 = vmatprep.mubr.msk.f32.mxu0 %vm6631_vm1, %v6630_v6 }
0x10fa   :  { %5841 = vmatmul.mubr.msk.f32.vlgmr.msra.gmra.mxu1 %vm239_vm10, %v3355_v0  ;;  %5857 = vmatprep.subr.mxu0 %v6630_v6 }
0x10fb   :  { %5851 = vmatpush3.msk.msra.mxu1 %vm540_vm2, %v7677_v30  ;;  %5852 = vmatprep.mubr.msk.f32.mxu1 %vm6631_vm1, %v6630_v6 }
0x10fc   :  { %5862 = vmatprep.subr.mxu1 %v6630_v6  ;;  %5858 = vmatpush3.msra.mxu0 %v7684_v29 }
0x10fd   :  { %5869 = vmatprep.subr.mxu0 %v6630_v6 }
0x11ae   :  { %v3328_v23 = vpop.f32.mrf.mxu0 }
0x11b0   :  { %v5835_v15 = vpop.f32.mrf.mxu0 }
0x11b8   :  { %v3546_v31 = vpop.f32.mrf.mxu0 }
0x11b9   :  { %v3551_v51 = vrot.slane %v3546_v31, 2  ;;  %v3552_v30 = vrot.slane %v3546_v31, 3  ;;  %v3553_v2 = vrot.slane %v3546_v31, 4  ;;  %v3554_v56 = vrot.slane %v3546_v31, 5 }
0x11ba   :  { %v3424_v3 = vpop.f32.mrf.mxu1  ;;  %v5849_v33 = vpop.f32.mrf.mxu0  ;;  %v3555_v1 = vrot.slane %v3546_v31, 6  ;;  %v3556_v14 = vrot.slane %v3546_v31, 7  ;;  %v3557_v55 = vrot.slane %v3546_v31, 1  ;;  %v3572_v20 = vadd.f32 %v3546_v31, %v6752_v46 }
0x11bb   :  { %v3566_v5 = vadd.f32 %v3551_v51, %v6729_v18  ;;  %v3567_v19 = vadd.f32 %v3552_v30, %v6740_v34  ;;  %v3568_v29 = vadd.f32 %v3553_v2, %v6743_v37  ;;  %v3569_v43 = vadd.f32 %v3554_v56, %v6731_v21 }
0x11bc   :  { %v5842_v54 = vpop.f32.mrf.mxu1  ;;  %v3570_v41 = vadd.f32 %v3555_v1, %v6748_v42  ;;  %v3571_v24 = vadd.f32 %v3556_v14, %v6735_v28  ;;  %v3573_v17 = vadd.f32 %v3557_v55, %v6738_v32  ;;  %v3425_v25 = vadd.f32 %v3424_v3, %v3328_v23 }
0x11bd   :  { %6336 = vtanh.f32 %v3566_v5  ;;  %v5590_v8 = vmul.f32 -1.442695, %v3566_v5  ;;  %v5591_v0 = vmul.f32 -1.442695, %v3567_v19  ;;  %v5592_v23 = vmul.f32 -1.442695, %v3568_v29 }
0x11be   :  { %6338 = vtanh.f32 %v3567_v19  ;;  %v3428_v11 = vadd.f32 %v7699_v10, %v3425_v25  ;;  %v5593_v15 = vmul.f32 -1.442695, %v3569_v43  ;;  %v5594_v31 = vmul.f32 -1.442695, %v3570_v41 }
0x11bf   :  { %6340 = vtanh.f32 %v3568_v29  ;;  %v5595_v3 = vmul.f32 -1.442695, %v3571_v24  ;;  %v5597_v54 = vmul.f32 -1.442695, %v3573_v17  ;;  %v5596_v5 = vmul.f32 -1.442695, %v3572_v20 }
0x11c0   :  { %6342 = vtanh.f32 %v3569_v43  ;;  %v5588_v30 = vmul.f32 -1.442695, %v3428_v11 }
0x11c1   :  { %6344 = vtanh.f32 %v3570_v41 }
0x11c2   :  { %6346 = vtanh.f32 %v3571_v24 }
0x11c3   :  { %6348 = vtanh.f32 %v3573_v17 }
0x11c4   :  { %6350 = vtanh.f32 %v3428_v11 }
0x11c5   :  { %6352 = vtanh.f32 %v3572_v20 }
0x11c6   :  { %6354 = vpow2.f32 %v5590_v8 }
0x11c7   :  { %6356 = vpow2.f32 %v5591_v0 }
0x11c8   :  { %6358 = vpow2.f32 %v5592_v23 }
0x11c9   :  { %6360 = vpow2.f32 %v5593_v15 }
0x11ca   :  { %v6337_v57 = vpop.eup %6336  ;;  %6362 = vpow2.f32 %v5594_v31 }
0x11cb   :  { %3670 = vrot.lane.b32.xlu0 %v6337_v57, %s6632_s3  ;;  %v6339_v38 = vpop.eup %6338  ;;  %6364 = vpow2.f32 %v5595_v3 }
0x11cc   :  { %v6341_v22 = vpop.eup %6340  ;;  %3672 = vrot.lane.b32.xlu1 %v6339_v38, %s6632_s3 }
0x11cd   :  { %v6343_v52 = vpop.eup %6342 }
0x11ce   :  { %v6345_v50 = vpop.eup %6344 }
0x11cf   :  { %3674 = vrot.lane.b32.xlu0 %v6341_v22, %s6632_s3  ;;  %v6347_v16 = vpop.eup %6346 }
0x11d0   :  { %3676 = vrot.lane.b32.xlu1 %v6343_v52, %s6632_s3  ;;  %v6349_v10 = vpop.eup %6348 }
0x11d1   :  { %v6351_v49 = vpop.eup %6350 }
0x11d2   :  { %v6353_v13 = vpop.eup %6352 }
0x11d3   :  { %3678 = vrot.lane.b32.xlu0 %v6345_v50, %s6632_s3  ;;  %v6355_v51 = vpop.eup %6354 }
0x11d4   :  { %3680 = vrot.lane.b32.xlu1 %v6347_v16, %s6632_s3  ;;  %v3598_v33 = vadd.f32 1.0, %v6355_v51  ;;  %v6357_v2 = vpop.eup %6356 }
0x11d5   :  { %v6359_v56 = vpop.eup %6358  ;;  %v3599_v1 = vadd.f32 1.0, %v6357_v2 }
0x11d6   :  { %6366 = vrcp.f32 %v3598_v33  ;;  %v6361_v19 = vpop.eup %6360  ;;  %v3600_v29 = vadd.f32 1.0, %v6359_v56 }
0x11d7   :  { %3438 = vrot.lane.b32.xlu0 %v6351_v49, %s6635_s14  ;;  %6368 = vpow2.f32 %v5597_v54  ;;  %v6363_v14 = vpop.eup %6362  ;;  %v3601_v43 = vadd.f32 1.0, %v6361_v19 }
0x11d8   :  { %3684 = vrot.lane.b32.xlu1 %v6349_v10, %s6632_s3  ;;  %6370 = vpow2.f32 %v5588_v30  ;;  %v6365_v41 = vpop.eup %6364  ;;  %v3602_v57 = vadd.f32 1.0, %v6363_v14 }
0x11d9   :  { %6372 = vpow2.f32 %v5596_v5  ;;  %v3603_v24 = vadd.f32 1.0, %v6365_v41 }
0x11da   :  { %6374 = vrcp.f32 %v3599_v1 }
0x11db   :  { %3682 = vrot.lane.b32.xlu0 %v6353_v13, %s6632_s3  ;;  %6376 = vrcp.f32 %v3600_v29 }
0x11dc   :  { %6378 = vrcp.f32 %v3601_v43 }
0x11dd   :  { %6380 = vrcp.f32 %v3602_v57 }
0x11de   :  { %6382 = vrcp.f32 %v3603_v24  ;;  %v3638_v24 = vrot.slane %v7749_v59, 7 }
0x11e3   :  { %v7915_v55 = vpop.eup %6366 }
0x11e4   :  { %v6369_v25 = vpop.eup %6368 }
0x11e5   :  { %v3605_v38 = vadd.f32 1.0, %v6369_v25  ;;  %v6371_v22 = vpop.eup %6370 }
0x11e6   :  { %v6373_v20 = vpop.eup %6372  ;;  %v3432_v52 = vadd.f32 1.0, %v6371_v22  ;;  %v3640_v22 = vrot.slane %v7760_v36, 7 }
0x11e7   :  { %6384 = vrcp.f32 %v3605_v38  ;;  %v7919_v50 = vpop.eup %6374  ;;  %v3604_v0 = vadd.f32 1.0, %v6373_v20  ;;  %v3639_v38 = vrot.slane %v7757_v53, 7 }
0x11e8   :  { %v7921_v10 = vpop.eup %6376  ;;  %6386 = vrcp.f32 %v3432_v52 }
0x11e9   :  { %v7926_v23 = vpop.eup %6378  ;;  %6388 = vrcp.f32 %v3604_v0  ;;  %v3655_v20 = vmul.f32 %v7919_v50, %v3639_v38 }
0x11ea   :  { %v7929_v31 = vpop.eup %6380 }
0x11eb   :  { %v7934_v54 = vpop.eup %6382 }
0x11f4   :  { %v7939_v56 = vpop.eup %6384 }
0x11f5   :  { %v7943_v19 = vpop.eup %6386 }
0x11f6   :  { %v7947_v43 = vpop.eup %6388 }
0x123d   :  { %v3671_v17 = vpop.permute.xlu0 %3670 }
0x123e   :  { %v3694_v11 = vmul.f32 %v7915_v55, %v3671_v17  ;;  %v3673_v16 = vpop.permute.xlu1 %3672  ;;  %v3654_v17 = vmul.f32 %v7915_v55, %v3638_v24 }
0x123f   :  { %v3695_v49 = vmul.f32 %v7919_v50, %v3673_v16  ;;  %v3656_v16 = vmul.f32 %v7921_v10, %v3640_v22 }
0x1240   :  { %3710 = vrot.lane.b32.xlu1 %v3694_v11, %s6633_s29 }
0x1241   :  { %v3675_v13 = vpop.permute.xlu0 %3674  ;;  %3712 = vrot.lane.b32.xlu0 %v3695_v49, %s6633_s29  ;;  %v3641_v49 = vrot.slane %v7766_v63, 7 }
0x1242   :  { %v3696_v8 = vmul.f32 %v7921_v10, %v3675_v13  ;;  %v3677_v15 = vpop.permute.xlu1 %3676 }
0x1243   :  { %v3697_v51 = vmul.f32 %v7926_v23, %v3677_v15  ;;  %v3657_v53 = vmul.f32 %v7926_v23, %v3641_v49 }
0x1244   :  { %3714 = vrot.lane.b32.xlu1 %v3696_v8, %s6633_s29  ;;  %v3642_v8 = vrot.slane %v7769_v39, 7 }
0x1245   :  { %v3679_v3 = vpop.permute.xlu0 %3678  ;;  %3716 = vrot.lane.b32.xlu0 %v3697_v51, %s6633_s29  ;;  %v3643_v51 = vrot.slane %v7792_v26, 7 }
0x1246   :  { %v3698_v33 = vmul.f32 %v7929_v31, %v3679_v3  ;;  %v3681_v30 = vpop.permute.xlu1 %3680  ;;  %v3658_v15 = vmul.f32 %v7929_v31, %v3642_v8 }
0x1247   :  { %v3699_v2 = vmul.f32 %v7934_v54, %v3681_v30  ;;  %v3659_v39 = vmul.f32 %v7934_v54, %v3643_v51 }
0x1248   :  { %3718 = vrot.lane.b32.xlu1 %v3698_v33, %s6633_s29 }
0x1249   :  { %3720 = vrot.lane.b32.xlu0 %v3699_v2, %s6633_s29  ;;  %v3439_v29 = vpop.permute.xlu0 %3438 }
0x124a   :  { %v3685_v5 = vpop.permute.xlu1 %3684  ;;  %v3441_v14 = vmul.f32 %v7943_v19, %v3439_v29 }
0x124b   :  { %v3701_v1 = vmul.f32 %v7939_v56, %v3685_v5  ;;  %v3645_v5 = vrot.slane %v7780_v58, 7 }
0x124c   :  { %3443 = vrot.lane.b32.xlu1 %v3441_v14, %s6636_s15 }
0x124d   :  { %3724 = vrot.lane.b32.xlu0 %v3701_v1, %s6633_s29  ;;  %v3683_v41 = vpop.permute.xlu0 %3682  ;;  %v3661_v26 = vmul.f32 %v7939_v56, %v3645_v5 }
0x124e   :  { %v3700_v57 = vmul.f32 %v7947_v43, %v3683_v41  ;;  %v3436_v41 = vmul.f32 %v7943_v19, %v7786_v7 }
0x1250   :  { %3722 = vrot.lane.b32.xlu1 %v3700_v57, %s6633_s29 }
0x12b2   :  { %v3711_v25 = vpop.permute.xlu1 %3710 }
0x12b3   :  { %v7953_v11 = vadd.f32 %v3711_v25, %v3654_v17  ;;  %v3713_v52 = vpop.permute.xlu0 %3712  ;;  %v3644_v25 = vrot.slane %v7776_v61, 7 }
0x12b4   :  { %v7961_v13 = vadd.f32 %v3713_v52, %v3655_v20 }
0x12b5   :  { %6390 = vtanh.f32 %v7953_v11  ;;  %v3660_v38 = vmul.f32 %v7947_v43, %v3644_v25 }
0x12b6   :  { %v3715_v59 = vpop.permute.xlu1 %3714  ;;  %6392 = vtanh.f32 %v7961_v13 }
0x12b7   :  { %v7964_v0 = vadd.f32 %v3715_v59, %v3656_v16  ;;  %v3717_v36 = vpop.permute.xlu0 %3716 }
0x12b8   :  { %v7971_v3 = vadd.f32 %v3717_v36, %v3657_v53 }
0x12b9   :  { %6394 = vtanh.f32 %v7964_v0 }
0x12ba   :  { %v3719_v63 = vpop.permute.xlu1 %3718  ;;  %6396 = vtanh.f32 %v7971_v3 }
0x12bb   :  { %v7973_v33 = vadd.f32 %v3719_v63, %v3658_v15  ;;  %v3721_v2 = vpop.permute.xlu0 %3720 }
0x12bc   :  { %v7980_v1 = vadd.f32 %v3721_v2, %v3659_v39 }
0x12bd   :  { %6398 = vtanh.f32 %v7973_v33 }
0x12be   :  { %6400 = vtanh.f32 %v7980_v1  ;;  %v3444_v24 = vpop.permute.xlu1 %3443 }
0x12bf   :  { %v3725_v29 = vpop.permute.xlu0 %3724  ;;  %v7990_v58 = vadd.f32 %v3444_v24, %v3436_v41 }
0x12c0   :  { %v7984_v14 = vadd.f32 %v3725_v29, %v3661_v26 }
0x12c2   :  { %v6391_v30 = vpop.eup %6390  ;;  %6402 = vtanh.f32 %v7984_v14  ;;  %v3723_v20 = vpop.permute.xlu1 %3722 }
0x12c3   :  { %3758 = vrot.lane.b32.xlu0 %v6391_v30, %s6633_s29  ;;  %v6393_v57 = vpop.eup %6392  ;;  %6404 = vtanh.f32 %v7990_v58  ;;  %v7996_v16 = vadd.f32 %v3723_v20, %v3660_v38 }
0x12c4   :  { %3760 = vrot.lane.b32.xlu1 %v6393_v57, %s6633_s29 }
0x12c5   :  { %6406 = vtanh.f32 %v7996_v16 }
0x12c6   :  { %v6395_v17 = vpop.eup %6394 }
0x12c7   :  { %3762 = vrot.lane.b32.xlu0 %v6395_v17, %s6633_s29  ;;  %v6397_v22 = vpop.eup %6396 }
0x12c8   :  { %3764 = vrot.lane.b32.xlu1 %v6397_v22, %s6633_s29 }
0x12ca   :  { %v6399_v52 = vpop.eup %6398 }
0x12cb   :  { %3766 = vrot.lane.b32.xlu0 %v6399_v52, %s6633_s29  ;;  %v6401_v61 = vpop.eup %6400 }
0x12cc   :  { %3768 = vrot.lane.b32.xlu1 %v6401_v61, %s6633_s29 }
0x12cf   :  { %v6403_v7 = vpop.eup %6402 }
0x12d0   :  { %3772 = vrot.lane.b32.xlu1 %v6403_v7, %s6633_s29  ;;  %v6405_v49 = vpop.eup %6404 }
0x12d1   :  { %3449 = vrot.lane.b32.xlu0 %v6405_v49, %s6636_s15 }
0x12d2   :  { %v6407_v59 = vpop.eup %6406 }
0x12d5   :  { %3770 = vrot.lane.b32.xlu0 %v6407_v59, %s6633_s29 }
0x1335   :  { %v3759_v8 = vpop.permute.xlu0 %3758 }
0x1336   :  { %v3761_v53 = vpop.permute.xlu1 %3760  ;;  %v3782_v15 = vmul.f32 %v7915_v55, %v3759_v8 }
0x1337   :  { %v3783_v51 = vmul.f32 %v7919_v50, %v3761_v53 }
0x1338   :  { %v3790_v2 = vmax.f32 %v3782_v15, 0.0  ;;  %v4003_v24 = vrot.slane %v3782_v15, 6 }
0x1339   :  { %v3763_v36 = vpop.permute.xlu0 %3762  ;;  %v3791_v5 = vmax.f32 %v3783_v51, 0.0  ;;  %v4004_v17 = vrot.slane %v3783_v51, 5 }
0x133a   :  { %v3765_v63 = vpop.permute.xlu1 %3764  ;;  %v3784_v30 = vmul.f32 %v7921_v10, %v3763_v36  ;;  %v3881_v38 = vrot.slane %v3790_v2, 6 }
0x133b   :  { %v3785_v26 = vmul.f32 %v7926_v23, %v3765_v63  ;;  %v3882_v22 = vrot.slane %v3791_v5, 5  ;;  %v4005_v10 = vsel %vm623_vm3, %v4004_v17, %v4003_v24 }
0x133c   :  { %v3792_v29 = vmax.f32 %v3784_v30, 0.0  ;;  %v4006_v25 = vrot.slane %v3784_v30, 4 }
0x133d   :  { %v3767_v39 = vpop.permute.xlu0 %3766  ;;  %v3793_v55 = vmax.f32 %v3785_v26, 0.0  ;;  %v4008_v61 = vrot.slane %v3785_v26, 3 }
0x133e   :  { %v3786_v41 = vmul.f32 %v7929_v31, %v3767_v39  ;;  %v3769_v57 = vpop.permute.xlu1 %3768  ;;  %v3884_v20 = vrot.slane %v3792_v29, 4  ;;  %v4007_v7 = vsel %vm626_vm4, %v4006_v25, %v4005_v10  ;;  %v3883_v31 = vsel %vm623_vm3, %v3882_v22, %v3881_v38 }
0x133f   :  { %v3787_v50 = vmul.f32 %v7934_v54, %v3769_v57  ;;  %v3886_v59 = vrot.slane %v3793_v55, 3  ;;  %v4009_v54 = vsel %vm629_vm5, %v4008_v61, %v4007_v7 }
0x1340   :  { %v3794_v52 = vmax.f32 %v3786_v41, 0.0  ;;  %v4010_v23 = vrot.slane %v3786_v41, 2  ;;  %v3885_v36 = vsel %vm626_vm4, %v3884_v20, %v3883_v31 }
0x1341   :  { %v3795_v8 = vmax.f32 %v3787_v50, 0.0  ;;  %v4012_v63 = vrot.slane %v3787_v50, 1  ;;  %v3887_v5 = vsel %vm629_vm5, %v3886_v59, %v3885_v36 }
0x1342   :  { %v3773_v49 = vpop.permute.xlu1 %3772  ;;  %v3888_v15 = vrot.slane %v3794_v52, 2  ;;  %v4011_v39 = vsel %vm632_vm6, %v4010_v23, %v4009_v54 }
0x1343   :  { %v3450_v53 = vpop.permute.xlu0 %3449  ;;  %v3789_v30 = vmul.f32 %v7939_v56, %v3773_v49  ;;  %v3890_v26 = vrot.slane %v3795_v8, 1  ;;  %v4013_v17 = vsel %vm635_vm7, %v4012_v63, %v4011_v39 }
0x1344   :  { %v3452_v51 = vmul.f32 %v7943_v19, %v3450_v53  ;;  %v3889_v41 = vsel %vm632_vm6, %v3888_v15, %v3887_v5 }
0x1345   :  { %v3797_v25 = vmax.f32 %v3789_v30, 0.0  ;;  %v3891_v50 = vsel %vm635_vm7, %v3890_v26, %v3889_v41  ;;  %v4015_v20 = vrot.slane %v3789_v30, 7 }
0x1346   :  { %v3453_v2 = vmax.f32 %v3452_v51, 0.0  ;;  %3799 = vrot.lane.b32.xlu1 %v3452_v51, %s6637_s16 }
0x1347   :  { %v3771_v29 = vpop.permute.xlu0 %3770  ;;  %v3893_v23 = vrot.slane %v3797_v25, 7 }
0x1348   :  { %v4795_v57 = vcombine.high %v3453_v2, %v3453_v2  ;;  %v4802_v24 = vrot.slane %v3453_v2, %v7170_v44  ;;  %v3788_v19 = vmul.f32 %v7947_v43, %v3771_v29 }
0x134a   :  { %v4809_v56 = vrot.slane %v4795_v57, %v7170_v44  ;;  %v4810_v38 = vcombine.high %v4802_v24, %v4802_v24  ;;  %v4818_v22 = vrot.slane %v4802_v24, %v7170_v44  ;;  %v3796_v55 = vmax.f32 %v3788_v19, 0.0 }
0x134b   :  { %v4014_v52 = vsel %vm638_vm8, %v3788_v19, %v4013_v17 }
0x134c   :  { %v4811_v10 = vcombine.high %v4809_v56, %v4809_v56  ;;  %v4825_v61 = vrot.slane %v4809_v56, %v7170_v44  ;;  %v4832_v43 = vrot.slane %v4810_v38, %v7170_v44  ;;  %v4840_v7 = vcombine.high %v4818_v22, %v4818_v22 }
0x134d   :  { %v5107_v49 = vrot.slane %v4818_v22, %v7195_v62  ;;  %v4016_v31 = vsel %vm641_vm9, %v4015_v20, %v4014_v52  ;;  %v3892_v59 = vsel %vm638_vm8, %v3796_v55, %v3891_v50 }
0x134e   :  { %v4839_v8 = vrot.slane %v4811_v10, %v7170_v44  ;;  %v4841_v53 = vcombine.high %v4825_v61, %v4825_v61  ;;  %v4842_v36 = vcombine.high %v4832_v43, %v4832_v43  ;;  %v5111_v15 = vrot.slane %v4832_v43, %v7195_v62  ;;  %4017 = vrot.lane.b32.xlu0 %v4016_v31, %s6634_s11 }
0x134f   :  { %v5115_v51 = vrot.slane %v4840_v7, %v7195_v62  ;;  %v5123_v54 = vrot.slane %v4825_v61, %v7195_v62  ;;  %v3894_v63 = vsel %vm641_vm9, %v3893_v23, %v3892_v59  ;;  %v8042_v30 = vsel %vm5259_vm15, %v7841_v9, %v5107_v49 }
0x1350   :  { %v4843_v39 = vcombine.high %v4839_v8, %v4839_v8  ;;  %3895 = vrot.lane.b32.xlu1 %v3894_v63, %s6634_s11  ;;  %v8047_v2 = vsel %vm5259_vm15, %v7845_v12, %v5111_v15  ;;  %v5119_v5 = vrot.slane %v4842_v36, %v7195_v62  ;;  %v5127_v26 = vrot.slane %v4839_v8, %v7195_v62 }
0x1351   :  { %v8053_v29 = vsel %vm5259_vm15, %v7849_v40, %v5115_v51  ;;  %v8057_v41 = vsel %vm5259_vm15, %v7859_v48, %v5123_v54  ;;  %v5131_v9 = vrot.slane %v4841_v53, %v7195_v62 }
0x1352   :  { %v8062_v57 = vsel %vm5259_vm15, %v7855_v60, %v5119_v5  ;;  %v8066_v12 = vsel %vm5259_vm15, %v7863_v4, %v5127_v26  ;;  %v5135_v24 = vrot.slane %v4843_v39, %v7195_v62 }
0x1353   :  { %v8071_v40 = vsel %vm5259_vm15, %v7867_v47, %v5131_v9  ;;  %v6534_v47 = vld [vmem:[#allocation7 + $0x8] sm:$0xff] }
0x1354   :  { %v8075_v48 = vsel %vm5259_vm15, %v7871_v35, %v5135_v24  ;;  %v6535_v35 = vld [vmem:[%s8346_s5] sm:$0xf] }
0x13b8   :  { %v3800_v19 = vpop.permute.xlu1 %3799 }
0x13b9   :  { %5853 = vmatmul.mubr.msk.f32.vlgmr.msra.gmra.mxu1 %vm537_vm11, %v3800_v19 }
0x13ba   :  { %5863 = vmatpush3.msra.mxu1 %v7874_v27  ;;  %5866 = vmatprep.mubr.msk.f32.mxu1 %vm6631_vm1, %v6630_v6  ;;  %v6536_v27 = vld [vmem:[#allocation7] sm:$0xff] }
0x13bb   :  { %5864 = vmatprep.subr.mxu1 %v6630_v6 }
0x13bc   :  { %5865 = vmatpush3.msra.mxu1 %v7880_v45 }
0x13bd   :  { %5874 = vmatprep.subr.mxu1 %v6630_v6 }
0x13c0   :  { %v4018_v60 = vpop.permute.xlu0 %4017 }
0x13c1   :  { %5867 = vmatmul.mubr.msk.f32.vlgmr.msra.gmra.mxu1 %vm239_vm10, %v4018_v60 }
0x13c2   :  { %v3896_v4 = vpop.permute.xlu1 %3895  ;;  %5875 = vmatpush3.msra.mxu1 %v6534_v47  ;;  %5878 = vmatprep.mubr.msk.f32.mxu1 %vm6631_vm1, %v6630_v6 }
0x13c3   :  { %5860 = vmatmul.mubr.msk.f32.vlgmr.msra.gmra.mxu0 %vm239_vm10, %v3896_v4  ;;  %5876 = vmatprep.subr.mxu1 %v6630_v6 }
0x13c4   :  { %5870 = vmatpush3.msk.msra.mxu0 %vm540_vm2, %v6535_v35  ;;  %5871 = vmatprep.mubr.msk.f32.mxu0 %vm6631_vm1, %v6630_v6  ;;  %vm5277_vm1 = vcmask 1046528  }
0x13c5   :  { %5877 = vmatpush3.msra.mxu1 %v6536_v27 }
0x1479   :  { %v3869_v45 = vpop.f32.mrf.mxu1 }
0x147b   :  { %v5854_v17 = vpop.f32.mrf.mxu1 }
0x1481   :  { %v4087_v25 = vpop.f32.mrf.mxu1 }
0x1482   :  { %v4092_v56 = vrot.slane %v4087_v25, 1  ;;  %v4093_v20 = vrot.slane %v4087_v25, 2  ;;  %v4094_v52 = vrot.slane %v4087_v25, 3  ;;  %v4095_v10 = vrot.slane %v4087_v25, 4 }
0x1483   :  { %v3965_v38 = vpop.f32.mrf.mxu0  ;;  %v5868_v22 = vpop.f32.mrf.mxu1  ;;  %v4096_v43 = vrot.slane %v4087_v25, 5  ;;  %v4097_v7 = vrot.slane %v4087_v25, 6  ;;  %v4098_v49 = vrot.slane %v4087_v25, 7 }
0x1484   :  { %v4107_v55 = vadd.f32 %v4092_v56, %v6729_v18  ;;  %v4108_v61 = vadd.f32 %v4093_v20, %v6740_v34  ;;  %v4109_v6 = vadd.f32 %v4094_v52, %v6743_v37  ;;  %v4110_v23 = vadd.f32 %v4095_v10, %v6731_v21  ;;  %v8107_v21 = vld [vmem:[%s8347_s6] ss:$0 sm:$0xff] }
0x1485   :  { %v5861_v50 = vpop.f32.mrf.mxu0  ;;  %v4111_v31 = vadd.f32 %v4096_v43, %v6748_v42  ;;  %v4112_v18 = vadd.f32 %v4097_v7, %v6735_v28  ;;  %v4113_v8 = vadd.f32 %v4098_v49, %v6752_v46  ;;  %v4114_v34 = vadd.f32 %v4087_v25, %v6738_v32 }
0x1486   :  { %6408 = vtanh.f32 %v4107_v55  ;;  %v3966_v37 = vadd.f32 %v3965_v38, %v3869_v45  ;;  %v5603_v63 = vmul.f32 -1.442695, %v4107_v55  ;;  %v5604_v39 = vmul.f32 -1.442695, %v4108_v61 }
0x1487   :  { %6410 = vtanh.f32 %v4108_v61  ;;  %v5605_v5 = vmul.f32 -1.442695, %v4109_v6  ;;  %v5606_v26 = vmul.f32 -1.442695, %v4110_v23  ;;  %v5607_v9 = vmul.f32 -1.442695, %v4111_v31 }
0x1488   :  { %6412 = vtanh.f32 %v4109_v6  ;;  %v3969_v42 = vadd.f32 %v8107_v21, %v3966_v37  ;;  %v5608_v19 = vmul.f32 -1.442695, %v4112_v18  ;;  %v5609_v60 = vmul.f32 -1.442695, %v4113_v8 }
0x1489   :  { %6414 = vtanh.f32 %v4110_v23  ;;  %v5610_v47 = vmul.f32 -1.442695, %v4114_v34 }
0x148a   :  { %6416 = vtanh.f32 %v4111_v31  ;;  %v5601_v35 = vmul.f32 -1.442695, %v3969_v42 }
0x148b   :  { %6418 = vtanh.f32 %v4112_v18 }
0x148c   :  { %6420 = vtanh.f32 %v4113_v8 }
0x148d   :  { %6422 = vtanh.f32 %v4114_v34 }
0x148e   :  { %6424 = vtanh.f32 %v3969_v42 }
0x148f   :  { %6426 = vpow2.f32 %v5603_v63 }
0x1490   :  { %6428 = vpow2.f32 %v5604_v39 }
0x1491   :  { %6430 = vpow2.f32 %v5605_v5 }
0x1492   :  { %6432 = vpow2.f32 %v5606_v26 }
0x1493   :  { %v6409_v59 = vpop.eup %6408  ;;  %6434 = vpow2.f32 %v5607_v9 }
0x1494   :  { %4211 = vrot.lane.b32.xlu0 %v6409_v59, %s6632_s3  ;;  %v6411_v28 = vpop.eup %6410  ;;  %6436 = vpow2.f32 %v5608_v19 }
0x1495   :  { %v6413_v53 = vpop.eup %6412  ;;  %4213 = vrot.lane.b32.xlu1 %v6411_v28, %s6632_s3  ;;  %6438 = vpow2.f32 %v5609_v60 }
0x1496   :  { %v6415_v46 = vpop.eup %6414 }
0x1497   :  { %v6417_v32 = vpop.eup %6416 }
0x1498   :  { %4215 = vrot.lane.b32.xlu0 %v6413_v53, %s6632_s3  ;;  %v6419_v36 = vpop.eup %6418 }
0x1499   :  { %4217 = vrot.lane.b32.xlu1 %v6415_v46, %s6632_s3  ;;  %v6421_v15 = vpop.eup %6420 }
0x149a   :  { %v6423_v51 = vpop.eup %6422 }
0x149b   :  { %v6425_v54 = vpop.eup %6424 }
0x149c   :  { %4219 = vrot.lane.b32.xlu0 %v6417_v32, %s6632_s3  ;;  %v6427_v24 = vpop.eup %6426 }
0x149d   :  { %4221 = vrot.lane.b32.xlu1 %v6419_v36, %s6632_s3  ;;  %v4139_v4 = vadd.f32 1.0, %v6427_v24  ;;  %v6429_v27 = vpop.eup %6428 }
0x149e   :  { %v6431_v45 = vpop.eup %6430  ;;  %v4140_v17 = vadd.f32 1.0, %v6429_v27 }
0x149f   :  { %6440 = vrcp.f32 %v4139_v4  ;;  %v6433_v25 = vpop.eup %6432  ;;  %v4141_v56 = vadd.f32 1.0, %v6431_v45 }
0x14a0   :  { %4223 = vrot.lane.b32.xlu0 %v6421_v15, %s6632_s3  ;;  %6442 = vpow2.f32 %v5610_v47  ;;  %v6435_v38 = vpop.eup %6434  ;;  %v4142_v22 = vadd.f32 1.0, %v6433_v25  ;;  %v4180_v25 = vrot.slane %v7961_v13, 7 }
0x14a1   :  { %4225 = vrot.lane.b32.xlu1 %v6423_v51, %s6632_s3  ;;  %6444 = vpow2.f32 %v5601_v35  ;;  %v6437_v55 = vpop.eup %6436  ;;  %v4143_v50 = vadd.f32 1.0, %v6435_v38  ;;  %v4179_v35 = vrot.slane %v7953_v11, 7  ;;  %v4183_v11 = vrot.slane %v7973_v33, 7 }
0x14a2   :  { %6446 = vrcp.f32 %v4140_v17  ;;  %v6439_v20 = vpop.eup %6438  ;;  %v4144_v10 = vadd.f32 1.0, %v6437_v55 }
0x14a3   :  { %6448 = vrcp.f32 %v4141_v56  ;;  %v4145_v6 = vadd.f32 1.0, %v6439_v20  ;;  %v4181_v56 = vrot.slane %v7964_v0, 7  ;;  %v4184_v0 = vrot.slane %v7980_v1, 7 }
0x14a4   :  { %3979 = vrot.lane.b32.xlu0 %v6425_v54, %s6635_s14  ;;  %6450 = vrcp.f32 %v4142_v22 }
0x14a5   :  { %6452 = vrcp.f32 %v4143_v50  ;;  %v4182_v50 = vrot.slane %v7971_v3, 7 }
0x14a6   :  { %6454 = vrcp.f32 %v4144_v10 }
0x14a7   :  { %6456 = vrcp.f32 %v4145_v6 }
0x14ac   :  { %v8118_v52 = vpop.eup %6440 }
0x14ad   :  { %v6443_v43 = vpop.eup %6442  ;;  %v4195_v27 = vmul.f32 %v8118_v52, %v4179_v35 }
0x14ae   :  { %v4146_v23 = vadd.f32 1.0, %v6443_v43  ;;  %v6445_v49 = vpop.eup %6444 }
0x14af   :  { %v3973_v31 = vadd.f32 1.0, %v6445_v49  ;;  %v8122_v59 = vpop.eup %6446  ;;  %v4185_v49 = vrot.slane %v7996_v16, 7 }
0x14b0   :  { %6458 = vrcp.f32 %v4146_v23  ;;  %v8124_v8 = vpop.eup %6448  ;;  %v4196_v38 = vmul.f32 %v8122_v59, %v4180_v25 }
0x14b1   :  { %6460 = vrcp.f32 %v3973_v31  ;;  %v8129_v28 = vpop.eup %6450  ;;  %v4197_v55 = vmul.f32 %v8124_v8, %v4181_v56 }
0x14b2   :  { %v8132_v46 = vpop.eup %6452  ;;  %v4198_v43 = vmul.f32 %v8129_v28, %v4182_v50 }
0x14b3   :  { %v8137_v51 = vpop.eup %6454  ;;  %v4199_v13 = vmul.f32 %v8132_v46, %v4183_v11 }
0x14b4   :  { %v8140_v63 = vpop.eup %6456 }
0x14bd   :  { %v8145_v9 = vpop.eup %6458 }
0x14be   :  { %v8150_v60 = vpop.eup %6460 }
0x1506   :  { %v4212_v61 = vpop.permute.xlu0 %4211 }
0x1507   :  { %v4235_v7 = vmul.f32 %v8118_v52, %v4212_v61  ;;  %v4214_v18 = vpop.permute.xlu1 %4213 }
0x1508   :  { %v4236_v34 = vmul.f32 %v8122_v59, %v4214_v18  ;;  %v4200_v18 = vmul.f32 %v8137_v51, %v4184_v0 }
0x1509   :  { %4251 = vrot.lane.b32.xlu1 %v4235_v7, %s6633_s29 }
0x150a   :  { %v4216_v37 = vpop.permute.xlu0 %4215  ;;  %4253 = vrot.lane.b32.xlu0 %v4236_v34, %s6633_s29  ;;  %v4201_v34 = vmul.f32 %v8140_v63, %v4185_v49 }
0x150b   :  { %v4237_v42 = vmul.f32 %v8124_v8, %v4216_v37  ;;  %v4218_v53 = vpop.permute.xlu1 %4217  ;;  %v4186_v37 = vrot.slane %v7984_v14, 7 }
0x150c   :  { %v4238_v32 = vmul.f32 %v8129_v28, %v4218_v53 }
0x150d   :  { %4255 = vrot.lane.b32.xlu1 %v4237_v42, %s6633_s29 }
0x150e   :  { %v4220_v36 = vpop.permute.xlu0 %4219  ;;  %4257 = vrot.lane.b32.xlu0 %v4238_v32, %s6633_s29  ;;  %v4202_v32 = vmul.f32 %v8145_v9, %v4186_v37 }
0x150f   :  { %v4239_v15 = vmul.f32 %v8132_v46, %v4220_v36  ;;  %v4222_v54 = vpop.permute.xlu1 %4221 }
0x1510   :  { %v4240_v39 = vmul.f32 %v8137_v51, %v4222_v54 }
0x1511   :  { %4259 = vrot.lane.b32.xlu1 %v4239_v15, %s6633_s29  ;;  %v3977_v15 = vmul.f32 %v8150_v60, %v7990_v58 }
0x1512   :  { %v4224_v5 = vpop.permute.xlu0 %4223  ;;  %4261 = vrot.lane.b32.xlu0 %v4240_v39, %s6633_s29 }
0x1513   :  { %v4241_v26 = vmul.f32 %v8140_v63, %v4224_v5  ;;  %v4226_v24 = vpop.permute.xlu1 %4225 }
0x1514   :  { %v4242_v19 = vmul.f32 %v8145_v9, %v4226_v24 }
0x1515   :  { %4263 = vrot.lane.b32.xlu1 %v4241_v26, %s6633_s29 }
0x1516   :  { %4265 = vrot.lane.b32.xlu0 %v4242_v19, %s6633_s29  ;;  %v3980_v4 = vpop.permute.xlu0 %3979 }
0x1517   :  { %v3982_v47 = vmul.f32 %v8150_v60, %v3980_v4 }
0x1519   :  { %3984 = vrot.lane.b32.xlu1 %v3982_v47, %s6636_s15 }
0x157b   :  { %v4252_v45 = vpop.permute.xlu1 %4251 }
0x157c   :  { %v4275_v17 = vadd.f32 %v4252_v45, %v4195_v27  ;;  %v4254_v22 = vpop.permute.xlu0 %4253 }
0x157d   :  { %v4276_v20 = vadd.f32 %v4254_v22, %v4196_v38 }
0x157e   :  { %6462 = vtanh.f32 %v4275_v17 }
0x157f   :  { %v4256_v10 = vpop.permute.xlu1 %4255  ;;  %6464 = vtanh.f32 %v4276_v20 }
0x1580   :  { %v4277_v61 = vadd.f32 %v4256_v10, %v4197_v55  ;;  %v4258_v6 = vpop.permute.xlu0 %4257 }
0x1581   :  { %v4278_v7 = vadd.f32 %v4258_v6, %v4198_v43 }
0x1582   :  { %6466 = vtanh.f32 %v4277_v61 }
0x1583   :  { %v4260_v23 = vpop.permute.xlu1 %4259  ;;  %6468 = vtanh.f32 %v4278_v7 }
0x1584   :  { %v4279_v31 = vadd.f32 %v4260_v23, %v4199_v13  ;;  %v4262_v33 = vpop.permute.xlu0 %4261 }
0x1585   :  { %v4280_v42 = vadd.f32 %v4262_v33, %v4200_v18 }
0x1586   :  { %6470 = vtanh.f32 %v4279_v31 }
0x1587   :  { %v4264_v53 = vpop.permute.xlu1 %4263  ;;  %6472 = vtanh.f32 %v4280_v42 }
0x1588   :  { %v4281_v1 = vadd.f32 %v4264_v53, %v4201_v34  ;;  %v4266_v16 = vpop.permute.xlu0 %4265 }
0x1589   :  { %v4282_v36 = vadd.f32 %v4266_v16, %v4202_v32 }
0x158a   :  { %6474 = vtanh.f32 %v4281_v1 }
0x158b   :  { %v6463_v3 = vpop.eup %6462  ;;  %6476 = vtanh.f32 %v4282_v36  ;;  %v3985_v39 = vpop.permute.xlu1 %3984 }
0x158c   :  { %4299 = vrot.lane.b32.xlu0 %v6463_v3, %s6633_s29  ;;  %v6465_v54 = vpop.eup %6464  ;;  %v8173_v26 = vadd.f32 %v3985_v39, %v3977_v15 }
0x158d   :  { %4301 = vrot.lane.b32.xlu1 %v6465_v54, %s6633_s29 }
0x158e   :  { %6478 = vtanh.f32 %v8173_v26 }
0x158f   :  { %v6467_v5 = vpop.eup %6466 }
0x1590   :  { %4303 = vrot.lane.b32.xlu0 %v6467_v5, %s6633_s29  ;;  %v6469_v14 = vpop.eup %6468 }
0x1591   :  { %4305 = vrot.lane.b32.xlu1 %v6469_v14, %s6633_s29 }
0x1593   :  { %v6471_v24 = vpop.eup %6470 }
0x1594   :  { %4307 = vrot.lane.b32.xlu0 %v6471_v24, %s6633_s29  ;;  %v6473_v19 = vpop.eup %6472 }
0x1595   :  { %4309 = vrot.lane.b32.xlu1 %v6473_v19, %s6633_s29 }
0x1597   :  { %v6475_v4 = vpop.eup %6474 }
0x1598   :  { %4311 = vrot.lane.b32.xlu0 %v6475_v4, %s6633_s29  ;;  %v6477_v58 = vpop.eup %6476 }
0x1599   :  { %4313 = vrot.lane.b32.xlu1 %v6477_v58, %s6633_s29 }
0x159b   :  { %v6479_v47 = vpop.eup %6478 }
0x159c   :  { %3990 = vrot.lane.b32.xlu0 %v6479_v47, %s6636_s15 }
0x15fe   :  { %v4300_v35 = vpop.permute.xlu0 %4299 }
0x15ff   :  { %v4323_v27 = vmul.f32 %v8118_v52, %v4300_v35  ;;  %v4302_v17 = vpop.permute.xlu1 %4301 }
0x1600   :  { %v4324_v25 = vmul.f32 %v8122_v59, %v4302_v17 }
0x1601   :  { %v4331_v45 = vmax.f32 %v4323_v27, 0.0 }
0x1602   :  { %v4304_v56 = vpop.permute.xlu0 %4303  ;;  %v4332_v22 = vmax.f32 %v4324_v25, 0.0 }
0x1603   :  { %v4325_v38 = vmul.f32 %v8124_v8, %v4304_v56  ;;  %v4422_v55 = vrot.slane %v4331_v45, 7  ;;  %v4306_v50 = vpop.permute.xlu1 %4305 }
0x1604   :  { %v4423_v10 = vrot.slane %v4332_v22, 6  ;;  %v4326_v11 = vmul.f32 %v8129_v28, %v4306_v50 }
0x1605   :  { %v4333_v20 = vmax.f32 %v4325_v38, 0.0 }
0x1606   :  { %v4308_v61 = vpop.permute.xlu0 %4307  ;;  %v4424_v52 = vsel %vm623_vm3, %v4423_v10, %v4422_v55  ;;  %v4334_v13 = vmax.f32 %v4326_v11, 0.0 }
0x1607   :  { %v4425_v43 = vrot.slane %v4333_v20, 5  ;;  %v4327_v6 = vmul.f32 %v8132_v46, %v4308_v61  ;;  %v4310_v59 = vpop.permute.xlu1 %4309 }
0x1608   :  { %v4427_v23 = vrot.slane %v4334_v13, 4  ;;  %v4328_v8 = vmul.f32 %v8137_v51, %v4310_v59 }
0x1609   :  { %v4426_v0 = vsel %vm626_vm4, %v4425_v43, %v4424_v52  ;;  %v4335_v7 = vmax.f32 %v4327_v6, 0.0 }
0x160a   :  { %v4312_v49 = vpop.permute.xlu0 %4311  ;;  %v4336_v18 = vmax.f32 %v4328_v8, 0.0  ;;  %v4428_v28 = vsel %vm629_vm5, %v4427_v23, %v4426_v0 }
0x160b   :  { %v4429_v31 = vrot.slane %v4335_v7, 3  ;;  %v4329_v3 = vmul.f32 %v8140_v63, %v4312_v49  ;;  %v4314_v46 = vpop.permute.xlu1 %4313 }
0x160c   :  { %v4431_v37 = vrot.slane %v4336_v18, 2  ;;  %v4330_v42 = vmul.f32 %v8145_v9, %v4314_v46 }
0x160d   :  { %v4430_v33 = vsel %vm632_vm6, %v4429_v31, %v4428_v28  ;;  %v4337_v34 = vmax.f32 %v4329_v3, 0.0 }
0x160e   :  { %v4338_v1 = vmax.f32 %v4330_v42, 0.0  ;;  %v4432_v32 = vsel %vm635_vm7, %v4431_v37, %v4430_v33  ;;  %v3991_v16 = vpop.permute.xlu0 %3990  ;;  %v101_v33 = vld [vmem:[%s8348_s7] sm:$0xf] }
0x160f   :  { %v4433_v53 = vrot.slane %v4337_v34, 1  ;;  %v3993_v36 = vmul.f32 %v8150_v60, %v3991_v16  ;;  %5881 = vmatprep.subr.msk.mxu0 %vm540_vm2, %v101_v33 }
0x1611   :  { %v4434_v51 = vsel %vm638_vm8, %v4433_v53, %v4432_v32  ;;  %v3994_v15 = vmax.f32 %v3993_v36, 0.0  ;;  %4340 = vrot.lane.b32.xlu1 %v3993_v36, %s6637_s16 }
0x1612   :  { %v4435_v63 = vsel %vm641_vm9, %v4338_v1, %v4434_v51 }
0x1613   :  { %4436 = vrot.lane.b32.xlu0 %v4435_v63, %s6634_s11  ;;  %v4845_v54 = vcombine.high %v3994_v15, %v3994_v15  ;;  %v4852_v39 = vrot.slane %v3994_v15, %v7170_v44 }
0x1615   :  { %v4859_v9 = vrot.slane %v4845_v54, %v7170_v44  ;;  %v4860_v5 = vcombine.high %v4852_v39, %v4852_v39  ;;  %v4868_v14 = vrot.slane %v4852_v39, %v7170_v44 }
0x1617   :  { %v4861_v24 = vcombine.high %v4859_v9, %v4859_v9  ;;  %v4875_v19 = vrot.slane %v4859_v9, %v7170_v44  ;;  %v4882_v60 = vrot.slane %v4860_v5, %v7170_v44  ;;  %v4890_v4 = vcombine.high %v4868_v14, %v4868_v14 }
0x1618   :  { %v5147_v58 = vrot.slane %v4868_v14, %v7195_v62 }
0x1619   :  { %v4889_v47 = vrot.slane %v4861_v24, %v7170_v44  ;;  %v4891_v35 = vcombine.high %v4875_v19, %v4875_v19  ;;  %v4892_v27 = vcombine.high %v4882_v60, %v4882_v60  ;;  %v5151_v45 = vrot.slane %v4882_v60, %v7195_v62 }
0x161a   :  { %v8212_v17 = vsel %vm5268_vm0, %v8042_v30, %v5147_v58  ;;  %v5155_v25 = vrot.slane %v4890_v4, %v7195_v62  ;;  %v5163_v56 = vrot.slane %v4875_v19, %v7195_v62 }
0x161b   :  { %v8218_v38 = vsel %vm5268_vm0, %v8047_v2, %v5151_v45  ;;  %v5159_v22 = vrot.slane %v4892_v27, %v7195_v62  ;;  %v5167_v55 = vrot.slane %v4889_v47, %v7195_v62  ;;  %v5171_v50 = vrot.slane %v4891_v35, %v7195_v62 }
0x161c   :  { %v8225_v20 = vsel %vm5268_vm0, %v8053_v29, %v5155_v25  ;;  %v8229_v30 = vsel %vm5268_vm0, %v8057_v41, %v5163_v56  ;;  %v4893_v10 = vcombine.high %v4889_v47, %v4889_v47 }
0x161d   :  { %v8233_v11 = vsel %vm5268_vm0, %v8062_v57, %v5159_v22  ;;  %v8237_v2 = vsel %vm5268_vm0, %v8066_v12, %v5167_v55  ;;  %v8241_v61 = vsel %vm5268_vm0, %v8071_v40, %v5171_v50 }
0x161e   :  { %v5175_v29 = vrot.slane %v4893_v10, %v7195_v62 }
0x1620   :  { %v8246_v43 = vsel %vm5268_vm0, %v8075_v48, %v5175_v29 }
0x1683   :  { %v4341_v6 = vpop.permute.xlu1 %4340 }
0x1684   :  { %5872 = vmatmul.mubr.msk.f32.vlgmr.msra.gmra.mxu0 %vm537_vm11, %v4341_v6 }
0x1685   :  { %v4437_v41 = vpop.permute.xlu0 %4436  ;;  %5882 = vmatpush3.msk.msra.mxu0 %vm540_vm2, %v101_v33 }
0x1686   :  { %5879 = vmatmul.mubr.msk.f32.vlgmr.msra.gmra.mxu1 %vm239_vm10, %v4437_v41 }
0x1744   :  { %v4410_v52 = vpop.f32.mrf.mxu0 }
0x1746   :  { %v4506_v57 = vpop.f32.mrf.mxu1  ;;  %v5873_v0 = vpop.f32.mrf.mxu0 }
0x1747   :  { %v4507_v12 = vadd.f32 %v4506_v57, %v4410_v52 }
0x1748   :  { %v5880_v13 = vpop.f32.mrf.mxu1 }
0x1749   :  { %v4510_v40 = vadd.f32 %v8107_v21, %v4507_v12 }
0x174b   :  { %6480 = vtanh.f32 %v4510_v40  ;;  %v5614_v7 = vmul.f32 -1.442695, %v4510_v40 }
0x174d   :  { %6482 = vpow2.f32 %v5614_v7 }
0x1758   :  { %v6481_v59 = vpop.eup %6480 }
0x1759   :  { %4520 = vrot.lane.b32.xlu1 %v6481_v59, %s6635_s14 }
0x175a   :  { %v6483_v48 = vpop.eup %6482 }
0x175b   :  { %v4514_v23 = vadd.f32 1.0, %v6483_v48 }
0x175d   :  { %6484 = vrcp.f32 %v4514_v23 }
0x176a   :  { %v6485_v8 = vpop.eup %6484 }
0x176b   :  { %v4518_v3 = vmul.f32 %v6485_v8, %v8173_v26 }
0x17cb   :  { %v4521_v49 = vpop.permute.xlu1 %4520 }
0x17cc   :  { %v4523_v31 = vmul.f32 %v6485_v8, %v4521_v49 }
0x17ce   :  { %4525 = vrot.lane.b32.xlu0 %v4523_v31, %s6636_s15 }
0x1840   :  { %v4526_v18 = vpop.permute.xlu0 %4525 }
0x1841   :  { %v4528_v28 = vadd.f32 %v4526_v18, %v4518_v3 }
0x1843   :  { %6486 = vtanh.f32 %v4528_v28 }
0x1850   :  { %v6487_v21 = vpop.eup %6486 }
0x1851   :  { %4531 = vrot.lane.b32.xlu1 %v6487_v21, %s6636_s15 }
0x18c3   :  { %v4532_v46 = vpop.permute.xlu1 %4531 }
0x18c4   :  { %v4534_v34 = vmul.f32 %v6485_v8, %v4532_v46 }
0x18c6   :  { %v4535_v37 = vmax.f32 %v4534_v34, 0.0 }
0x18c8   :  { %v4895_v42 = vcombine.high %v4535_v37, %v4535_v37  ;;  %v4902_v26 = vrot.slane %v4535_v37, %v7170_v44 }
0x18ca   :  { %v4909_v53 = vrot.slane %v4895_v42, %v7170_v44  ;;  %v4910_v1 = vcombine.high %v4902_v26, %v4902_v26  ;;  %v4918_v32 = vrot.slane %v4902_v26, %v7170_v44 }
0x18cc   :  { %v4911_v16 = vcombine.high %v4909_v53, %v4909_v53  ;;  %v4932_v51 = vrot.slane %v4910_v1, %v7170_v44  ;;  %v4940_v36 = vcombine.high %v4918_v32, %v4918_v32  ;;  %v5187_v63 = vrot.slane %v4918_v32, %v7195_v62 }
0x18cd   :  { %v4925_v39 = vrot.slane %v4909_v53, %v7170_v44 }
0x18ce   :  { %v4942_v15 = vcombine.high %v4932_v51, %v4932_v51  ;;  %v5191_v54 = vrot.slane %v4932_v51, %v7195_v62  ;;  %v5278_v9 = vsel %vm5277_vm1, %v8212_v17, %v5187_v63  ;;  %v5195_v5 = vrot.slane %v4940_v36, %v7195_v62 }
0x18cf   :  { %v4939_v14 = vrot.slane %v4911_v16, %v7170_v44  ;;  %5300 = vrot.lane.b32.xlu0 %v5278_v9, %s6637_s16  ;;  %v4941_v60 = vcombine.high %v4925_v39, %v4925_v39  ;;  %v5203_v58 = vrot.slane %v4925_v39, %v7195_v62 }
0x18d0   :  { %v5279_v24 = vsel %vm5277_vm1, %v8218_v38, %v5191_v54  ;;  %v5199_v19 = vrot.slane %v4942_v15, %v7195_v62  ;;  %v5280_v4 = vsel %vm5277_vm1, %v8225_v20, %v5195_v5 }
0x18d1   :  { %5302 = vrot.lane.b32.xlu1 %v5279_v24, %s6637_s16  ;;  %v5207_v47 = vrot.slane %v4939_v14, %v7195_v62  ;;  %v4943_v35 = vcombine.high %v4939_v14, %v4939_v14  ;;  %v5282_v27 = vsel %vm5277_vm1, %v8229_v30, %v5203_v58  ;;  %v5211_v45 = vrot.slane %v4941_v60, %v7195_v62 }
0x18d2   :  { %v5281_v44 = vsel %vm5277_vm1, %v8233_v11, %v5199_v19 }
0x18d3   :  { %5304 = vrot.lane.b32.xlu0 %v5280_v4, %s6637_s16  ;;  %v5283_v17 = vsel %vm5277_vm1, %v8237_v2, %v5207_v47  ;;  %v5215_v25 = vrot.slane %v4943_v35, %v7195_v62  ;;  %v5284_v56 = vsel %vm5277_vm1, %v8241_v61, %v5211_v45  ;;  %v5615_v2 = vld [vmem:[%s8349_s8] ss:$0 sm:$0xff] }
0x18d5   :  { %5306 = vrot.lane.b32.xlu1 %v5281_v44, %s6637_s16  ;;  %v5285_v38 = vsel %vm5277_vm1, %v8246_v43, %v5215_v25 }
0x18d7   :  { %5308 = vrot.lane.b32.xlu0 %v5282_v27, %s6637_s16 }
0x18d9   :  { %5310 = vrot.lane.b32.xlu1 %v5283_v17, %s6637_s16 }
0x18db   :  { %5312 = vrot.lane.b32.xlu0 %v5284_v56, %s6637_s16 }
0x18dd   :  { %5314 = vrot.lane.b32.xlu1 %v5285_v38, %s6637_s16 }
0x1941   :  { %v5301_v22 = vpop.permute.xlu0 %5300 }
0x1942   :  { %5883 = vmatprep.mubr.msk.f32.mxu0 %vm537_vm11, %v5301_v22 }
0x1943   :  { %v5303_v55 = vpop.permute.xlu1 %5302 }
0x1944   :  { %5884 = vmatmul.mubr.msk.f32.vlgmr.msra.gmra.mxu0 %vm537_vm11, %v5303_v55 }
0x1945   :  { %v5305_v50 = vpop.permute.xlu0 %5304 }
0x1946   :  { %5886 = vmatprep.mubr.msk.f32.mxu0 %vm537_vm11, %v5305_v50 }
0x1947   :  { %v5307_v62 = vpop.permute.xlu1 %5306 }
0x1948   :  { %5887 = vmatmul.mubr.msk.f32.gmra.mxu0 %vm537_vm11, %v5307_v62 }
0x1949   :  { %v5309_v20 = vpop.permute.xlu0 %5308 }
0x194a   :  { %5889 = vmatprep.mubr.msk.f32.mxu0 %vm537_vm11, %v5309_v20 }
0x194b   :  { %v5311_v30 = vpop.permute.xlu1 %5310 }
0x194c   :  { %5890 = vmatmul.mubr.msk.f32.gmra.mxu0 %vm537_vm11, %v5311_v30 }
0x194d   :  { %v5313_v10 = vpop.permute.xlu0 %5312 }
0x194e   :  { %5892 = vmatprep.mubr.msk.f32.mxu0 %vm537_vm11, %v5313_v10 }
0x194f   :  { %v5315_v11 = vpop.permute.xlu1 %5314 }
0x1950   :  { %5893 = vmatmul.mubr.msk.f32.gmra.mxu0 %vm537_vm11, %v5315_v11 }
0x1a04   :  { %v5885_v61 = vpop.f32.mrf.mxu0 }
0x1a05   :  { %v5407_v29 = vadd.f32 %v5885_v61, %v5615_v2 }
0x1a06   :  { %v5401_v43 = vpop.f32.mrf.mxu0 }
0x1a07   :  { %v5626_v41 = vmul.f32 -1.442695, %v5407_v29  ;;  %v5402_v6 = vadd.f32 %v5615_v2, %v5401_v43 }
0x1a08   :  { %v5888_v57 = vpop.f32.mrf.mxu0 }
0x1a09   :  { %6488 = vpow2.f32 %v5626_v41  ;;  %v5625_v52 = vmul.f32 -1.442695, %v5402_v6  ;;  %v5417_v12 = vadd.f32 %v5888_v57, %v5615_v2 }
0x1a0a   :  { %v5411_v13 = vpop.f32.mrf.mxu0 }
0x1a0b   :  { %6490 = vpow2.f32 %v5625_v52  ;;  %v5628_v0 = vmul.f32 -1.442695, %v5417_v12  ;;  %v5412_v40 = vadd.f32 %v5615_v2, %v5411_v13 }
0x1a0c   :  { %v5891_v59 = vpop.f32.mrf.mxu0 }
0x1a0d   :  { %6492 = vpow2.f32 %v5628_v0  ;;  %v5627_v7 = vmul.f32 -1.442695, %v5412_v40  ;;  %v5427_v48 = vadd.f32 %v5891_v59, %v5615_v2 }
0x1a0e   :  { %v5421_v23 = vpop.f32.mrf.mxu0 }
0x1a0f   :  { %6494 = vpow2.f32 %v5627_v7  ;;  %v5630_v8 = vmul.f32 -1.442695, %v5427_v48  ;;  %v5422_v49 = vadd.f32 %v5615_v2, %v5421_v23 }
0x1a10   :  { %v5894_v31 = vpop.f32.mrf.mxu0 }
0x1a11   :  { %6496 = vpow2.f32 %v5630_v8  ;;  %v5629_v3 = vmul.f32 -1.442695, %v5422_v49  ;;  %v5437_v18 = vadd.f32 %v5894_v31, %v5615_v2 }
0x1a12   :  { %v5431_v28 = vpop.f32.mrf.mxu0 }
0x1a13   :  { %6498 = vpow2.f32 %v5629_v3  ;;  %v5632_v21 = vmul.f32 -1.442695, %v5437_v18  ;;  %v5432_v33 = vadd.f32 %v5615_v2, %v5431_v28 }
0x1a15   :  { %6500 = vpow2.f32 %v5632_v21  ;;  %v5631_v46 = vmul.f32 -1.442695, %v5432_v33 }
0x1a16   :  { %v6489_v34 = vpop.eup %6488 }
0x1a17   :  { %v5465_v37 = vadd.f32 1.0, %v6489_v34  ;;  %6502 = vpow2.f32 %v5631_v46 }
0x1a18   :  { %v6491_v42 = vpop.eup %6490 }
0x1a19   :  { %6504 = vrcp.f32 %v5465_v37  ;;  %v5464_v26 = vadd.f32 1.0, %v6491_v42 }
0x1a1a   :  { %v6493_v53 = vpop.eup %6492 }
0x1a1b   :  { %6506 = vrcp.f32 %v5464_v26  ;;  %v5467_v1 = vadd.f32 1.0, %v6493_v53 }
0x1a1c   :  { %v6495_v32 = vpop.eup %6494 }
0x1a1d   :  { %6508 = vrcp.f32 %v5467_v1  ;;  %v5466_v16 = vadd.f32 1.0, %v6495_v32 }
0x1a1e   :  { %v6497_v51 = vpop.eup %6496 }
0x1a1f   :  { %6510 = vrcp.f32 %v5466_v16  ;;  %v5469_v36 = vadd.f32 1.0, %v6497_v51 }
0x1a20   :  { %v6499_v63 = vpop.eup %6498 }
0x1a21   :  { %6512 = vrcp.f32 %v5469_v36  ;;  %v5468_v15 = vadd.f32 1.0, %v6499_v63 }
0x1a22   :  { %v6501_v54 = vpop.eup %6500 }
0x1a23   :  { %6514 = vrcp.f32 %v5468_v15  ;;  %v5471_v39 = vadd.f32 1.0, %v6501_v54 }
0x1a24   :  { %v6503_v9 = vpop.eup %6502 }
0x1a25   :  { %6516 = vrcp.f32 %v5471_v39  ;;  %v5470_v5 = vadd.f32 1.0, %v6503_v9 }
0x1a26   :  { %v6505_v14 = vpop.eup %6504 }
0x1a27   :  { %5489 = vst.msk [vmem:[%s8350_s9 + $0x8] sm:$0xff] %vm537_vm11, %v6505_v14  ;;  %6518 = vrcp.f32 %v5470_v5 }
0x1a28   :  { %v6507_v24 = vpop.eup %6506 }
0x1a29   :  { %5488 = vst.msk [vmem:[%s8350_s9] sm:$0xff] %vm537_vm11, %v6507_v24 }
0x1a2a   :  { %v6509_v19 = vpop.eup %6508 }
0x1a2b   :  { %5491 = vst.msk [vmem:[%s8350_s9 + $0x18] sm:$0xff] %vm537_vm11, %v6509_v19 }
0x1a2c   :  { %v6511_v60 = vpop.eup %6510 }
0x1a2d   :  { %5490 = vst.msk [vmem:[%s8350_s9 + $0x10] sm:$0xff] %vm537_vm11, %v6511_v60 }
0x1a2e   :  { %v6513_v4 = vpop.eup %6512 }
0x1a2f   :  { %5493 = vst.msk [vmem:[%s8350_s9 + $0x28] sm:$0xff] %vm537_vm11, %v6513_v4 }
0x1a30   :  { %v6515_v58 = vpop.eup %6514 }
0x1a31   :  { %5492 = vst.msk [vmem:[%s8350_s9 + $0x20] sm:$0xff] %vm537_vm11, %v6515_v58 }
0x1a32   :  { %v6517_v44 = vpop.eup %6516 }
0x1a33   :  { %5495 = vst.msk [vmem:[%s8350_s9 + $0x38] sm:$0xff] %vm537_vm11, %v6517_v44 }
0x1a34   :  { %v6519_v47 = vpop.eup %6518 }
0x1a35   :  { %5494 = vst.msk [vmem:[%s8350_s9 + $0x30] sm:$0xff] %vm537_vm11, %v6519_v47 }
0x1a36   :  { %5500 = vsyncpa [#allocation3], 1 }
0x1a37   :  { %5501 = vsyncpa [#allocation5], 1 }
0x1a38   :  { %5502 = vsyncpa [#allocation8], 1 }

</bundles_post_ra>
